<compile_context>
chip_gen: v7x
topology: tpu7x:2x2x1
jax: 0.10.0
libtpu: 0.0.40
codegen_flags: <defaults>
</compile_context>

<pallas_src>
import functools

import jax
import jax.numpy as jnp
import numpy as np
from jax.experimental import pallas as pl
from jax.experimental.pallas import tpu as pltpu


def _saa_kernel(q_ref, kv_ref, mask_ref,
                wq_ref, wkv_ref, wp_ref, bp_ref, gamma_ref, beta_ref,
                out_ref, kvp_ref, score_ref,
                k_scr, vp_scr, q_scr,
                *, n_head, head_dim, ln_eps, compute_dtype, approx_recip,
                bf16_softmax):
    # Grid = (batch, q_tile).  Per-step blocks:
    #   q_ref  (1, tq, H)          kv_ref  (1, ks, H)         mask_ref (1, tq, ks) int8
    #   wq_ref (H, N*D) (scaled)   wkv_ref (H, 2*N*D) f32     wp_ref   (D, H)
    #   bp/gamma/beta (1, H)
    #   out_ref (1, tq, N*H)       kvp_ref (1, ks, 2*N*D)     score_ref (1, N, tq, ks)
    #   scratch: k_scr (N, ks, D), vp_scr (N, ks, H), q_scr (N, tq, D)  [compute_dtype]
    qt = pl.program_id(1)
    tq = q_ref.shape[1]
    hidden = bp_ref.shape[-1]
    nd = n_head * head_dim
    cdt = compute_dtype

    # ---- once per batch element (first q tile) -------------------------------------
    # kv projection stays f32 so the returned kv_proj matches the reference even on the
    # bf16 MXU path; K is re-laid out head-major and V is pre-multiplied by W_proj^T
    # (Vp) so every q tile needs only ONE deep-ks matmul per head.
    # NOTE: this residency (and kvp_ref written only at t==0) requires the q-tile grid
    # axis to remain "arbitrary" (sequential within a batch) -- do not megacore-shard it.
    @pl.when(qt == 0)
    def _():
        kvp = jnp.dot(kv_ref[0], wkv_ref[...],
                      preferred_element_type=jnp.float32)              # (ks, 2*N*D) f32
        kvp_ref[0] = kvp
        wp_c = wp_ref[...]                                             # already compute_dtype
        # TODO(synk): switch to lax.fori_loop / aligned reshape for large n_head.
        for h in range(n_head):
            lo = h * head_dim
            k_scr[h] = kvp[:, lo:lo + head_dim].astype(cdt)
            vp_scr[h] = jnp.dot(kvp[:, nd + lo:nd + lo + head_dim].astype(cdt), wp_c,
                                preferred_element_type=jnp.float32).astype(cdt)

    # ---- query projection for this q tile (1/sqrt(D) pre-folded into wq_ref) -------
    qc = jnp.dot(q_ref[0].astype(cdt), wq_ref[...],
                 preferred_element_type=jnp.float32).astype(cdt)       # (tq, N*D)
    for h in range(n_head):
        q_scr[h] = qc[:, h * head_dim:(h + 1) * head_dim]              # (N, tq, D)

    # ---- heads-batched QK^T, exact masked_fill, masked-score output ----------------
    s = jnp.einsum('nqd,nkd->nqk', q_scr[...], k_scr[...],
                   preferred_element_type=jnp.float32)                 # (N, tq, ks) f32
    msk = mask_ref[0] != 0                                             # nonzero == masked
    s = jnp.where(msk[None, :, :], -60000.0, s)                        # exact masked_fill_
    score_ref[0] = s                                                   # ks on lanes

    # ---- softmax; normalization deferred to after the PVp matmul (equivalent, and
    #      moves the divide from N*tq*ks elements to N*tq*H) -------------------------
    z = s - jnp.max(s, axis=-1, keepdims=True)
    if bf16_softmax:
        p = jnp.exp(z.astype(jnp.bfloat16))        # EUP bf16 fast path (v6e/v7x)
    else:
        p = jnp.exp(z)                             # exact f32 path
    denom = jnp.sum(p.astype(jnp.float32), axis=-1, keepdims=True)
    inv = pl.reciprocal(denom, approx=approx_recip)                    # (N, tq, 1) f32

    # ---- fused attention + output projection:  (P @ (V @ WpT)) * inv ---------------
    att = jnp.einsum('nqk,nkh->nqh', p, vp_scr[...],
                     preferred_element_type=jnp.float32)               # (N, tq, H) f32
    att = att * inv
    att2 = att.reshape(n_head * tq, hidden)                            # heads stacked on rows
    y = jnp.maximum(att2 + bp_ref[...], 0.0)                           # bias + ReLU

    # LayerNorm(hidden_dim), biased variance, eps = 1e-5 (f32 math).
    mu = jnp.mean(y, axis=-1, keepdims=True)
    var = jnp.mean(jnp.square(y - mu), axis=-1, keepdims=True)
    yn = (y - mu) * jax.lax.rsqrt(var + ln_eps)
    yn = yn * gamma_ref[...] + beta_ref[...]                           # rows ordered (head, q)

    # Lane-dense output block (tq, N*H): single full-width store per step.
    out_ref[0] = jnp.concatenate(
        [yn[h * tq:(h + 1) * tq, :] for h in range(n_head)], axis=-1)


def _physical_vmem_bytes():
    """Best-effort VMEM capacity; conservative 64 MiB fallback (v7x floor)."""
    try:
        info = pltpu.get_tpu_info()
        cap = getattr(info, "vmem_capacity_bytes", None)
        if cap:
            return int(cap)
    except Exception:
        pass
    return 64 * 1024 * 1024


def sentence_aware_att(q, kv, mask, params, *, n_head, head_dim,
                       q_tile=None, compute_dtype=jnp.float32,
                       score_layout="bqkn", vmem_limit_bytes=None,
                       single_buffer_constants=True):
    """Fused SentenceAwareAtt forward (eval mode, pre_lnorm=False, mem=None).

    Returns (out, kv_proj, masked_score).
      score_layout="bqkn": PyTorch layout (bs, qs, ks, n_head) -- costs one HBM transpose.
      score_layout="bnqk": head-major (bs, n_head, qs, ks) as produced -- no transpose.
    On v5e prefer compute_dtype=jnp.float32 (no bf16 VPU/EUP there).
    """
    bs, qs, hidden_dim = q.shape
    ks = kv.shape[1]
    nd = n_head * head_dim
    assert head_dim == hidden_dim, (
        "SentenceAwareAtt.proj is Linear(hidden, hidden) applied to the un-flattened "
        "(bs, qs, n_head, head_dim) tensor => requires head_dim == hidden_dim")
    assert score_layout in ("bqkn", "bnqk")
    scale = 1.0 / (head_dim ** 0.5)
    cdt = np.dtype(compute_dtype)
    cdt_b = cdt.itemsize

    # ---- per-generation VMEM budget / q_tile selection ------------------------------
    phys_vmem = _physical_vmem_bytes()

    def _est_vmem(tq):
        b = 2 * tq * hidden_dim * 4                    # q block (double buffered)
        b += 2 * ks * hidden_dim * 4                   # kv block
        b += 2 * tq * ks * 4                           # mask block (conservative 4B/elem)
        b += 2 * (hidden_dim * nd * cdt_b + hidden_dim * 2 * nd * 4
                  + head_dim * hidden_dim * cdt_b + 3 * hidden_dim * 4)  # weights / LN
        b += 2 * tq * n_head * hidden_dim * 4          # out block
        b += 2 * ks * 2 * nd * 4                       # kv_proj out block (t-resident)
        b += 2 * n_head * tq * ks * 4                  # masked-score out block
        b += (n_head * ks * head_dim + n_head * ks * hidden_dim
              + n_head * tq * head_dim) * cdt_b        # K / Vp / Q scratch
        return b

    budget = int(0.75 * phys_vmem)
    if q_tile is None:
        cands = [d for d in range(qs, 0, -1)
                 if qs % d == 0 and (d == qs or d % 8 == 0)]
        q_tile = next((d for d in cands if _est_vmem(d) <= budget), cands[-1])
    assert qs % q_tile == 0, "qs must be divisible by q_tile"
    assert q_tile == qs or q_tile % 8 == 0, "q_tile must be a multiple of 8 (sublanes)"
    n_qt = qs // q_tile

    if vmem_limit_bytes is None:
        vmem_limit_bytes = int(min(0.9 * phys_vmem,
                                   max(_est_vmem(q_tile) + (4 << 20), 16 << 20)))

    # ---- mask: int8 when q-tile offsets respect int8 sublane packing (32 rows) ------
    if q_tile == qs or q_tile % 32 == 0:
        if mask.dtype != jnp.int8:
            mask = (mask != 0).astype(jnp.int8)        # 4x less mask DMA / VMEM
    elif np.dtype(mask.dtype).itemsize != 4:
        mask = (mask != 0).astype(jnp.int32)           # keep 32-bit tiling for odd q_tile

    # ---- parameter prep: fold 1/sqrt(D) into W_q^T; pre-cast MXU-only weights -------
    wq_in = (params["wqT"] * scale).astype(cdt)        # scale folded -> no per-score mul
    wkv_in = params["wkvT"].astype(jnp.float32)        # f32: kv_proj is a returned output
    wp_in = params["wpT"].astype(cdt)
    bp_in = params["bp"].astype(jnp.float32)
    gamma_in = params["gamma"].astype(jnp.float32)
    beta_in = params["beta"].astype(jnp.float32)

    approx_recip = cdt == np.dtype(jnp.bfloat16)       # exact recip on the f32 path
    bf16_softmax = cdt == np.dtype(jnp.bfloat16)       # EUP bf16 exp on v6e/v7x

    kernel = functools.partial(
        _saa_kernel, n_head=n_head, head_dim=head_dim, ln_eps=1e-5,
        compute_dtype=cdt, approx_recip=approx_recip, bf16_softmax=bf16_softmax)

    out_shapes = (
        jax.ShapeDtypeStruct((bs, qs, n_head * hidden_dim), jnp.float32),
        jax.ShapeDtypeStruct((bs, ks, 2 * nd), jnp.float32),
        jax.ShapeDtypeStruct((bs, n_head, qs, ks), jnp.float32),
    )

    def _call(use_single_buffer):
        # Grid-invariant weights/bias/LN params and the t-invariant kv block only need
        # one VMEM buffer; default double-buffering would charge 2x their size.
        cmode = dict(pipeline_mode=pl.Buffered(1)) if use_single_buffer else {}
        grid_spec = pltpu.PrefetchScalarGridSpec(
            num_scalar_prefetch=0,
            grid=(bs, n_qt),
            in_specs=[
                pl.BlockSpec((1, q_tile, hidden_dim), lambda b, t: (b, t, 0)),        # q
                pl.BlockSpec((1, ks, hidden_dim), lambda b, t: (b, 0, 0), **cmode),   # kv
                pl.BlockSpec((1, q_tile, ks), lambda b, t: (b, t, 0)),                # mask
                pl.BlockSpec((hidden_dim, nd), lambda b, t: (0, 0), **cmode),         # W_q^T*scale
                pl.BlockSpec((hidden_dim, 2 * nd), lambda b, t: (0, 0), **cmode),     # W_kv^T
                pl.BlockSpec((head_dim, hidden_dim), lambda b, t: (0, 0), **cmode),   # W_proj^T
                pl.BlockSpec((1, hidden_dim), lambda b, t: (0, 0), **cmode),          # b_proj
                pl.BlockSpec((1, hidden_dim), lambda b, t: (0, 0), **cmode),          # ln gamma
                pl.BlockSpec((1, hidden_dim), lambda b, t: (0, 0), **cmode),          # ln beta
            ],
            out_specs=[
                pl.BlockSpec((1, q_tile, n_head * hidden_dim), lambda b, t: (b, t, 0)),
                pl.BlockSpec((1, ks, 2 * nd), lambda b, t: (b, 0, 0)),   # written at t==0
                pl.BlockSpec((1, n_head, q_tile, ks), lambda b, t: (b, 0, t, 0)),
            ],
            scratch_shapes=[
                pltpu.VMEM((n_head, ks, head_dim), cdt),       # K head-major
                pltpu.VMEM((n_head, ks, hidden_dim), cdt),     # Vp = V @ W_proj^T
                pltpu.VMEM((n_head, q_tile, head_dim), cdt),   # Q head-major
            ],
        )
        return pl.pallas_call(
            kernel,
            out_shape=out_shapes,
            grid_spec=grid_spec,
            compiler_params=pltpu.CompilerParams(
                # kvp/K/Vp residency (written only at t==0) needs the q-tile axis to be
                # "arbitrary".  TODO(synk): for bs < #TensorCores, hoist the kv projection
                # out of the kernel so this axis could be made parallel (v7x megacore).
                dimension_semantics=("parallel", "arbitrary"),
                vmem_limit_bytes=vmem_limit_bytes),
        )(q, kv, mask, wq_in, wkv_in, wp_in, bp_in, gamma_in, beta_in)

    if single_buffer_constants:
        try:
            out_flat, kv_proj, score_hm = _call(True)
        except Exception:     # pl.Buffered(1) unsupported on this jax -> default buffering
            out_flat, kv_proj, score_hm = _call(False)
    else:
        out_flat, kv_proj, score_hm = _call(False)

    # Free row-major reshape (no data movement): (bs, qs, N*H) -> (bs, qs, N, H).
    out = out_flat.reshape(bs, qs, n_head, hidden_dim)
    if score_layout == "bnqk":
        return out, kv_proj, score_hm                  # skip the HBM transpose
    # PyTorch layout (bs, qs, ks, n_head): this transpose re-reads/re-writes the full
    # score tensor in HBM -- use score_layout="bnqk" when the consumer accepts head-major.
    return out, kv_proj, jnp.transpose(score_hm, (0, 2, 3, 1))


def reference_forward(q, kv, mask, params, *, n_head, head_dim):
    """Pure-JAX reference mirroring the PyTorch forward (eval, pre_lnorm=False, mem=None)."""
    bs, qs, hidden_dim = q.shape
    ks = kv.shape[1]
    scale = 1.0 / (head_dim ** 0.5)
    hp = jax.lax.Precision.HIGHEST
    kv_proj = jnp.dot(kv, params["wkvT"], precision=hp)
    key, value = jnp.split(kv_proj, 2, axis=-1)
    query = jnp.dot(q, params["wqT"], precision=hp)
    qh = query.reshape(bs, qs, n_head, head_dim)
    kh = key.reshape(bs, ks, n_head, head_dim)
    vh = value.reshape(bs, ks, n_head, head_dim)
    score = jnp.einsum('bqnd,bknd->bqkn', qh, kh, precision=hp) * scale
    score = jnp.where(mask[..., None] != 0, -60000.0, score)
    prob = jax.nn.softmax(score, axis=2)
    att = jnp.einsum('bqkn,bknd->bqnd', prob, vh, precision=hp)   # (bs, qs, N, D)
    y = jnp.maximum(jnp.dot(att, params["wpT"], precision=hp) + params["bp"][0], 0.0)
    mu = y.mean(-1, keepdims=True)
    var = ((y - mu) ** 2).mean(-1, keepdims=True)
    out = (y - mu) / jnp.sqrt(var + 1e-5) * params["gamma"][0] + params["beta"][0]
    return out, kv_proj, score


if __name__ == "__main__":
    # SentenceAwareAtt.proj (Linear(hidden, hidden)) is applied to the un-flattened
    # (bs, qs, n_head, head_dim) tensor, so the PyTorch forward only works when
    # head_dim == hidden_dim -- mirrored here.  Shapes are lane/sublane aligned
    # (ks, head_dim multiples of 128; q_tile multiple of 32) per the perf review.
    hidden_dim = 128
    n_head = 2
    head_dim = hidden_dim
    bs, qs, ks = 2, 64, 128
    nd = n_head * head_dim

    key = jax.random.PRNGKey(0)
    k_q, k_kv, k_m, k_wq, k_wkv, k_wp, k_bp, k_g, k_b = jax.random.split(key, 9)

    q = jax.random.normal(k_q, (bs, qs, hidden_dim), jnp.float32)
    kv = jax.random.normal(k_kv, (bs, ks, hidden_dim), jnp.float32)
    # mask: nonzero == masked position (matches mask.bool() semantics in PyTorch).
    mask = (jax.random.uniform(k_m, (bs, qs, ks)) < 0.2).astype(jnp.int8)

    params = {
        # weights stored pre-transposed as [in, out] (PyTorch Linear does x @ W^T).
        "wqT": 0.05 * jax.random.normal(k_wq, (hidden_dim, nd), jnp.float32),
        "wkvT": 0.05 * jax.random.normal(k_wkv, (hidden_dim, 2 * nd), jnp.float32),
        "wpT": 0.05 * jax.random.normal(k_wp, (head_dim, hidden_dim), jnp.float32),
        "bp": 0.05 * jax.random.normal(k_bp, (1, hidden_dim), jnp.float32),
        "gamma": 1.0 + 0.05 * jax.random.normal(k_g, (1, hidden_dim), jnp.float32),
        "beta": 0.05 * jax.random.normal(k_b, (1, hidden_dim), jnp.float32),
    }

    out_r, kvp_r, score_r = reference_forward(q, kv, mask, params,
                                              n_head=n_head, head_dim=head_dim)

    # --- f32 MXU path with explicit q tiling (exercises the q-tile grid axis) ---
    out, kvp, score = sentence_aware_att(q, kv, mask, params, n_head=n_head,
                                         head_dim=head_dim, q_tile=32,
                                         compute_dtype=jnp.float32)
    jax.block_until_ready((out, kvp, score))
    np.testing.assert_allclose(np.asarray(kvp), np.asarray(kvp_r), atol=1e-4, rtol=1e-4)
    np.testing.assert_allclose(np.asarray(score), np.asarray(score_r), atol=1e-4, rtol=1e-4)
    # Vp fusion changes matmul association vs the reference -> slightly wider tolerance.
    np.testing.assert_allclose(np.asarray(out), np.asarray(out_r), atol=2e-4, rtol=2e-4)

    # --- head-major score layout (skips the wrapper HBM transpose), auto q_tile ---
    out2, kvp2, score_hm = sentence_aware_att(q, kv, mask, params, n_head=n_head,
                                              head_dim=head_dim, score_layout="bnqk")
    jax.block_until_ready((out2, kvp2, score_hm))
    np.testing.assert_allclose(np.asarray(score_hm),
                               np.asarray(jnp.transpose(score_r, (0, 3, 1, 2))),
                               atol=1e-4, rtol=1e-4)
    np.testing.assert_allclose(np.asarray(out2), np.asarray(out_r), atol=2e-4, rtol=2e-4)

    # --- bf16 MXU-input path (f32 accumulation); kv_proj stays f32-exact ---
    out_b, kvp_b, score_b = sentence_aware_att(q, kv, mask, params, n_head=n_head,
                                               head_dim=head_dim, q_tile=32,
                                               compute_dtype=jnp.bfloat16)
    jax.block_until_ready((out_b, kvp_b, score_b))
    np.testing.assert_allclose(np.asarray(kvp_b), np.asarray(kvp_r), atol=1e-4, rtol=1e-4)
    np.testing.assert_allclose(np.asarray(score_b), np.asarray(score_r), atol=5e-2, rtol=5e-2)
    np.testing.assert_allclose(np.asarray(out_b), np.asarray(out_r), atol=5e-2, rtol=5e-2)

    print("KERNEL_OK")
</pallas_src>

<mosaic_0001>
module attributes {stable_mosaic.version = 11 : i64} {
  func.func @_saa_kernel(%arg0: i32, %arg1: i32, %arg2: memref<1x32x128xf32, #tpu.memory_space<vmem>>, %arg3: memref<1x128x128xf32, #tpu.memory_space<vmem>>, %arg4: memref<1x32x128xi8, #tpu.memory_space<vmem>>, %arg5: memref<128x256xf32, #tpu.memory_space<vmem>>, %arg6: memref<128x512xf32, #tpu.memory_space<vmem>>, %arg7: memref<128x128xf32, #tpu.memory_space<vmem>>, %arg8: memref<1x128xf32, #tpu.memory_space<vmem>>, %arg9: memref<1x128xf32, #tpu.memory_space<vmem>>, %arg10: memref<1x128xf32, #tpu.memory_space<vmem>>, %arg11: memref<1x32x256xf32, #tpu.memory_space<vmem>>, %arg12: memref<1x128x512xf32, #tpu.memory_space<vmem>>, %arg13: memref<1x2x32x128xf32, #tpu.memory_space<vmem>>, %arg14: memref<2x128x128xf32, #tpu.memory_space<vmem>>, %arg15: memref<2x128x128xf32, #tpu.memory_space<vmem>>, %arg16: memref<2x32x128xf32, #tpu.memory_space<vmem>>) attributes {dimension_semantics = [#tpu.dimension_semantics<parallel>, #tpu.dimension_semantics<arbitrary>], iteration_bounds = array<i64: 2, 2>, scalar_prefetch = 0 : i64, scratch_operands = 3 : i64, tpu.core_type = #tpu.core_type<tc>, window_params = [{transform_indices = @transform_0, window_bounds = array<i64: 1, 32, 128>}, {pipeline_mode = #tpu.pipeline_mode<synchronous>, transform_indices = @transform_1, window_bounds = array<i64: 1, 128, 128>}, {transform_indices = @transform_2, window_bounds = array<i64: 1, 32, 128>}, {pipeline_mode = #tpu.pipeline_mode<synchronous>, transform_indices = @transform_3, window_bounds = array<i64: 128, 256>}, {pipeline_mode = #tpu.pipeline_mode<synchronous>, transform_indices = @transform_4, window_bounds = array<i64: 128, 512>}, {pipeline_mode = #tpu.pipeline_mode<synchronous>, transform_indices = @transform_5, window_bounds = array<i64: 128, 128>}, {pipeline_mode = #tpu.pipeline_mode<synchronous>, transform_indices = @transform_6, window_bounds = array<i64: 1, 128>}, {pipeline_mode = #tpu.pipeline_mode<synchronous>, transform_indices = @transform_7, window_bounds = array<i64: 1, 128>}, {pipeline_mode = #tpu.pipeline_mode<synchronous>, transform_indices = @transform_8, window_bounds = array<i64: 1, 128>}, {transform_indices = @transform_9, window_bounds = array<i64: 1, 32, 256>}, {transform_indices = @transform_10, window_bounds = array<i64: 1, 128, 512>}, {transform_indices = @transform_11, window_bounds = array<i64: 1, 2, 32, 128>}]} {
    %c0_i32 = arith.constant 0 : i32
    %0 = arith.cmpi eq, %arg1, %c0_i32 : i32
    %1 = arith.extui %0 : i1 to i32
    %c0_i32_0 = arith.constant 0 : i32
    %2 = arith.cmpi ne, %1, %c0_i32_0 : i32
    scf.if %2 {
      %c0_46 = arith.constant 0 : index
      %c0_47 = arith.constant 0 : index
      %c0_48 = arith.constant 0 : index
      %78 = vector.load %arg3[%c0_46, %c0_47, %c0_48] : memref<1x128x128xf32, #tpu.memory_space<vmem>>, vector<1x128x128xf32>
      %79 = vector.shape_cast %78 : vector<1x128x128xf32> to vector<128x128xf32>
      %c0_49 = arith.constant 0 : index
      %c0_50 = arith.constant 0 : index
      %80 = vector.load %arg6[%c0_49, %c0_50] : memref<128x512xf32, #tpu.memory_space<vmem>>, vector<128x512xf32>
      %cst_51 = arith.constant dense<0.000000e+00> : vector<128x512xf32>
      %81 = tpu.matmul %79, %80, %cst_51 {dimension_numbers = #tpu.dot_dimension_numbers<[1], [0], [0], [1], [0, 0, 1, 1], [], []>} : vector<128x128xf32>, vector<128x512xf32>, vector<128x512xf32> -> vector<128x512xf32>
      %c0_52 = arith.constant 0 : index
      %c0_53 = arith.constant 0 : index
      %c0_54 = arith.constant 0 : index
      %82 = vector.load %arg12[%c0_52, %c0_53, %c0_54] : memref<1x128x512xf32, #tpu.memory_space<vmem>>, vector<1x128x512xf32>
      %83 = vector.shape_cast %82 : vector<1x128x512xf32> to vector<128x512xf32>
      %84 = vector.shape_cast %81 : vector<128x512xf32> to vector<1x128x512xf32>
      tpu.vector_store %arg12[%c0_52, %c0_53, %c0_54], %84 {strides = array<i32>} : memref<1x128x512xf32, #tpu.memory_space<vmem>>, vector<1x128x512xf32>,
      %c0_55 = arith.constant 0 : index
      %c0_56 = arith.constant 0 : index
      %85 = vector.load %arg7[%c0_55, %c0_56] : memref<128x128xf32, #tpu.memory_space<vmem>>, vector<128x128xf32>
      %86 = vector.extract_strided_slice %81 {offsets = [0, 0], sizes = [128, 128], strides = [1, 1]} : vector<128x512xf32> to vector<128x128xf32>
      %c0_57 = arith.constant 0 : index
      %c0_58 = arith.constant 0 : index
      %c0_59 = arith.constant 0 : index
      %87 = vector.load %arg14[%c0_57, %c0_58, %c0_59] : memref<2x128x128xf32, #tpu.memory_space<vmem>>, vector<1x128x128xf32>
      %88 = vector.shape_cast %87 : vector<1x128x128xf32> to vector<128x128xf32>
      %89 = vector.shape_cast %86 : vector<128x128xf32> to vector<1x128x128xf32>
      tpu.vector_store %arg14[%c0_57, %c0_58, %c0_59], %89 {strides = array<i32>} : memref<2x128x128xf32, #tpu.memory_space<vmem>>, vector<1x128x128xf32>,
      %90 = vector.extract_strided_slice %81 {offsets = [0, 256], sizes = [128, 128], strides = [1, 1]} : vector<128x512xf32> to vector<128x128xf32>
      %cst_60 = arith.constant dense<0.000000e+00> : vector<128x128xf32>
      %91 = tpu.matmul %90, %85, %cst_60 {dimension_numbers = #tpu.dot_dimension_numbers<[1], [0], [0], [1], [0, 0, 1, 1], [], []>} : vector<128x128xf32>, vector<128x128xf32>, vector<128x128xf32> -> vector<128x128xf32>
      %c0_61 = arith.constant 0 : index
      %c0_62 = arith.constant 0 : index
      %c0_63 = arith.constant 0 : index
      %92 = vector.load %arg15[%c0_61, %c0_62, %c0_63] : memref<2x128x128xf32, #tpu.memory_space<vmem>>, vector<1x128x128xf32>
      %93 = vector.shape_cast %92 : vector<1x128x128xf32> to vector<128x128xf32>
      %94 = vector.shape_cast %91 : vector<128x128xf32> to vector<1x128x128xf32>
      tpu.vector_store %arg15[%c0_61, %c0_62, %c0_63], %94 {strides = array<i32>} : memref<2x128x128xf32, #tpu.memory_space<vmem>>, vector<1x128x128xf32>,
      %95 = vector.extract_strided_slice %81 {offsets = [0, 128], sizes = [128, 128], strides = [1, 1]} : vector<128x512xf32> to vector<128x128xf32>
      %c1_64 = arith.constant 1 : index
      %c0_65 = arith.constant 0 : index
      %c0_66 = arith.constant 0 : index
      %96 = vector.load %arg14[%c1_64, %c0_65, %c0_66] : memref<2x128x128xf32, #tpu.memory_space<vmem>>, vector<1x128x128xf32>
      %97 = vector.shape_cast %96 : vector<1x128x128xf32> to vector<128x128xf32>
      %98 = vector.shape_cast %95 : vector<128x128xf32> to vector<1x128x128xf32>
      tpu.vector_store %arg14[%c1_64, %c0_65, %c0_66], %98 {strides = array<i32>} : memref<2x128x128xf32, #tpu.memory_space<vmem>>, vector<1x128x128xf32>,
      %99 = vector.extract_strided_slice %81 {offsets = [0, 384], sizes = [128, 128], strides = [1, 1]} : vector<128x512xf32> to vector<128x128xf32>
      %cst_67 = arith.constant dense<0.000000e+00> : vector<128x128xf32>
      %100 = tpu.matmul %99, %85, %cst_67 {dimension_numbers = #tpu.dot_dimension_numbers<[1], [0], [0], [1], [0, 0, 1, 1], [], []>} : vector<128x128xf32>, vector<128x128xf32>, vector<128x128xf32> -> vector<128x128xf32>
      %c1_68 = arith.constant 1 : index
      %c0_69 = arith.constant 0 : index
      %c0_70 = arith.constant 0 : index
      %101 = vector.load %arg15[%c1_68, %c0_69, %c0_70] : memref<2x128x128xf32, #tpu.memory_space<vmem>>, vector<1x128x128xf32>
      %102 = vector.shape_cast %101 : vector<1x128x128xf32> to vector<128x128xf32>
      %103 = vector.shape_cast %100 : vector<128x128xf32> to vector<1x128x128xf32>
      tpu.vector_store %arg15[%c1_68, %c0_69, %c0_70], %103 {strides = array<i32>} : memref<2x128x128xf32, #tpu.memory_space<vmem>>, vector<1x128x128xf32>,
    } else {
    }
    %c0 = arith.constant 0 : index
    %c0_1 = arith.constant 0 : index
    %c0_2 = arith.constant 0 : index
    %3 = vector.load %arg2[%c0, %c0_1, %c0_2] : memref<1x32x128xf32, #tpu.memory_space<vmem>>, vector<1x32x128xf32>
    %4 = vector.shape_cast %3 : vector<1x32x128xf32> to vector<32x128xf32>
    %c0_3 = arith.constant 0 : index
    %c0_4 = arith.constant 0 : index
    %5 = vector.load %arg5[%c0_3, %c0_4] : memref<128x256xf32, #tpu.memory_space<vmem>>, vector<128x256xf32>
    %cst = arith.constant dense<0.000000e+00> : vector<32x256xf32>
    %6 = tpu.matmul %4, %5, %cst {dimension_numbers = #tpu.dot_dimension_numbers<[1], [0], [0], [1], [0, 0, 1, 1], [], []>} : vector<32x128xf32>, vector<128x256xf32>, vector<32x256xf32> -> vector<32x256xf32>
    %7 = vector.extract_strided_slice %6 {offsets = [0, 0], sizes = [32, 128], strides = [1, 1]} : vector<32x256xf32> to vector<32x128xf32>
    %c0_5 = arith.constant 0 : index
    %c0_6 = arith.constant 0 : index
    %c0_7 = arith.constant 0 : index
    %8 = vector.load %arg16[%c0_5, %c0_6, %c0_7] : memref<2x32x128xf32, #tpu.memory_space<vmem>>, vector<1x32x128xf32>
    %9 = vector.shape_cast %8 : vector<1x32x128xf32> to vector<32x128xf32>
    %10 = vector.shape_cast %7 : vector<32x128xf32> to vector<1x32x128xf32>
    tpu.vector_store %arg16[%c0_5, %c0_6, %c0_7], %10 {strides = array<i32>} : memref<2x32x128xf32, #tpu.memory_space<vmem>>, vector<1x32x128xf32>,
    %11 = vector.extract_strided_slice %6 {offsets = [0, 128], sizes = [32, 128], strides = [1, 1]} : vector<32x256xf32> to vector<32x128xf32>
    %c1 = arith.constant 1 : index
    %c0_8 = arith.constant 0 : index
    %c0_9 = arith.constant 0 : index
    %12 = vector.load %arg16[%c1, %c0_8, %c0_9] : memref<2x32x128xf32, #tpu.memory_space<vmem>>, vector<1x32x128xf32>
    %13 = vector.shape_cast %12 : vector<1x32x128xf32> to vector<32x128xf32>
    %14 = vector.shape_cast %11 : vector<32x128xf32> to vector<1x32x128xf32>
    tpu.vector_store %arg16[%c1, %c0_8, %c0_9], %14 {strides = array<i32>} : memref<2x32x128xf32, #tpu.memory_space<vmem>>, vector<1x32x128xf32>,
    %c0_10 = arith.constant 0 : index
    %c0_11 = arith.constant 0 : index
    %c0_12 = arith.constant 0 : index
    %15 = vector.load %arg16[%c0_10, %c0_11, %c0_12] : memref<2x32x128xf32, #tpu.memory_space<vmem>>, vector<2x32x128xf32>
    %c0_13 = arith.constant 0 : index
    %c0_14 = arith.constant 0 : index
    %c0_15 = arith.constant 0 : index
    %16 = vector.load %arg14[%c0_13, %c0_14, %c0_15] : memref<2x128x128xf32, #tpu.memory_space<vmem>>, vector<2x128x128xf32>
    "tpu.trace_start"() <{level = 10 : i32, message = "nqd,nkd->nqk"}> : () -> ()
    %cst_16 = arith.constant dense<0.000000e+00> : vector<2x32x128xf32>
    %17 = tpu.matmul %15, %16, %cst_16 {dimension_numbers = #tpu.dot_dimension_numbers<[2], [2], [1], [1], [0, 0, 0, 1, 1, 1], [0], [0]>} : vector<2x32x128xf32>, vector<2x128x128xf32>, vector<2x32x128xf32> -> vector<2x32x128xf32>
    "tpu.trace_stop"() : () -> ()
    %c0_17 = arith.constant 0 : index
    %c0_18 = arith.constant 0 : index
    %c0_19 = arith.constant 0 : index
    %18 = vector.load %arg4[%c0_17, %c0_18, %c0_19] : memref<1x32x128xi8, #tpu.memory_space<vmem>>, vector<1x32x128xi8>
    %19 = vector.shape_cast %18 : vector<1x32x128xi8> to vector<32x128xi8>
    %c0_i8 = arith.constant 0 : i8
    %20 = vector.broadcast %c0_i8 : i8 to vector<32x128xi8>
    %21 = arith.cmpi ne, %19, %20 : vector<32x128xi8>
    %22 = vector.shape_cast %21 : vector<32x128xi1> to vector<1x32x128xi1>
    %cst_20 = arith.constant -6.000000e+04 : f32
    %23 = vector.shape_cast %22 : vector<1x32x128xi1> to vector<1x32x128xi1>
    %24 = vector.broadcast %23 : vector<1x32x128xi1> to vector<2x32x128xi1>
    %25 = vector.broadcast %cst_20 : f32 to vector<2x32x128xf32>
    %26 = arith.select %24, %25, %17 : vector<2x32x128xi1>, vector<2x32x128xf32>
    %c0_21 = arith.constant 0 : index
    %c0_22 = arith.constant 0 : index
    %c0_23 = arith.constant 0 : index
    %c0_24 = arith.constant 0 : index
    %27 = vector.load %arg13[%c0_21, %c0_22, %c0_23, %c0_24] : memref<1x2x32x128xf32, #tpu.memory_space<vmem>>, vector<1x2x32x128xf32>
    %28 = vector.shape_cast %27 : vector<1x2x32x128xf32> to vector<2x32x128xf32>
    %29 = vector.shape_cast %26 : vector<2x32x128xf32> to vector<1x2x32x128xf32>
    tpu.vector_store %arg13[%c0_21, %c0_22, %c0_23, %c0_24], %29 {strides = array<i32>} : memref<1x2x32x128xf32, #tpu.memory_space<vmem>>, vector<1x2x32x128xf32>,
    %cst_25 = arith.constant dense<0xFF800000> : vector<2x32xf32>
    %30 = vector.multi_reduction <maximumf>, %26, %cst_25 [2] : vector<2x32x128xf32> to vector<2x32xf32>
    %31 = vector.shape_cast %30 : vector<2x32xf32> to vector<2x32x1xf32>
    %32 = vector.broadcast %31 : vector<2x32x1xf32> to vector<2x32x128xf32>
    %33 = arith.subf %26, %32 : vector<2x32x128xf32>
    %34 = math.exp %33 : vector<2x32x128xf32>
    %cst_26 = arith.constant dense<0.000000e+00> : vector<2x32xf32>
    %35 = vector.multi_reduction <add>, %34, %cst_26 [2] : vector<2x32x128xf32> to vector<2x32xf32>
    %36 = vector.shape_cast %35 : vector<2x32xf32> to vector<2x32x1xf32>
    %37 = tpu.reciprocal %36 : vector<2x32x1xf32> -> vector<2x32x1xf32>
    %c0_27 = arith.constant 0 : index
    %c0_28 = arith.constant 0 : index
    %c0_29 = arith.constant 0 : index
    %38 = vector.load %arg15[%c0_27, %c0_28, %c0_29] : memref<2x128x128xf32, #tpu.memory_space<vmem>>, vector<2x128x128xf32>
    "tpu.trace_start"() <{level = 10 : i32, message = "nqk,nkh->nqh"}> : () -> ()
    %cst_30 = arith.constant dense<0.000000e+00> : vector<2x32x128xf32>
    %39 = tpu.matmul %34, %38, %cst_30 {dimension_numbers = #tpu.dot_dimension_numbers<[2], [1], [1], [2], [0, 0, 0, 1, 1, 2], [0], [0]>} : vector<2x32x128xf32>, vector<2x128x128xf32>, vector<2x32x128xf32> -> vector<2x32x128xf32>
    "tpu.trace_stop"() : () -> ()
    %40 = vector.broadcast %37 : vector<2x32x1xf32> to vector<2x32x128xf32>
    %41 = arith.mulf %39, %40 : vector<2x32x128xf32>
    %42 = vector.shape_cast %41 : vector<2x32x128xf32> to vector<64x128xf32>
    %c0_31 = arith.constant 0 : index
    %c0_32 = arith.constant 0 : index
    %43 = vector.load %arg8[%c0_31, %c0_32] : memref<1x128xf32, #tpu.memory_space<vmem>>, vector<1x128xf32>
    %44 = vector.broadcast %43 : vector<1x128xf32> to vector<64x128xf32>
    %45 = arith.addf %42, %44 : vector<64x128xf32>
    %cst_33 = arith.constant 0.000000e+00 : f32
    %46 = vector.broadcast %cst_33 : f32 to vector<64x128xf32>
    %47 = arith.maximumf %45, %46 : vector<64x128xf32>
    %cst_34 = arith.constant dense<0.000000e+00> : vector<64xf32>
    %48 = vector.multi_reduction <add>, %47, %cst_34 [1] : vector<64x128xf32> to vector<64xf32>
    %49 = vector.shape_cast %48 : vector<64xf32> to vector<64x1xf32>
    %cst_35 = arith.constant 1.280000e+02 : f32
    %50 = vector.broadcast %cst_35 : f32 to vector<64x1xf32>
    %51 = arith.divf %49, %50 : vector<64x1xf32>
    %52 = vector.broadcast %51 : vector<64x1xf32> to vector<64x128xf32>
    %53 = arith.subf %47, %52 : vector<64x128xf32>
    %54 = arith.mulf %53, %53 : vector<64x128xf32>
    %cst_36 = arith.constant dense<0.000000e+00> : vector<64xf32>
    %55 = vector.multi_reduction <add>, %54, %cst_36 [1] : vector<64x128xf32> to vector<64xf32>
    %56 = vector.shape_cast %55 : vector<64xf32> to vector<64x1xf32>
    %cst_37 = arith.constant 1.280000e+02 : f32
    %57 = vector.broadcast %cst_37 : f32 to vector<64x1xf32>
    %58 = arith.divf %56, %57 : vector<64x1xf32>
    %59 = vector.broadcast %51 : vector<64x1xf32> to vector<64x128xf32>
    %60 = arith.subf %47, %59 : vector<64x128xf32>
    %cst_38 = arith.constant 9.99999974E-6 : f32
    %61 = vector.broadcast %cst_38 : f32 to vector<64x1xf32>
    %62 = arith.addf %58, %61 : vector<64x1xf32>
    %63 = math.rsqrt %62 : vector<64x1xf32>
    %64 = vector.broadcast %63 : vector<64x1xf32> to vector<64x128xf32>
    %65 = arith.mulf %60, %64 : vector<64x128xf32>
    %c0_39 = arith.constant 0 : index
    %c0_40 = arith.constant 0 : index
    %66 = vector.load %arg9[%c0_39, %c0_40] : memref<1x128xf32, #tpu.memory_space<vmem>>, vector<1x128xf32>
    %67 = vector.broadcast %66 : vector<1x128xf32> to vector<64x128xf32>
    %68 = arith.mulf %65, %67 : vector<64x128xf32>
    %c0_41 = arith.constant 0 : index
    %c0_42 = arith.constant 0 : index
    %69 = vector.load %arg10[%c0_41, %c0_42] : memref<1x128xf32, #tpu.memory_space<vmem>>, vector<1x128xf32>
    %70 = vector.broadcast %69 : vector<1x128xf32> to vector<64x128xf32>
    %71 = arith.addf %68, %70 : vector<64x128xf32>
    %72 = vector.extract_strided_slice %71 {offsets = [0, 0], sizes = [32, 128], strides = [1, 1]} : vector<64x128xf32> to vector<32x128xf32>
    %73 = vector.extract_strided_slice %71 {offsets = [32, 0], sizes = [32, 128], strides = [1, 1]} : vector<64x128xf32> to vector<32x128xf32>
    %74 = tpu.concatenate %72, %73 in 1 : vector<32x128xf32>, vector<32x128xf32> -> vector<32x256xf32>
    %c0_43 = arith.constant 0 : index
    %c0_44 = arith.constant 0 : index
    %c0_45 = arith.constant 0 : index
    %75 = vector.load %arg11[%c0_43, %c0_44, %c0_45] : memref<1x32x256xf32, #tpu.memory_space<vmem>>, vector<1x32x256xf32>
    %76 = vector.shape_cast %75 : vector<1x32x256xf32> to vector<32x256xf32>
    %77 = vector.shape_cast %74 : vector<32x256xf32> to vector<1x32x256xf32>
    tpu.vector_store %arg11[%c0_43, %c0_44, %c0_45], %77 {strides = array<i32>} : memref<1x32x256xf32, #tpu.memory_space<vmem>>, vector<1x32x256xf32>,
    return
  }
  func.func @transform_0(%arg0: i32, %arg1: i32) -> (i32, i32, i32) {
    %c0_i32 = arith.constant 0 : i32
    %c0_i32_0 = arith.constant 0 : i32
    return %arg0, %arg1, %c0_i32 : i32, i32, i32
  }
  func.func @transform_1(%arg0: i32, %arg1: i32) -> (i32, i32, i32) {
    %c0_i32 = arith.constant 0 : i32
    %c0_i32_0 = arith.constant 0 : i32
    %c0_i32_1 = arith.constant 0 : i32
    return %arg0, %c0_i32, %c0_i32_0 : i32, i32, i32
  }
  func.func @transform_2(%arg0: i32, %arg1: i32) -> (i32, i32, i32) {
    %c0_i32 = arith.constant 0 : i32
    %c0_i32_0 = arith.constant 0 : i32
    return %arg0, %arg1, %c0_i32 : i32, i32, i32
  }
  func.func @transform_3(%arg0: i32, %arg1: i32) -> (i32, i32) {
    %c0_i32 = arith.constant 0 : i32
    %c0_i32_0 = arith.constant 0 : i32
    %c0_i32_1 = arith.constant 0 : i32
    return %c0_i32, %c0_i32_0 : i32, i32
  }
  func.func @transform_4(%arg0: i32, %arg1: i32) -> (i32, i32) {
    %c0_i32 = arith.constant 0 : i32
    %c0_i32_0 = arith.constant 0 : i32
    %c0_i32_1 = arith.constant 0 : i32
    return %c0_i32, %c0_i32_0 : i32, i32
  }
  func.func @transform_5(%arg0: i32, %arg1: i32) -> (i32, i32) {
    %c0_i32 = arith.constant 0 : i32
    %c0_i32_0 = arith.constant 0 : i32
    %c0_i32_1 = arith.constant 0 : i32
    return %c0_i32, %c0_i32_0 : i32, i32
  }
  func.func @transform_6(%arg0: i32, %arg1: i32) -> (i32, i32) {
    %c0_i32 = arith.constant 0 : i32
    %c0_i32_0 = arith.constant 0 : i32
    %c0_i32_1 = arith.constant 0 : i32
    return %c0_i32, %c0_i32_0 : i32, i32
  }
  func.func @transform_7(%arg0: i32, %arg1: i32) -> (i32, i32) {
    %c0_i32 = arith.constant 0 : i32
    %c0_i32_0 = arith.constant 0 : i32
    %c0_i32_1 = arith.constant 0 : i32
    return %c0_i32, %c0_i32_0 : i32, i32
  }
  func.func @transform_8(%arg0: i32, %arg1: i32) -> (i32, i32) {
    %c0_i32 = arith.constant 0 : i32
    %c0_i32_0 = arith.constant 0 : i32
    %c0_i32_1 = arith.constant 0 : i32
    return %c0_i32, %c0_i32_0 : i32, i32
  }
  func.func @transform_9(%arg0: i32, %arg1: i32) -> (i32, i32, i32) {
    %c0_i32 = arith.constant 0 : i32
    %c0_i32_0 = arith.constant 0 : i32
    return %arg0, %arg1, %c0_i32 : i32, i32, i32
  }
  func.func @transform_10(%arg0: i32, %arg1: i32) -> (i32, i32, i32) {
    %c0_i32 = arith.constant 0 : i32
    %c0_i32_0 = arith.constant 0 : i32
    %c0_i32_1 = arith.constant 0 : i32
    return %arg0, %c0_i32, %c0_i32_0 : i32, i32, i32
  }
  func.func @transform_11(%arg0: i32, %arg1: i32) -> (i32, i32, i32, i32) {
    %c0_i32 = arith.constant 0 : i32
    %c0_i32_0 = arith.constant 0 : i32
    %c0_i32_1 = arith.constant 0 : i32
    return %arg0, %c0_i32, %arg1, %c0_i32_0 : i32, i32, i32, i32
  }
}

module attributes {stable_mosaic.version = 11 : i64} {
  func.func @_saa_kernel(%arg0: i32, %arg1: i32, %arg2: memref<1x32x128xf32, #tpu.memory_space<vmem>>, %arg3: memref<1x128x128xf32, #tpu.memory_space<vmem>>, %arg4: memref<1x32x128xi8, #tpu.memory_space<vmem>>, %arg5: memref<128x256xf32, #tpu.memory_space<vmem>>, %arg6: memref<128x512xf32, #tpu.memory_space<vmem>>, %arg7: memref<128x128xf32, #tpu.memory_space<vmem>>, %arg8: memref<1x128xf32, #tpu.memory_space<vmem>>, %arg9: memref<1x128xf32, #tpu.memory_space<vmem>>, %arg10: memref<1x128xf32, #tpu.memory_space<vmem>>, %arg11: memref<1x32x256xf32, #tpu.memory_space<vmem>>, %arg12: memref<1x128x512xf32, #tpu.memory_space<vmem>>, %arg13: memref<1x2x32x128xf32, #tpu.memory_space<vmem>>, %arg14: memref<2x128x128xf32, #tpu.memory_space<vmem>>, %arg15: memref<2x128x128xf32, #tpu.memory_space<vmem>>, %arg16: memref<2x32x128xf32, #tpu.memory_space<vmem>>) attributes {dimension_semantics = [#tpu.dimension_semantics<parallel>, #tpu.dimension_semantics<arbitrary>], iteration_bounds = array<i64: 2, 2>, scalar_prefetch = 0 : i64, scratch_operands = 3 : i64, tpu.core_type = #tpu.core_type<tc>, window_params = [{transform_indices = @transform_0, window_bounds = array<i64: 1, 32, 128>}, {transform_indices = @transform_1, window_bounds = array<i64: 1, 128, 128>}, {transform_indices = @transform_2, window_bounds = array<i64: 1, 32, 128>}, {pipeline_mode = #tpu.pipeline_mode<synchronous>, transform_indices = @transform_3, window_bounds = array<i64: 128, 256>}, {pipeline_mode = #tpu.pipeline_mode<synchronous>, transform_indices = @transform_4, window_bounds = array<i64: 128, 512>}, {pipeline_mode = #tpu.pipeline_mode<synchronous>, transform_indices = @transform_5, window_bounds = array<i64: 128, 128>}, {pipeline_mode = #tpu.pipeline_mode<synchronous>, transform_indices = @transform_6, window_bounds = array<i64: 1, 128>}, {pipeline_mode = #tpu.pipeline_mode<synchronous>, transform_indices = @transform_7, window_bounds = array<i64: 1, 128>}, {pipeline_mode = #tpu.pipeline_mode<synchronous>, transform_indices = @transform_8, window_bounds = array<i64: 1, 128>}, {transform_indices = @transform_9, window_bounds = array<i64: 1, 32, 256>}, {transform_indices = @transform_10, window_bounds = array<i64: 1, 128, 512>}, {transform_indices = @transform_11, window_bounds = array<i64: 1, 2, 32, 128>}]} {
    %c0_i32 = arith.constant 0 : i32
    %0 = arith.cmpi eq, %arg1, %c0_i32 : i32
    %1 = arith.extui %0 : i1 to i32
    %c0_i32_0 = arith.constant 0 : i32
    %2 = arith.cmpi ne, %1, %c0_i32_0 : i32
    scf.if %2 {
      %c0_46 = arith.constant 0 : index
      %c0_47 = arith.constant 0 : index
      %c0_48 = arith.constant 0 : index
      %78 = vector.load %arg3[%c0_46, %c0_47, %c0_48] : memref<1x128x128xf32, #tpu.memory_space<vmem>>, vector<1x128x128xf32>
      %79 = vector.shape_cast %78 : vector<1x128x128xf32> to vector<128x128xf32>
      %c0_49 = arith.constant 0 : index
      %c0_50 = arith.constant 0 : index
      %80 = vector.load %arg6[%c0_49, %c0_50] : memref<128x512xf32, #tpu.memory_space<vmem>>, vector<128x512xf32>
      %cst_51 = arith.constant dense<0.000000e+00> : vector<128x512xf32>
      %81 = tpu.matmul %79, %80, %cst_51 {dimension_numbers = #tpu.dot_dimension_numbers<[1], [0], [0], [1], [0, 0, 1, 1], [], []>} : vector<128x128xf32>, vector<128x512xf32>, vector<128x512xf32> -> vector<128x512xf32>
      %c0_52 = arith.constant 0 : index
      %c0_53 = arith.constant 0 : index
      %c0_54 = arith.constant 0 : index
      %82 = vector.load %arg12[%c0_52, %c0_53, %c0_54] : memref<1x128x512xf32, #tpu.memory_space<vmem>>, vector<1x128x512xf32>
      %83 = vector.shape_cast %82 : vector<1x128x512xf32> to vector<128x512xf32>
      %84 = vector.shape_cast %81 : vector<128x512xf32> to vector<1x128x512xf32>
      tpu.vector_store %arg12[%c0_52, %c0_53, %c0_54], %84 {strides = array<i32>} : memref<1x128x512xf32, #tpu.memory_space<vmem>>, vector<1x128x512xf32>,
      %c0_55 = arith.constant 0 : index
      %c0_56 = arith.constant 0 : index
      %85 = vector.load %arg7[%c0_55, %c0_56] : memref<128x128xf32, #tpu.memory_space<vmem>>, vector<128x128xf32>
      %86 = vector.extract_strided_slice %81 {offsets = [0, 0], sizes = [128, 128], strides = [1, 1]} : vector<128x512xf32> to vector<128x128xf32>
      %c0_57 = arith.constant 0 : index
      %c0_58 = arith.constant 0 : index
      %c0_59 = arith.constant 0 : index
      %87 = vector.load %arg14[%c0_57, %c0_58, %c0_59] : memref<2x128x128xf32, #tpu.memory_space<vmem>>, vector<1x128x128xf32>
      %88 = vector.shape_cast %87 : vector<1x128x128xf32> to vector<128x128xf32>
      %89 = vector.shape_cast %86 : vector<128x128xf32> to vector<1x128x128xf32>
      tpu.vector_store %arg14[%c0_57, %c0_58, %c0_59], %89 {strides = array<i32>} : memref<2x128x128xf32, #tpu.memory_space<vmem>>, vector<1x128x128xf32>,
      %90 = vector.extract_strided_slice %81 {offsets = [0, 256], sizes = [128, 128], strides = [1, 1]} : vector<128x512xf32> to vector<128x128xf32>
      %cst_60 = arith.constant dense<0.000000e+00> : vector<128x128xf32>
      %91 = tpu.matmul %90, %85, %cst_60 {dimension_numbers = #tpu.dot_dimension_numbers<[1], [0], [0], [1], [0, 0, 1, 1], [], []>} : vector<128x128xf32>, vector<128x128xf32>, vector<128x128xf32> -> vector<128x128xf32>
      %c0_61 = arith.constant 0 : index
      %c0_62 = arith.constant 0 : index
      %c0_63 = arith.constant 0 : index
      %92 = vector.load %arg15[%c0_61, %c0_62, %c0_63] : memref<2x128x128xf32, #tpu.memory_space<vmem>>, vector<1x128x128xf32>
      %93 = vector.shape_cast %92 : vector<1x128x128xf32> to vector<128x128xf32>
      %94 = vector.shape_cast %91 : vector<128x128xf32> to vector<1x128x128xf32>
      tpu.vector_store %arg15[%c0_61, %c0_62, %c0_63], %94 {strides = array<i32>} : memref<2x128x128xf32, #tpu.memory_space<vmem>>, vector<1x128x128xf32>,
      %95 = vector.extract_strided_slice %81 {offsets = [0, 128], sizes = [128, 128], strides = [1, 1]} : vector<128x512xf32> to vector<128x128xf32>
      %c1_64 = arith.constant 1 : index
      %c0_65 = arith.constant 0 : index
      %c0_66 = arith.constant 0 : index
      %96 = vector.load %arg14[%c1_64, %c0_65, %c0_66] : memref<2x128x128xf32, #tpu.memory_space<vmem>>, vector<1x128x128xf32>
      %97 = vector.shape_cast %96 : vector<1x128x128xf32> to vector<128x128xf32>
      %98 = vector.shape_cast %95 : vector<128x128xf32> to vector<1x128x128xf32>
      tpu.vector_store %arg14[%c1_64, %c0_65, %c0_66], %98 {strides = array<i32>} : memref<2x128x128xf32, #tpu.memory_space<vmem>>, vector<1x128x128xf32>,
      %99 = vector.extract_strided_slice %81 {offsets = [0, 384], sizes = [128, 128], strides = [1, 1]} : vector<128x512xf32> to vector<128x128xf32>
      %cst_67 = arith.constant dense<0.000000e+00> : vector<128x128xf32>
      %100 = tpu.matmul %99, %85, %cst_67 {dimension_numbers = #tpu.dot_dimension_numbers<[1], [0], [0], [1], [0, 0, 1, 1], [], []>} : vector<128x128xf32>, vector<128x128xf32>, vector<128x128xf32> -> vector<128x128xf32>
      %c1_68 = arith.constant 1 : index
      %c0_69 = arith.constant 0 : index
      %c0_70 = arith.constant 0 : index
      %101 = vector.load %arg15[%c1_68, %c0_69, %c0_70] : memref<2x128x128xf32, #tpu.memory_space<vmem>>, vector<1x128x128xf32>
      %102 = vector.shape_cast %101 : vector<1x128x128xf32> to vector<128x128xf32>
      %103 = vector.shape_cast %100 : vector<128x128xf32> to vector<1x128x128xf32>
      tpu.vector_store %arg15[%c1_68, %c0_69, %c0_70], %103 {strides = array<i32>} : memref<2x128x128xf32, #tpu.memory_space<vmem>>, vector<1x128x128xf32>,
    } else {
    }
    %c0 = arith.constant 0 : index
    %c0_1 = arith.constant 0 : index
    %c0_2 = arith.constant 0 : index
    %3 = vector.load %arg2[%c0, %c0_1, %c0_2] : memref<1x32x128xf32, #tpu.memory_space<vmem>>, vector<1x32x128xf32>
    %4 = vector.shape_cast %3 : vector<1x32x128xf32> to vector<32x128xf32>
    %c0_3 = arith.constant 0 : index
    %c0_4 = arith.constant 0 : index
    %5 = vector.load %arg5[%c0_3, %c0_4] : memref<128x256xf32, #tpu.memory_space<vmem>>, vector<128x256xf32>
    %cst = arith.constant dense<0.000000e+00> : vector<32x256xf32>
    %6 = tpu.matmul %4, %5, %cst {dimension_numbers = #tpu.dot_dimension_numbers<[1], [0], [0], [1], [0, 0, 1, 1], [], []>} : vector<32x128xf32>, vector<128x256xf32>, vector<32x256xf32> -> vector<32x256xf32>
    %7 = vector.extract_strided_slice %6 {offsets = [0, 0], sizes = [32, 128], strides = [1, 1]} : vector<32x256xf32> to vector<32x128xf32>
    %c0_5 = arith.constant 0 : index
    %c0_6 = arith.constant 0 : index
    %c0_7 = arith.constant 0 : index
    %8 = vector.load %arg16[%c0_5, %c0_6, %c0_7] : memref<2x32x128xf32, #tpu.memory_space<vmem>>, vector<1x32x128xf32>
    %9 = vector.shape_cast %8 : vector<1x32x128xf32> to vector<32x128xf32>
    %10 = vector.shape_cast %7 : vector<32x128xf32> to vector<1x32x128xf32>
    tpu.vector_store %arg16[%c0_5, %c0_6, %c0_7], %10 {strides = array<i32>} : memref<2x32x128xf32, #tpu.memory_space<vmem>>, vector<1x32x128xf32>,
    %11 = vector.extract_strided_slice %6 {offsets = [0, 128], sizes = [32, 128], strides = [1, 1]} : vector<32x256xf32> to vector<32x128xf32>
    %c1 = arith.constant 1 : index
    %c0_8 = arith.constant 0 : index
    %c0_9 = arith.constant 0 : index
    %12 = vector.load %arg16[%c1, %c0_8, %c0_9] : memref<2x32x128xf32, #tpu.memory_space<vmem>>, vector<1x32x128xf32>
    %13 = vector.shape_cast %12 : vector<1x32x128xf32> to vector<32x128xf32>
    %14 = vector.shape_cast %11 : vector<32x128xf32> to vector<1x32x128xf32>
    tpu.vector_store %arg16[%c1, %c0_8, %c0_9], %14 {strides = array<i32>} : memref<2x32x128xf32, #tpu.memory_space<vmem>>, vector<1x32x128xf32>,
    %c0_10 = arith.constant 0 : index
    %c0_11 = arith.constant 0 : index
    %c0_12 = arith.constant 0 : index
    %15 = vector.load %arg16[%c0_10, %c0_11, %c0_12] : memref<2x32x128xf32, #tpu.memory_space<vmem>>, vector<2x32x128xf32>
    %c0_13 = arith.constant 0 : index
    %c0_14 = arith.constant 0 : index
    %c0_15 = arith.constant 0 : index
    %16 = vector.load %arg14[%c0_13, %c0_14, %c0_15] : memref<2x128x128xf32, #tpu.memory_space<vmem>>, vector<2x128x128xf32>
    "tpu.trace_start"() <{level = 10 : i32, message = "nqd,nkd->nqk"}> : () -> ()
    %cst_16 = arith.constant dense<0.000000e+00> : vector<2x32x128xf32>
    %17 = tpu.matmul %15, %16, %cst_16 {dimension_numbers = #tpu.dot_dimension_numbers<[2], [2], [1], [1], [0, 0, 0, 1, 1, 1], [0], [0]>} : vector<2x32x128xf32>, vector<2x128x128xf32>, vector<2x32x128xf32> -> vector<2x32x128xf32>
    "tpu.trace_stop"() : () -> ()
    %c0_17 = arith.constant 0 : index
    %c0_18 = arith.constant 0 : index
    %c0_19 = arith.constant 0 : index
    %18 = vector.load %arg4[%c0_17, %c0_18, %c0_19] : memref<1x32x128xi8, #tpu.memory_space<vmem>>, vector<1x32x128xi8>
    %19 = vector.shape_cast %18 : vector<1x32x128xi8> to vector<32x128xi8>
    %c0_i8 = arith.constant 0 : i8
    %20 = vector.broadcast %c0_i8 : i8 to vector<32x128xi8>
    %21 = arith.cmpi ne, %19, %20 : vector<32x128xi8>
    %22 = vector.shape_cast %21 : vector<32x128xi1> to vector<1x32x128xi1>
    %cst_20 = arith.constant -6.000000e+04 : f32
    %23 = vector.shape_cast %22 : vector<1x32x128xi1> to vector<1x32x128xi1>
    %24 = vector.broadcast %23 : vector<1x32x128xi1> to vector<2x32x128xi1>
    %25 = vector.broadcast %cst_20 : f32 to vector<2x32x128xf32>
    %26 = arith.select %24, %25, %17 : vector<2x32x128xi1>, vector<2x32x128xf32>
    %c0_21 = arith.constant 0 : index
    %c0_22 = arith.constant 0 : index
    %c0_23 = arith.constant 0 : index
    %c0_24 = arith.constant 0 : index
    %27 = vector.load %arg13[%c0_21, %c0_22, %c0_23, %c0_24] : memref<1x2x32x128xf32, #tpu.memory_space<vmem>>, vector<1x2x32x128xf32>
    %28 = vector.shape_cast %27 : vector<1x2x32x128xf32> to vector<2x32x128xf32>
    %29 = vector.shape_cast %26 : vector<2x32x128xf32> to vector<1x2x32x128xf32>
    tpu.vector_store %arg13[%c0_21, %c0_22, %c0_23, %c0_24], %29 {strides = array<i32>} : memref<1x2x32x128xf32, #tpu.memory_space<vmem>>, vector<1x2x32x128xf32>,
    %cst_25 = arith.constant dense<0xFF800000> : vector<2x32xf32>
    %30 = vector.multi_reduction <maximumf>, %26, %cst_25 [2] : vector<2x32x128xf32> to vector<2x32xf32>
    %31 = vector.shape_cast %30 : vector<2x32xf32> to vector<2x32x1xf32>
    %32 = vector.broadcast %31 : vector<2x32x1xf32> to vector<2x32x128xf32>
    %33 = arith.subf %26, %32 : vector<2x32x128xf32>
    %34 = math.exp %33 : vector<2x32x128xf32>
    %cst_26 = arith.constant dense<0.000000e+00> : vector<2x32xf32>
    %35 = vector.multi_reduction <add>, %34, %cst_26 [2] : vector<2x32x128xf32> to vector<2x32xf32>
    %36 = vector.shape_cast %35 : vector<2x32xf32> to vector<2x32x1xf32>
    %37 = tpu.reciprocal %36 : vector<2x32x1xf32> -> vector<2x32x1xf32>
    %c0_27 = arith.constant 0 : index
    %c0_28 = arith.constant 0 : index
    %c0_29 = arith.constant 0 : index
    %38 = vector.load %arg15[%c0_27, %c0_28, %c0_29] : memref<2x128x128xf32, #tpu.memory_space<vmem>>, vector<2x128x128xf32>
    "tpu.trace_start"() <{level = 10 : i32, message = "nqk,nkh->nqh"}> : () -> ()
    %cst_30 = arith.constant dense<0.000000e+00> : vector<2x32x128xf32>
    %39 = tpu.matmul %34, %38, %cst_30 {dimension_numbers = #tpu.dot_dimension_numbers<[2], [1], [1], [2], [0, 0, 0, 1, 1, 2], [0], [0]>} : vector<2x32x128xf32>, vector<2x128x128xf32>, vector<2x32x128xf32> -> vector<2x32x128xf32>
    "tpu.trace_stop"() : () -> ()
    %40 = vector.broadcast %37 : vector<2x32x1xf32> to vector<2x32x128xf32>
    %41 = arith.mulf %39, %40 : vector<2x32x128xf32>
    %42 = vector.shape_cast %41 : vector<2x32x128xf32> to vector<64x128xf32>
    %c0_31 = arith.constant 0 : index
    %c0_32 = arith.constant 0 : index
    %43 = vector.load %arg8[%c0_31, %c0_32] : memref<1x128xf32, #tpu.memory_space<vmem>>, vector<1x128xf32>
    %44 = vector.broadcast %43 : vector<1x128xf32> to vector<64x128xf32>
    %45 = arith.addf %42, %44 : vector<64x128xf32>
    %cst_33 = arith.constant 0.000000e+00 : f32
    %46 = vector.broadcast %cst_33 : f32 to vector<64x128xf32>
    %47 = arith.maximumf %45, %46 : vector<64x128xf32>
    %cst_34 = arith.constant dense<0.000000e+00> : vector<64xf32>
    %48 = vector.multi_reduction <add>, %47, %cst_34 [1] : vector<64x128xf32> to vector<64xf32>
    %49 = vector.shape_cast %48 : vector<64xf32> to vector<64x1xf32>
    %cst_35 = arith.constant 1.280000e+02 : f32
    %50 = vector.broadcast %cst_35 : f32 to vector<64x1xf32>
    %51 = arith.divf %49, %50 : vector<64x1xf32>
    %52 = vector.broadcast %51 : vector<64x1xf32> to vector<64x128xf32>
    %53 = arith.subf %47, %52 : vector<64x128xf32>
    %54 = arith.mulf %53, %53 : vector<64x128xf32>
    %cst_36 = arith.constant dense<0.000000e+00> : vector<64xf32>
    %55 = vector.multi_reduction <add>, %54, %cst_36 [1] : vector<64x128xf32> to vector<64xf32>
    %56 = vector.shape_cast %55 : vector<64xf32> to vector<64x1xf32>
    %cst_37 = arith.constant 1.280000e+02 : f32
    %57 = vector.broadcast %cst_37 : f32 to vector<64x1xf32>
    %58 = arith.divf %56, %57 : vector<64x1xf32>
    %59 = vector.broadcast %51 : vector<64x1xf32> to vector<64x128xf32>
    %60 = arith.subf %47, %59 : vector<64x128xf32>
    %cst_38 = arith.constant 9.99999974E-6 : f32
    %61 = vector.broadcast %cst_38 : f32 to vector<64x1xf32>
    %62 = arith.addf %58, %61 : vector<64x1xf32>
    %63 = math.rsqrt %62 : vector<64x1xf32>
    %64 = vector.broadcast %63 : vector<64x1xf32> to vector<64x128xf32>
    %65 = arith.mulf %60, %64 : vector<64x128xf32>
    %c0_39 = arith.constant 0 : index
    %c0_40 = arith.constant 0 : index
    %66 = vector.load %arg9[%c0_39, %c0_40] : memref<1x128xf32, #tpu.memory_space<vmem>>, vector<1x128xf32>
    %67 = vector.broadcast %66 : vector<1x128xf32> to vector<64x128xf32>
    %68 = arith.mulf %65, %67 : vector<64x128xf32>
    %c0_41 = arith.constant 0 : index
    %c0_42 = arith.constant 0 : index
    %69 = vector.load %arg10[%c0_41, %c0_42] : memref<1x128xf32, #tpu.memory_space<vmem>>, vector<1x128xf32>
    %70 = vector.broadcast %69 : vector<1x128xf32> to vector<64x128xf32>
    %71 = arith.addf %68, %70 : vector<64x128xf32>
    %72 = vector.extract_strided_slice %71 {offsets = [0, 0], sizes = [32, 128], strides = [1, 1]} : vector<64x128xf32> to vector<32x128xf32>
    %73 = vector.extract_strided_slice %71 {offsets = [32, 0], sizes = [32, 128], strides = [1, 1]} : vector<64x128xf32> to vector<32x128xf32>
    %74 = tpu.concatenate %72, %73 in 1 : vector<32x128xf32>, vector<32x128xf32> -> vector<32x256xf32>
    %c0_43 = arith.constant 0 : index
    %c0_44 = arith.constant 0 : index
    %c0_45 = arith.constant 0 : index
    %75 = vector.load %arg11[%c0_43, %c0_44, %c0_45] : memref<1x32x256xf32, #tpu.memory_space<vmem>>, vector<1x32x256xf32>
    %76 = vector.shape_cast %75 : vector<1x32x256xf32> to vector<32x256xf32>
    %77 = vector.shape_cast %74 : vector<32x256xf32> to vector<1x32x256xf32>
    tpu.vector_store %arg11[%c0_43, %c0_44, %c0_45], %77 {strides = array<i32>} : memref<1x32x256xf32, #tpu.memory_space<vmem>>, vector<1x32x256xf32>,
    return
  }
  func.func @transform_0(%arg0: i32, %arg1: i32) -> (i32, i32, i32) {
    %c0_i32 = arith.constant 0 : i32
    %c0_i32_0 = arith.constant 0 : i32
    return %arg0, %arg1, %c0_i32 : i32, i32, i32
  }
  func.func @transform_1(%arg0: i32, %arg1: i32) -> (i32, i32, i32) {
    %c0_i32 = arith.constant 0 : i32
    %c0_i32_0 = arith.constant 0 : i32
    %c0_i32_1 = arith.constant 0 : i32
    return %arg0, %c0_i32, %c0_i32_0 : i32, i32, i32
  }
  func.func @transform_2(%arg0: i32, %arg1: i32) -> (i32, i32, i32) {
    %c0_i32 = arith.constant 0 : i32
    %c0_i32_0 = arith.constant 0 : i32
    return %arg0, %arg1, %c0_i32 : i32, i32, i32
  }
  func.func @transform_3(%arg0: i32, %arg1: i32) -> (i32, i32) {
    %c0_i32 = arith.constant 0 : i32
    %c0_i32_0 = arith.constant 0 : i32
    %c0_i32_1 = arith.constant 0 : i32
    return %c0_i32, %c0_i32_0 : i32, i32
  }
  func.func @transform_4(%arg0: i32, %arg1: i32) -> (i32, i32) {
    %c0_i32 = arith.constant 0 : i32
    %c0_i32_0 = arith.constant 0 : i32
    %c0_i32_1 = arith.constant 0 : i32
    return %c0_i32, %c0_i32_0 : i32, i32
  }
  func.func @transform_5(%arg0: i32, %arg1: i32) -> (i32, i32) {
    %c0_i32 = arith.constant 0 : i32
    %c0_i32_0 = arith.constant 0 : i32
    %c0_i32_1 = arith.constant 0 : i32
    return %c0_i32, %c0_i32_0 : i32, i32
  }
  func.func @transform_6(%arg0: i32, %arg1: i32) -> (i32, i32) {
    %c0_i32 = arith.constant 0 : i32
    %c0_i32_0 = arith.constant 0 : i32
    %c0_i32_1 = arith.constant 0 : i32
    return %c0_i32, %c0_i32_0 : i32, i32
  }
  func.func @transform_7(%arg0: i32, %arg1: i32) -> (i32, i32) {
    %c0_i32 = arith.constant 0 : i32
    %c0_i32_0 = arith.constant 0 : i32
    %c0_i32_1 = arith.constant 0 : i32
    return %c0_i32, %c0_i32_0 : i32, i32
  }
  func.func @transform_8(%arg0: i32, %arg1: i32) -> (i32, i32) {
    %c0_i32 = arith.constant 0 : i32
    %c0_i32_0 = arith.constant 0 : i32
    %c0_i32_1 = arith.constant 0 : i32
    return %c0_i32, %c0_i32_0 : i32, i32
  }
  func.func @transform_9(%arg0: i32, %arg1: i32) -> (i32, i32, i32) {
    %c0_i32 = arith.constant 0 : i32
    %c0_i32_0 = arith.constant 0 : i32
    return %arg0, %arg1, %c0_i32 : i32, i32, i32
  }
  func.func @transform_10(%arg0: i32, %arg1: i32) -> (i32, i32, i32) {
    %c0_i32 = arith.constant 0 : i32
    %c0_i32_0 = arith.constant 0 : i32
    %c0_i32_1 = arith.constant 0 : i32
    return %arg0, %c0_i32, %c0_i32_0 : i32, i32, i32
  }
  func.func @transform_11(%arg0: i32, %arg1: i32) -> (i32, i32, i32, i32) {
    %c0_i32 = arith.constant 0 : i32
    %c0_i32_0 = arith.constant 0 : i32
    %c0_i32_1 = arith.constant 0 : i32
    return %arg0, %c0_i32, %arg1, %c0_i32_0 : i32, i32, i32, i32
  }
}

</mosaic_0001>

<bundles_post_ra>
// kernel: tpu_custom_call.1
= control target key start
LH: loop header
LB: loop body
LE: loop exit
PB: predicated region body
PF: predicated region fallthrough
CT: control target
= control target key end

     0   :  { %s4726_s0 = inlined_call_operand.hbm [shape: f32[2,64,128], index: 0, kind: input, shape index: {}]   ;;  %s4727_s1 = inlined_call_operand.hbm [shape: f32[2,128,128], index: 1, kind: input, shape index: {}]   ;;  %s4728_s2 = inlined_call_operand.hbm [shape: s8[2,64,128], index: 2, kind: input, shape index: {}]   ;;  %s4729_s3 = inlined_call_operand.hbm [shape: f32[128,256], index: 3, kind: input, shape index: {}]   ;;  %s4730_s4 = inlined_call_operand.hbm [shape: f32[128,512], index: 4, kind: input, shape index: {}]   ;;  %s4731_s5 = inlined_call_operand.hbm [shape: f32[128,128], index: 5, kind: input, shape index: {}]   ;;  %s4732_s6 = inlined_call_operand.vmem [shape: f32[1,128], index: 6, kind: input, shape index: {}]   ;;  %s4733_s7 = inlined_call_operand.vmem [shape: f32[1,128], index: 7, kind: input, shape index: {}]   ;;  %s4734_s8 = inlined_call_operand.vmem [shape: f32[1,128], index: 8, kind: input, shape index: {}]   ;;  %s4735_s9 = inlined_call_operand.hbm [shape: f32[2,64,256], index: 9, kind: output, shape index: {0}]   ;;  %s4736_s10 = inlined_call_operand.hbm [shape: f32[2,128,512], index: 10, kind: output, shape index: {1}]   ;;  %s4737_s11 = inlined_call_operand.hbm [shape: f32[2,2,64,128], index: 11, kind: output, shape index: {2}]  }
   0x1   :  { %4780 = sst [smem:[#allocation45_spill]] %s4726_s0 }
   0x2   :  { %4781 = sst [smem:[#allocation46_spill]] %s4727_s1 }
   0x3   :  { %4782 = sst [smem:[#allocation47_spill]] %s4730_s4 }
   0x4   :  { %4783 = sst [smem:[#allocation48_spill]] %s4732_s6 }
   0x5   :  { %4784 = sst [smem:[#allocation49_spill]] %s4733_s7 }
   0x6   :  { %4785 = sst [smem:[#allocation50_spill]] %s4734_s8 }
   0x7   :  { %4786 = sst [smem:[#allocation51_spill]] %s4735_s9 }
   0x8   :  { %4787 = sst [smem:[#allocation52_spill]] %s4736_s10 }
   0x9   :  { %4788 = sst [smem:[#allocation53_spill]] %s4737_s11 }
   0xa   :  { %17 = vsyncpa [#allocation6], 0 }
   0xb   :  { %19 = vsyncpa [#allocation6 + $0x1], 0 }
   0xc   :  { %20 = vsyncpa [#allocation9], 0 }
   0xd   :  { %21 = vsyncpa [#allocation13], 0 }
   0xe   :  { %22 = vsyncpa [#allocation7], 0 }
   0xf   :  { %24 = vsyncpa [#allocation7 + $0x1], 0 }
  0x10   :  { %25 = vsyncpa [#allocation17], 0 }
  0x11   :  { %27 = vsyncpa [#allocation17 + $0x1], 0  ;;  %s3947_s17 = smov 0   ;;  %s3949_s18 = smov 0  }
  0x12   :  { %s3951_s19 = smov 0   ;;  %s3953_s20 = smov 0  }
  0x13   :  { %s3955_s21 = smov 0   ;;  %s3957_s22 = smov 0  }
  0x14   :  { %s3959_s23 = smov 0   ;;  %s3961_s24 = smov 0  }
  0x15   :  { %s3963_s25 = smov 0   ;;  %s3965_s26 = smov 0  }
  0x16   :  { %s3967_s27 = smov 0  }
  0x17 LB: > { %4789 = sst [smem:[#allocation29_spill]] %s3821_s18  ;;  %s4001_s28 = sadd.s32 4294967295, %s3857_s27   ;;  %s3857_s27 = sphi %s3967_s27, %s33_s27   ;;  %s3853_s26 = sphi %s3965_s26, %s4875_s26   ;;  %s3849_s25 = sphi %s3963_s25, %s4874_s25   ;;  %s3845_s24 = sphi %s3961_s24, %s4873_s24   ;;  %s3841_s23 = sphi %s3959_s23, %s4872_s23   ;;  %s3837_s22 = sphi %s3957_s22, %s4871_s22   ;;  %s3833_s21 = sphi %s3955_s21, %s4870_s21   ;;  %s3829_s20 = sphi %s3953_s20, %s4869_s20   ;;  %s3825_s19 = sphi %s3951_s19, %s4865_s19   ;;  %s3821_s18 = sphi %s3949_s18, %s4864_s18   ;;  %s3817_s17 = sphi %s3947_s17, %s4863_s17  }
  0x18   : > { %4790 = sst [smem:[#allocation30_spill]] %s3825_s19  ;;  %s4738_s29 = sadd.s32 4294967294, %s3857_s27  }
  0x19   : > { %4791 = sst [smem:[#allocation31_spill]] %s3829_s20  ;;  %p4745_p0 = scmp.eq.s32.totalorder %s4001_s28, 0 }
  0x1a   : > { %4792 = sst [smem:[#allocation32_spill]] %s3841_s23  ;;  %p93_p1 = scmp.ne.s32.totalorder %s3821_s18, %s3817_s17 }
  0x1b   : > { %4793 = sst [smem:[#allocation33_spill]] %s3845_s24  ;;  %p4744_p2 = scmp.eq.s32.totalorder %s4001_s28, 3 }
  0x1c   : > { %4794 = sst [smem:[#allocation34_spill]] %s3857_s27  ;;  %p4010_p3 = scmp.eq.s32.totalorder %s4738_s29, 3 }
  0x1d   : > { %p298_p4 = scmp.ne.s32.totalorder %s3825_s19, %s3821_s18  ;;  %p4018_p5 = por %p93_p1, %p4745_p0 }
  0x1e   : > { %s4795_s12 = scalar_select %p4010_p3, 1, 0 }
  0x1f   : > { %s4796_s13 = scalar_select %p4018_p5, 1, 0 }
  0x20   : > { %p2525_p6 = scmp.ge.s32.totalorder %s3857_s27, 1  ;;  %p4025_p7 = por %p298_p4, %p4744_p2 }
  0x21   : > { %4797 = sst [smem:[#allocation35_spill]] %s4796_s13  ;;  %p4031_p8 = por %p4010_p3, %p93_p1 }
  0x22   : > { %s4798_s14 = scalar_select %p4025_p7, 1, 0 }
  0x23   : > { %s4800_s15 = scalar_select %p4031_p8, 1, 0 }
  0x24   : > { %4799 = sst [smem:[#allocation36_spill]] %s4798_s14  ;;  %p340_p9 = scmp.lt.s32.totalorder %s3857_s27, 5 }
  0x25   : > { %4801 = sst [smem:[#allocation37_spill]] %s4800_s15  ;;  %s2566_s16 = sshll.u32 %s3845_s24, 11 }
  0x26   : > { %s4802_s1 = sld [smem:[#allocation46_spill]]  ;;  %p4042_p10 = pnand %p2525_p6, %p340_p9 }
  0x27   : > { %s3859_s9 = smov [#allocation8]  }
  0x28   : > { %s4803_s11 = scalar_select %p4042_p10, 1, 0 }
  0x29   : > { %s355_s8 = sshll.u32 %s3859_s9, 4  ;;  %p3311_p11 = pneg %p4042_p10  ;;  %s4046_s8 = int_to_ptr.vmem [resolvable:$true] %s355_s8 }
  0x2b   : > { %p4052_p12 = pnand %p3311_p11, %p4018_p5  ;;  %p4058_p13 = pnand %p3311_p11, %p4745_p0 }
  0x2c   : > { %s4040_s30 = scalar_lea.hbm %s4802_s1, %s2566_s16  ;;  %s3514_s7 = scalar_lea.hbm %s4802_s1, 4096 }
  0x2d   : > { %s4805_s16 = scalar_select %p4058_p13, 1, 0 }
  0x2e   : > { %s3509_s17 = scalar_lea.hbm %s4040_s30, 2048  ;;  %p3511_p4 = pneg %p4052_p12 }
  0x2f   : > { %p3510_p1 = scmp.ne.s32.totalorder %s4040_s30, %s3509_s17  ;;  %p3515_p2 = scmp.lt.u32.totalorder %s4040_s30, %s4802_s1 }
  0x30   : > { %p3516_p11 = scmp.lt.u32.totalorder %s3514_s7, %s3509_s17  ;;  %p3518_p8 = scmp.lt.u32.totalorder %s3509_s17, %s4040_s30 }
  0x31   : > { %p3512_p6 = pnand %p3511_p4, %p3510_p1 }
  0x32   : > { %p3517_p0 = por %p3516_p11, %p3515_p2 }
  0x33   : > { %p3513_p9 = pneg %p3512_p6 }
  0x34   : > { %p3519_p7 = por %p3518_p8, %p3517_p0 }
  0x36   : > { %p3520_p5 = pnand %p3519_p7, %p3513_p9 }
  0x38   : > { %3523 = shalt.err (!%p3520_p5)
}
  0x39   : > { %s3524_s24 = scalar_lea.vmem %s4046_s8, 2048  ;;  %p3532_p3 = scmp.lt.s32.totalorder %s4046_s8, %s4046_s8 }
  0x3a   : > { %p3525_p1 = scmp.ne.s32.totalorder %s4046_s8, %s3524_s24  ;;  %p3533_p13 = scmp.lt.s32.totalorder %s3524_s24, %s3524_s24 }
  0x3c   : > { %p3527_p6 = pnand %p3525_p1, %p3511_p4  ;;  %p3534_p2 = por %p3533_p13, %p3532_p3 }
  0x3e   : > { %p3528_p10 = pneg %p3527_p6 }
  0x40   : > { %p3535_p11 = pnand %p3534_p2, %p3528_p10 }
  0x42   : > { %3538 = shalt.err (!%p3535_p11)
}
  0x43   : > { %s4755_s7 = smov 128   ;;  %s4757_s10 = smov 8  }
  0x44   : > { %3314 = dma.hbm_to_vmem [thread:$0]  (!%p4052_p12), %s4040_s30, 2048, %s4046_s8, [#allocation9], %s4755_s7, %s4755_s7, %s4757_s10  }
  0x45   : > { %s3862_s14 = smov [#allocation12]   ;;  %s4806_s4 = sld [smem:[#allocation47_spill]] }
  0x46   : > { %s381_s15 = sshll.u32 %s3862_s14, 4  ;;  %p4807_p3 = scmp.ne.s32.totalorder %s4805_s16, 0  ;;  %s382_s15 = int_to_ptr.vmem [resolvable:$true] %s381_s15 }
  0x48   : > { %p4099_p5 = pneg %p4807_p3 }
  0x4b   : > { %s3539_s24 = scalar_lea.hbm %s4806_s4, 8192 }
  0x4c   : > { %p3540_p0 = scmp.ne.s32.totalorder %s4806_s4, %s3539_s24  ;;  %p3546_p10 = scmp.lt.u32.totalorder %s3539_s24, %s4806_s4 }
  0x4e   : > { %p3542_p7 = pnand %p4099_p5, %p3540_p0 }
  0x50   : > { %p3543_p8 = pneg %p3542_p7 }
  0x52   : > { %p3548_p12 = pnand %p3546_p10, %p3543_p8 }
  0x54   : > { %3551 = shalt.err (!%p3548_p12)
}
  0x55   : > { %s3552_s29 = scalar_lea.vmem %s382_s15, 8192  ;;  %p3560_p1 = scmp.lt.s32.totalorder %s382_s15, %s382_s15 }
  0x56   : > { %p3553_p13 = scmp.ne.s32.totalorder %s382_s15, %s3552_s29  ;;  %p3561_p6 = scmp.lt.s32.totalorder %s3552_s29, %s3552_s29 }
  0x58   : > { %p3555_p4 = pnand %p3553_p13, %p4099_p5  ;;  %p3562_p2 = por %p3561_p6, %p3560_p1 }
  0x5a   : > { %p3556_p9 = pneg %p3555_p4 }
  0x5c   : > { %p3563_p11 = pnand %p3562_p2, %p3556_p9 }
  0x5e   : > { %3566 = shalt.err (!%p3563_p11)
}
  0x5f   : > { %s3863_s1 = smov 512   ;;  %s3864_s6 = smov 32  }
  0x60   : > { %3320 = dma.hbm_to_vmem [thread:$0]  (!%p4807_p3), %s4806_s4, 8192, %s382_s15, [#allocation13], %s3863_s1, %s3863_s1, %s3864_s6  }
  0x61   : > { %s42_s9 = sadd.s32 1, %s3849_s25  ;;  %s45_s24 = sadd.s32 1, %s3853_s26 }
  0x62   : > { %p43_p0 = scmp.ge.s32.totalorder %s42_s9, 2  ;;  %s54_s8 = sadd.s32 1, %s3837_s22 }
  0x63   : > { %p61_p7 = scmp.ne.s32.totalorder %s3837_s22, %s3833_s21  ;;  %p62_p8 = scmp.eq.s32.totalorder %s3857_s27, 0 }
  0x64   : > { %s4877_s9 = smov (%p43_p0, %s42_s9), 0  ;;  %s4879_s24 = smov (!%p43_p0, %s45_s24), %s3853_s26 }
  0x65   : > { %4809 = sst [smem:[#allocation38_spill]] %s4877_s9  ;;  %s50_s30 = ssub.s32 %s3849_s25, %s4877_s9 }
  0x66   : > { %p47_p10 = scmp.ge.s32.totalorder %s4879_s24, 2  ;;  %p67_p12 = scmp.ne.s32.totalorder %s3833_s21, %s3829_s20 }
  0x67   : > { %p4128_p13 = por %p62_p8, %p61_p7  ;;  %p4811_p4 = scmp.eq.s32.totalorder %s4001_s28, 3 }
  0x68   : > { %s4881_s24 = smov (%p47_p10, %s4879_s24), 0  ;;  %p4815_p1 = scmp.eq.s32.totalorder %s4001_s28, 0 }
  0x69   : > { %p4134_p9 = por %p4811_p4, %p61_p7  ;;  %4814 = sst [smem:[#allocation40_spill]] %s4881_s24 }
  0x6a   : > { %p4142_p6 = por %p4815_p1, %p67_p12  ;;  %p4818_p2 = scmp.ne.s32.totalorder %s4795_s12, 0 }
  0x6b   : > { %s4812_s29 = scalar_select %p4134_p9, 1, 0 }
  0x6c   : > { %s4816_s1 = scalar_select %p4142_p6, 1, 0 }
  0x6d   : > { %4813 = sst [smem:[#allocation39_spill]] %s4812_s29  ;;  %p4148_p11 = por %p4818_p2, %p67_p12 }
  0x6e   : > { %4817 = sst [smem:[#allocation41_spill]] %s4816_s1  ;;  %s49_s14 = ssub.s32 %s3853_s26, %s4881_s24 }
  0x6f   : > { %s4819_s6 = scalar_select %p4148_p11, 1, 0 }
  0x70   : > { %p3344_p0 = scmp.lt.s32.totalorder %s3857_s27, 4  ;;  %s51_s17 = sor.u32 %s50_s30, %s49_s14 }
  0x71   : > { %4820 = sst [smem:[#allocation42_spill]] %s4819_s6  ;;  %p78_p7 = scmp.eq.s32.totalorder %s49_s14, 0 }
  0x72   : > { %p52_p8 = scmp.eq.s32.totalorder %s51_s17, 0  ;;  %s417_s7 = sand.u32 1, %s3857_s27  }
  0x73   : > { %s4821_s10 = sadd.s32 1, %s3825_s19  ;;  %s4773_s20 = sand.u32 1, %s3837_s22  }
  0x74   : > { %s4159_s4 = scalar_select %p78_p7, %s3825_s19, %s4821_s10  }
  0x75   : > { %s4162_s9 = scalar_select %p52_p8, %s3837_s22, %s54_s8  }
  0x76   : > { %4822 = sst [smem:[#allocation43_spill]] %s4159_s4  ;;  %s2532_s12 = sshll.u32 %s4773_s20, 5 }
  0x77   : > { %4823 = sst [smem:[#allocation44_spill]] %s4162_s9  ;;  %s2533_s29 = sshll.u32 %s3849_s25, 2 }
  0x78   : > { %s2534_s18 = sshll.u32 %s3853_s26, 3  ;;  %s421_s6 = scalar_lea.vmem [#allocation5], %s2532_s12 }
  0x79   : > { %s427_s13 = sadd.s32 %s2534_s18, %s2533_s29  ;;  %s430_s24 = sshll.u32 %s421_s6, 4  ;;  %s4169_s24 = int_to_ptr.vmem [resolvable:$true] %s430_s24 }
  0x7a   : > { %s2535_s1 = sshll.u32 %s427_s13, 7  ;;  %s4824_s0 = sld [smem:[#allocation45_spill]] }
  0x7b   : > { %p4180_p10 = pnand %p3344_p0, %p4128_p13  ;;  %s3865_s18 = smov [#allocation11]  }
  0x7c   : > { %s4184_s13 = sshll.u32 %s3865_s18, 4  ;;  %s4186_s8 = scalar_lea.sflag [#allocation6], %s417_s7  ;;  %s369_s13 = int_to_ptr.vmem [resolvable:$true] %s4184_s13 }
  0x7d   : > { %s4825_s10 = scalar_select %p4180_p10, 1, 0 }
  0x7e   : > { %p4774_p4 = pneg %p4180_p10 }
  0x80   : > { %s4174_s17 = scalar_lea.hbm %s4824_s0, %s2535_s1  ;;  %s3572_s6 = scalar_lea.hbm %s4824_s0, 2048 }
  0x81   : > { %s3567_s29 = scalar_lea.hbm %s4174_s17, 512  ;;  %p3573_p13 = scmp.lt.u32.totalorder %s4174_s17, %s4824_s0 }
  0x82   : > { %p3568_p12 = scmp.ne.s32.totalorder %s4174_s17, %s3567_s29  ;;  %p3574_p0 = scmp.lt.u32.totalorder %s3572_s6, %s3567_s29 }
  0x83   : > { %p3576_p8 = scmp.lt.u32.totalorder %s3567_s29, %s4174_s17 }
  0x84   : > { %p3570_p1 = pnand %p4774_p4, %p3568_p12  ;;  %p3575_p7 = por %p3574_p0, %p3573_p13 }
  0x86   : > { %p3571_p2 = pneg %p3570_p1  ;;  %p3577_p11 = por %p3576_p8, %p3575_p7 }
  0x88   : > { %p3578_p9 = pnand %p3577_p11, %p3571_p2 }
  0x8a   : > { %3581 = shalt.err (!%p3578_p9)
}
  0x8b   : > { %s3582_s7 = scalar_lea.vmem %s4169_s24, 512  ;;  %s3866_s14 = smov [#allocation5]  }
  0x8c   : > { %p3583_p12 = scmp.ne.s32.totalorder %s4169_s24, %s3582_s7  ;;  %s3587_s18 = sshll.u32 %s3866_s14, 4  ;;  %s3588_s18 = int_to_ptr.vmem [resolvable:$false] %s3587_s18 }
  0x8d   : > { %s3589_s15 = scalar_lea.vmem %s3588_s18, 1024  ;;  %p3590_p3 = scmp.lt.s32.totalorder %s4169_s24, %s3588_s18 }
  0x8e   : > { %p3585_p1 = pnand %p3583_p12, %p4774_p4  ;;  %p3591_p13 = scmp.lt.s32.totalorder %s3589_s15, %s3582_s7 }
  0x90   : > { %p3586_p6 = pneg %p3585_p1  ;;  %p3592_p0 = por %p3591_p13, %p3590_p3 }
  0x92   : > { %p3593_p7 = pnand %p3592_p0, %p3586_p6 }
  0x94   : > { %3596 = shalt.err (!%p3593_p7)
}
  0x95   : > { %s4826_s29 = smov 8   ;;  %s4827_s1 = smov 128  }
  0x96   : > { %3327 = dma.hbm_to_vmem [thread:$0]  (!%p4180_p10), %s4174_s17, 512, %s4169_s24, %s4186_s8, %s4827_s1, %s4827_s1, %s4826_s29  }
  0x97   : > { %s3597_s30 = scalar_lea.hbm %s4729_s3, 4096 }
  0x98   : > { %p3598_p3 = scmp.ne.s32.totalorder %s4729_s3, %s3597_s30  ;;  %p3604_p11 = scmp.lt.u32.totalorder %s3597_s30, %s4729_s3 }
  0x9a   : > { %p3600_p9 = pnand %p3598_p3, %p4099_p5 }
  0x9c   : > { %p3601_p6 = pneg %p3600_p9 }
  0x9e   : > { %p3606_p2 = pnand %p3604_p11, %p3601_p6 }
  0xa0   : > { %3609 = shalt.err (!%p3606_p2)
}
  0xa1   : > { %s3610_s20 = scalar_lea.vmem %s369_s13, 4096  ;;  %p3618_p13 = scmp.lt.s32.totalorder %s369_s13, %s369_s13 }
  0xa2   : > { %p3611_p8 = scmp.ne.s32.totalorder %s369_s13, %s3610_s20  ;;  %p3619_p0 = scmp.lt.s32.totalorder %s3610_s20, %s3610_s20 }
  0xa4   : > { %p3613_p12 = pnand %p3611_p8, %p4099_p5  ;;  %p3620_p7 = por %p3619_p0, %p3618_p13 }
  0xa6   : > { %p3614_p1 = pneg %p3613_p12 }
  0xa8   : > { %p3621_p4 = pnand %p3620_p7, %p3614_p1 }
  0xaa   : > { %3624 = shalt.err (!%p3621_p4)
}
  0xab   : > { %s3867_s24 = smov 256   ;;  %s3868_s17 = smov 16  }
  0xac   : > { %p4828_p3 = scmp.ne.s32.totalorder %s4805_s16, 0  ;;  %s4829_s30 = sand.u32 1, %s3837_s22  }
  0xad   : > { %s2536_s7 = sshll.u32 %s4829_s30, 3  ;;  %s3869_s14 = smov [#allocation14]  }
  0xae   : > { %3317 = dma.hbm_to_vmem [thread:$0]  (!%p4828_p3), %s4729_s3, 4096, %s369_s13, [#allocation9], %s3867_s24, %s3867_s24, %s3868_s17  }
  0xaf   : > { %s394_s18 = sshll.u32 %s3869_s14, 4  ;;  %s2537_s20 = sshll.u32 %s3853_s26, 1  ;;  %s395_s18 = int_to_ptr.vmem [resolvable:$true] %s394_s18 }
  0xb0   : > { %s3625_s9 = scalar_lea.hbm %s4731_s5, 2048 }
  0xb1   : > { %p3626_p4 = scmp.ne.s32.totalorder %s4731_s5, %s3625_s9  ;;  %p3632_p11 = scmp.lt.u32.totalorder %s3625_s9, %s4731_s5 }
  0xb3   : > { %p3628_p9 = pnand %p3626_p4, %p4099_p5 }
  0xb5   : > { %p3629_p6 = pneg %p3628_p9 }
  0xb7   : > { %p3634_p2 = pnand %p3632_p11, %p3629_p6 }
  0xb9   : > { %3637 = shalt.err (!%p3634_p2)
}
  0xba   : > { %s3638_s13 = scalar_lea.vmem %s395_s18, 2048  ;;  %p3646_p13 = scmp.lt.s32.totalorder %s395_s18, %s395_s18 }
  0xbb   : > { %p3639_p8 = scmp.ne.s32.totalorder %s395_s18, %s3638_s13  ;;  %p3647_p0 = scmp.lt.s32.totalorder %s3638_s13, %s3638_s13 }
  0xbd   : > { %p3641_p12 = pnand %p3639_p8, %p4099_p5  ;;  %p3648_p7 = por %p3647_p0, %p3646_p13 }
  0xbf   : > { %p3642_p1 = pneg %p3641_p12 }
  0xc1   : > { %p3649_p10 = pnand %p3648_p7, %p3642_p1 }
  0xc3   : > { %3652 = shalt.err (!%p3649_p10)
}
  0xc4   : > { %3323 = dma.hbm_to_vmem [thread:$0]  (!%p4828_p3), %s4731_s5, 2048, %s395_s18, [#allocation13], %s4827_s1, %s4827_s1, %s4826_s29  }
  0xc5   : > { %s449_s19 = sadd.s32 %s3849_s25, %s2537_s20  ;;  %s444_s23 = scalar_lea.vmem [#allocation10], %s2536_s7 }
  0xc6   : > { %s453_s27 = sshll.u32 %s444_s23, 4  ;;  %s2538_s9 = sshll.u32 %s449_s19, 7  ;;  %s454_s27 = int_to_ptr.vmem [resolvable:$true] %s453_s27 }
  0xc7   : > { %s451_s12 = scalar_lea.hbm %s4728_s2, %s2538_s9  ;;  %p4830_p10 = scmp.ne.s32.totalorder %s4825_s10, 0 }
  0xc8   : > { %s3653_s30 = scalar_lea.hbm %s451_s12, 128  ;;  %s3658_s15 = scalar_lea.hbm %s4728_s2, 512 }
  0xc9   : > { %p3654_p5 = scmp.ne.s32.totalorder %s451_s12, %s3653_s30  ;;  %p4831_p4 = pneg %p4830_p10 }
  0xca   : > { %p3659_p3 = scmp.lt.u32.totalorder %s451_s12, %s4728_s2  ;;  %p3660_p11 = scmp.lt.u32.totalorder %s3658_s15, %s3653_s30 }
  0xcb   : > { %p3656_p9 = pnand %p3654_p5, %p4831_p4  ;;  %p3662_p8 = scmp.lt.u32.totalorder %s3653_s30, %s451_s12 }
  0xcc   : > { %p3661_p2 = por %p3660_p11, %p3659_p3 }
  0xcd   : > { %p3657_p6 = pneg %p3656_p9 }
  0xce   : > { %p3663_p12 = por %p3662_p8, %p3661_p2 }
  0xd0   : > { %p3664_p1 = pnand %p3663_p12, %p3657_p6 }
  0xd2   : > { %3667 = shalt.err (!%p3664_p1)
}
  0xd3   : > { %s3668_s7 = scalar_lea.vmem %s454_s27, 128  ;;  %p4832_p0 = pmov %p4831_p4 }
  0xd4   : > { %p3669_p13 = scmp.ne.s32.totalorder %s454_s27, %s3668_s7  ;;  %s3870_s18 = smov [#allocation10]  }
  0xd5   : > { %s3673_s20 = sshll.u32 %s3870_s18, 4  ;;  %s3674_s20 = int_to_ptr.vmem [resolvable:$false] %s3673_s20 }
  0xd6   : > { %p3671_p7 = pnand %p3669_p13, %p4832_p0  ;;  %s3675_s6 = scalar_lea.vmem %s3674_s20, 256 }
  0xd7   : > { %p3676_p4 = scmp.lt.s32.totalorder %s454_s27, %s3674_s20  ;;  %p3677_p9 = scmp.lt.s32.totalorder %s3675_s6, %s3668_s7 }
  0xd8   : > { %p3672_p5 = pneg %p3671_p7 }
  0xd9   : > { %p3678_p3 = por %p3677_p9, %p3676_p4 }
  0xdb   : > { %p3679_p11 = pnand %p3678_p3, %p3672_p5 }
  0xdd   : > { %3682 = shalt.err (!%p3679_p11)
}
  0xde   : > { %3330 = dma.hbm_to_vmem [thread:$0]  (!%p4830_p10), %s451_s12, 128, %s454_s27, %s4186_s8  }
  0xdf   : > { %p4833_p6 = scmp.ne.s32.totalorder %s4803_s11, 0 }
  0xe0   : > { %s4834_s13 = sld [smem:[#allocation41_spill]] (!%p4833_p6)  ;;  %s464_s0 = sand.u32 (!%p4833_p6), 1, %s4001_s28  }
  0xe1   : > { %462 = sbr.rel (%p4833_p6) target bundleno = 1997 (0x7cd), region = 56  ;;  %s4283_s4 = sand.u32 (!%p4833_p6), 1, %s3833_s21  }
  0xe2   : > { %s2540_s19 = sshll.u32 (!%p4833_p6), %s4283_s4, 5  ;;  %s465_s23 = scalar_lea.sflag (!%p4833_p6), [#allocation6], %s464_s0 }
  0xe3   : > { %s4288_s9 = scalar_lea.vmem (!%p4833_p6), [#allocation5], %s2540_s19 }
  0xe6   : > { %p4835_p2 = scmp.ne.s32.totalorder (!%p4833_p6), %s4834_s13, 0 }
  0xe8   : > { %3784 = dma.done.wait (%p4835_p2), %s465_s23, 512  }
  0xe9   : > { %3786 = vsyncadd (%p4835_p2), %s465_s23, 4294966784  ;;  %s4836_s11 = sld [smem:[#allocation35_spill]] }
  0xef   : > { %p4837_p10 = scmp.ne.s32.totalorder %s4836_s11, 0 }
  0xf1   : > { %3788 = dma.done.wait (%p4837_p10), [#allocation9], 2048  }
  0xf2   : > { %3790 = vsyncadd (%p4837_p10), [#allocation9], 4294965248  ;;  %s2541_s10 = sshll.u32 %s4283_s4, 3 }
  0xf3   : > { %s4299_s8 = scalar_lea.vmem [#allocation10], %s2541_s10 }
  0xf4   : > { %3792 = dma.done.wait (%p4835_p2), %s465_s23, 128  }
  0xf5   : > { %3794 = vsyncadd (%p4835_p2), %s465_s23, 4294967168  ;;  %p4838_p8 = scmp.eq.s32.totalorder %s4001_s28, 0 }
  0xf7   : > { %3796 = dma.done.wait (%p4838_p8), [#allocation9], 4096   ;;  %p4839_p12 = pmov %p4838_p8 }
  0xf8   : > { %p4840_p1 = pmov %p4838_p8 }
  0xf9   : > { %3798 = vsyncadd (%p4839_p12), [#allocation9], 4294963200 }
  0xfa   : > { %3800 = dma.done.wait (%p4840_p1), [#allocation13], 10240   ;;  %p4841_p13 = pmov %p4840_p1 }
  0xfb   : > { %s4842_s27 = sld [smem:[#allocation29_spill]]  ;;  %s2545_s24 = sshll.u32 %s4283_s4, 6 }
  0xfc   : > { %3802 = vsyncadd (%p4841_p13), [#allocation13], 4294957056  ;;  %s4315_s30 = scalar_lea.vmem [#allocation15], %s2545_s24  ;;  %s4319_s14 = scalar_lea.vmem [#allocation18], %s2545_s24 }
  0xfd   : > { %s4843_s15 = sld [smem:[#allocation32_spill]] }
 0x101   : > { %s537_s17 = sand.u32 1, %s4842_s27  }
 0x102   : > { %s2546_s12 = sshll.u32 %s537_s17, 9 }
 0x103   : > { %s4317_s16 = scalar_lea.vmem [#allocation16], %s2546_s12  ;;  %p2548_p0 = scmp.ne.s32.totalorder %s4843_s15, 0 }
 0x104   : > { %v575_v0 = vld [vmem:[#allocation12 + $0x18] sm:$0xff] (!%p2548_p0)  ;;  %v574_v2 = vld [vmem:[#allocation12 + $0x10] sm:$0xff] (!%p2548_p0)  ;;  %v3871_v7 = vmov (!%p2548_p0), 0.0   ;;  %v573_v37 = vld [vmem:[#allocation12 + $0x8] sm:$0xff] (!%p2548_p0) }
 0x105   : > { %555 = sbr.rel (%p2548_p0) target bundleno = 783 (0x30f), region = 84  ;;  %v579_v1 = vld [vmem:[#allocation12 + $0x38] sm:$0xff] (!%p2548_p0)  ;;  %v578_v4 = vld [vmem:[#allocation12 + $0x30] sm:$0xff] (!%p2548_p0)  ;;  %861 = vmatprep.mubr.f32.mxu1 (!%p2548_p0), %v3871_v7  ;;  %700 = vmatprep.mubr.f32.mxu0 (!%p2548_p0), %v3871_v7  ;;  %v577_v38 = vld [vmem:[#allocation12 + $0x28] sm:$0xff] (!%p2548_p0) }
 0x106   : > { %v3009_v3 = vpack.c.bf16 (!%p2548_p0), %v579_v1, %v575_v0  ;;  %v583_v5 = vld [vmem:[#allocation12 + $0x58] sm:$0xff] (!%p2548_p0)  ;;  %v3011_v8 = vpack.c.bf16 (!%p2548_p0), %v578_v4, %v574_v2  ;;  %v582_v10 = vld [vmem:[#allocation12 + $0x50] sm:$0xff] (!%p2548_p0)  ;;  %v572_v39 = vld [vmem:[#allocation12] sm:$0xff] (!%p2548_p0)  ;;  %v2977_v41 = vpack.c.bf16 (!%p2548_p0), %v577_v38, %v573_v37 }
 0x107   : > { %v587_v6 = vld [vmem:[#allocation12 + $0x78] sm:$0xff] (!%p2548_p0)  ;;  %v586_v11 = vld [vmem:[#allocation12 + $0x70] sm:$0xff] (!%p2548_p0)  ;;  %v576_v42 = vld [vmem:[#allocation12 + $0x20] sm:$0xff] (!%p2548_p0) }
 0x108   : > { %v3013_v9 = vpack.c.bf16 (!%p2548_p0), %v587_v6, %v583_v5  ;;  %v591_v12 = vld [vmem:[#allocation12 + $0x98] sm:$0xff] (!%p2548_p0)  ;;  %3010 = vmatprep.subr.bf16.mxu1 (!%p2548_p0), %v3009_v3  ;;  %v3015_v14 = vpack.c.bf16 (!%p2548_p0), %v586_v11, %v582_v10  ;;  %v590_v16 = vld [vmem:[#allocation12 + $0x90] sm:$0xff] (!%p2548_p0)  ;;  %v581_v43 = vld [vmem:[#allocation12 + $0x48] sm:$0xff] (!%p2548_p0)  ;;  %v2979_v45 = vpack.c.bf16 (!%p2548_p0), %v576_v42, %v572_v39  ;;  %2978 = vmatprep.subr.bf16.mxu0 (!%p2548_p0), %v2977_v41 }
 0x109   : > { %v595_v13 = vld [vmem:[#allocation12 + $0xb8] sm:$0xff] (!%p2548_p0)  ;;  %3012 = vmatpush1.bf16.msra.mxu1 (!%p2548_p0), %v3011_v8  ;;  %v594_v17 = vld [vmem:[#allocation12 + $0xb0] sm:$0xff] (!%p2548_p0)  ;;  %v585_v44 = vld [vmem:[#allocation12 + $0x68] sm:$0xff] (!%p2548_p0) }
 0x10a   : > { %3014 = vmatprep.subr.bf16.mxu1 (!%p2548_p0), %v3013_v9  ;;  %v3017_v15 = vpack.c.bf16 (!%p2548_p0), %v595_v13, %v591_v12  ;;  %v599_v18 = vld [vmem:[#allocation12 + $0xd8] sm:$0xff] (!%p2548_p0)  ;;  %v3019_v20 = vpack.c.bf16 (!%p2548_p0), %v594_v17, %v590_v16  ;;  %v598_v22 = vld [vmem:[#allocation12 + $0xd0] sm:$0xff] (!%p2548_p0)  ;;  %v2981_v46 = vpack.c.bf16 (!%p2548_p0), %v585_v44, %v581_v43  ;;  %v580_v47 = vld [vmem:[#allocation12 + $0x40] sm:$0xff] (!%p2548_p0)  ;;  %2980 = vmatpush1.bf16.msra.mxu0 (!%p2548_p0), %v2979_v45 }
 0x10b   : > { %v603_v19 = vld [vmem:[#allocation12 + $0xf8] sm:$0xff] (!%p2548_p0)  ;;  %v602_v23 = vld [vmem:[#allocation12 + $0xf0] sm:$0xff] (!%p2548_p0)  ;;  %v584_v48 = vld [vmem:[#allocation12 + $0x60] sm:$0xff] (!%p2548_p0) }
 0x10c   : > { %v3021_v21 = vpack.c.bf16 %v603_v19, %v599_v18  ;;  %v607_v24 = vld [vmem:[#allocation12 + $0x118] sm:$0xff]  ;;  %v3023_v26 = vpack.c.bf16 %v602_v23, %v598_v22  ;;  %v606_v28 = vld [vmem:[#allocation12 + $0x110] sm:$0xff]  ;;  %v589_v49 = vld [vmem:[#allocation12 + $0x88] sm:$0xff]  ;;  %v2983_v54 = vpack.c.bf16 %v584_v48, %v580_v47  ;;  %2982 = vmatprep.subr.bf16.mxu0 %v2981_v46 }
 0x10d   : > { %3016 = vmatpush1.bf16.msra.mxu1 %v3015_v14  ;;  %v611_v25 = vld [vmem:[#allocation12 + $0x138] sm:$0xff]  ;;  %v610_v29 = vld [vmem:[#allocation12 + $0x130] sm:$0xff]  ;;  %v593_v50 = vld [vmem:[#allocation12 + $0xa8] sm:$0xff] }
 0x10e   : > { %3018 = vmatprep.subr.bf16.mxu1 %v3017_v15  ;;  %v3025_v27 = vpack.c.bf16 %v611_v25, %v607_v24  ;;  %v615_v30 = vld [vmem:[#allocation12 + $0x158] sm:$0xff]  ;;  %v614_v32 = vld [vmem:[#allocation12 + $0x150] sm:$0xff]  ;;  %v3027_v34 = vpack.c.bf16 %v610_v29, %v606_v28  ;;  %v2985_v57 = vpack.c.bf16 %v593_v50, %v589_v49  ;;  %v588_v58 = vld [vmem:[#allocation12 + $0x80] sm:$0xff]  ;;  %2984 = vmatpush1.bf16.msra.mxu0 %v2983_v54 }
 0x10f   : > { %v619_v31 = vld [vmem:[#allocation12 + $0x178] sm:$0xff]  ;;  %v618_v33 = vld [vmem:[#allocation12 + $0x170] sm:$0xff]  ;;  %v592_v59 = vld [vmem:[#allocation12 + $0xa0] sm:$0xff] }
 0x110   : > { %v623_v35 = vld [vmem:[#allocation12 + $0x198] sm:$0xff]  ;;  %v3029_v40 = vpack.c.bf16 %v619_v31, %v615_v30  ;;  %v3031_v51 = vpack.c.bf16 %v618_v33, %v614_v32  ;;  %v622_v52 = vld [vmem:[#allocation12 + $0x190] sm:$0xff]  ;;  %v597_v61 = vld [vmem:[#allocation12 + $0xc8] sm:$0xff]  ;;  %v2987_v1 = vpack.c.bf16 %v592_v59, %v588_v58  ;;  %2986 = vmatprep.subr.bf16.mxu0 %v2985_v57 }
 0x111   : > { %3020 = vmatpush1.bf16.msra.mxu1 %v3019_v20  ;;  %v627_v36 = vld [vmem:[#allocation12 + $0x1b8] sm:$0xff]  ;;  %v626_v53 = vld [vmem:[#allocation12 + $0x1b0] sm:$0xff]  ;;  %v601_v62 = vld [vmem:[#allocation12 + $0xe8] sm:$0xff] }
 0x112   : > { %3022 = vmatprep.subr.bf16.mxu1 %v3021_v21  ;;  %v3033_v55 = vpack.c.bf16 %v627_v36, %v623_v35  ;;  %v631_v56 = vld [vmem:[#allocation12 + $0x1d8] sm:$0xff]  ;;  %v3035_v63 = vpack.c.bf16 %v626_v53, %v622_v52  ;;  %v630_v0 = vld [vmem:[#allocation12 + $0x1d0] sm:$0xff]  ;;  %v2989_v4 = vpack.c.bf16 %v601_v62, %v597_v61  ;;  %v596_v5 = vld [vmem:[#allocation12 + $0xc0] sm:$0xff]  ;;  %2988 = vmatpush1.bf16.msra.mxu0 %v2987_v1 }
 0x113   : > { %v635_v60 = vld [vmem:[#allocation12 + $0x1f8] sm:$0xff]  ;;  %v634_v3 = vld [vmem:[#allocation12 + $0x1f0] sm:$0xff]  ;;  %v600_v6 = vld [vmem:[#allocation12 + $0xe0] sm:$0xff] }
 0x114   : > { %v3037_v2 = vpack.c.bf16 %v635_v60, %v631_v56  ;;  %v605_v8 = vld [vmem:[#allocation12 + $0x108] sm:$0xff]  ;;  %v1022_v10 = vld [vmem:[#allocation14] sm:$0xff]  ;;  %v3039_v12 = vpack.c.bf16 %v634_v3, %v630_v0  ;;  %v2991_v13 = vpack.c.bf16 %v600_v6, %v596_v5  ;;  %2990 = vmatprep.subr.bf16.mxu0 %v2989_v4  ;;  %v1024_v20 = vld [vmem:[#allocation14 + $0x10] sm:$0xff] }
 0x115   : > { %3024 = vmatpush1.bf16.msra.mxu1 %v3023_v26  ;;  %v609_v9 = vld [vmem:[#allocation12 + $0x128] sm:$0xff]  ;;  %v604_v15 = vld [vmem:[#allocation12 + $0x100] sm:$0xff]  ;;  %v1025_v21 = vld [vmem:[#allocation14 + $0x18] sm:$0xff] }
 0x116   : > { %3026 = vmatprep.subr.bf16.mxu1 %v3025_v27  ;;  %v1023_v11 = vld [vmem:[#allocation14 + $0x8] sm:$0xff]  ;;  %v2993_v14 = vpack.c.bf16 %v609_v9, %v605_v8  ;;  %v608_v16 = vld [vmem:[#allocation12 + $0x120] sm:$0xff]  ;;  %v556_v22 = vld [vmem:[#allocation8] sm:$0xff]  ;;  %2992 = vmatpush1.bf16.msra.mxu0 %v2991_v13  ;;  %v4327_v29 = vpack.c.bf16 %v1025_v21, %v1024_v20 }
 0x117   : > { %v4324_v17 = vpack.c.bf16 %v1023_v11, %v1022_v10  ;;  %v613_v18 = vld [vmem:[#allocation12 + $0x148] sm:$0xff]  ;;  %v2995_v23 = vpack.c.bf16 %v608_v16, %v604_v15  ;;  %v612_v25 = vld [vmem:[#allocation12 + $0x140] sm:$0xff]  ;;  %v557_v32 = vld [vmem:[#allocation8 + $0x8] sm:$0xff] }
 0x118   : > { %v617_v19 = vld [vmem:[#allocation12 + $0x168] sm:$0xff]  ;;  %2994 = vmatprep.subr.bf16.mxu0 %v2993_v14  ;;  %v616_v26 = vld [vmem:[#allocation12 + $0x160] sm:$0xff]  ;;  %v1029_v41 = vld [vmem:[#allocation14 + $0x38] sm:$0xff] }
 0x119   : > { %3028 = vmatpush1.bf16.msra.mxu1 %v3027_v34  ;;  %v2997_v24 = vpack.c.bf16 %v617_v19, %v613_v18  ;;  %v621_v27 = vld [vmem:[#allocation12 + $0x188] sm:$0xff]  ;;  %v1026_v30 = vld [vmem:[#allocation14 + $0x20] sm:$0xff]  ;;  %v2999_v33 = vpack.c.bf16 %v616_v26, %v612_v25  ;;  %v1032_v53 = vld [vmem:[#allocation14 + $0x50] sm:$0xff] }
 0x11a   : > { %3030 = vmatprep.subr.bf16.mxu1 %v3029_v40  ;;  %v625_v28 = vld [vmem:[#allocation12 + $0x1a8] sm:$0xff]  ;;  %2996 = vmatpush1.bf16.msra.mxu0 %v2995_v23  ;;  %v620_v35 = vld [vmem:[#allocation12 + $0x180] sm:$0xff]  ;;  %v1028_v40 = vld [vmem:[#allocation14 + $0x30] sm:$0xff] }
 0x11b   : > { %v1027_v31 = vld [vmem:[#allocation14 + $0x28] sm:$0xff]  ;;  %2998 = vmatprep.subr.bf16.mxu0 %v2997_v24  ;;  %v3001_v34 = vpack.c.bf16 %v625_v28, %v621_v27  ;;  %v624_v36 = vld [vmem:[#allocation12 + $0x1a0] sm:$0xff]  ;;  %v3053_v47 = vpack.c.bf16 %v1029_v41, %v1028_v40  ;;  %v1033_v54 = vld [vmem:[#allocation14 + $0x58] sm:$0xff] }
 0x11c   : > { %v629_v37 = vld [vmem:[#allocation12 + $0x1c8] sm:$0xff]  ;;  %v3049_v39 = vpack.c.bf16 %v1027_v31, %v1026_v30  ;;  %v558_v42 = vld [vmem:[#allocation8 + $0x10] sm:$0xff]  ;;  %v3003_v43 = vpack.c.bf16 %v624_v36, %v620_v35  ;;  %v3061_v56 = vpack.c.bf16 %v1033_v54, %v1032_v53  ;;  %v561_v59 = vld [vmem:[#allocation8 + $0x28] sm:$0xff] }
 0x11d   : > { %3032 = vmatpush1.bf16.msra.mxu1 %v3031_v51  ;;  %v633_v38 = vld [vmem:[#allocation12 + $0x1e8] sm:$0xff]  ;;  %v628_v45 = vld [vmem:[#allocation12 + $0x1c0] sm:$0xff]  ;;  %v565_v0 = vld [vmem:[#allocation8 + $0x48] sm:$0xff] }
 0x11e   : > { %3034 = vmatprep.subr.bf16.mxu1 %v3033_v55  ;;  %3000 = vmatpush1.bf16.msra.mxu0 %v2999_v33  ;;  %v3005_v44 = vpack.c.bf16 %v633_v38, %v629_v37  ;;  %v632_v46 = vld [vmem:[#allocation12 + $0x1e0] sm:$0xff]  ;;  %v1031_v49 = vld [vmem:[#allocation14 + $0x48] sm:$0xff]  ;;  %v560_v55 = vld [vmem:[#allocation8 + $0x20] sm:$0xff] }
 0x11f   : > { %3002 = vmatprep.subr.bf16.mxu0 %v3001_v34  ;;  %v1030_v48 = vld [vmem:[#allocation14 + $0x40] sm:$0xff]  ;;  %v559_v50 = vld [vmem:[#allocation8 + $0x18] sm:$0xff]  ;;  %v3007_v51 = vpack.c.bf16 %v632_v46, %v628_v45  ;;  %v568_v3 = vld [vmem:[#allocation8 + $0x60] sm:$0xff] }
 0x120   : > { %v3057_v52 = vpack.c.bf16 %v1031_v49, %v1030_v48  ;;  %v1034_v57 = vld [vmem:[#allocation14 + $0x60] sm:$0xff]  ;;  %v1035_v58 = vld [vmem:[#allocation14 + $0x68] sm:$0xff]  ;;  %v569_v4 = vld [vmem:[#allocation8 + $0x68] sm:$0xff] }
 0x121   : > { %3036 = vmatpush1.bf16.msra.mxu1 %v3035_v63  ;;  %v3065_v60 = vpack.c.bf16 %v1035_v58, %v1034_v57  ;;  %v562_v61 = vld [vmem:[#allocation8 + $0x30] sm:$0xff]  ;;  %v563_v62 = vld [vmem:[#allocation8 + $0x38] sm:$0xff]  ;;  %v564_v63 = vld [vmem:[#allocation8 + $0x40] sm:$0xff] }
 0x122   : > { %3038 = vmatprep.subr.bf16.mxu1 %v3037_v2  ;;  %3004 = vmatpush1.bf16.msra.mxu0 %v3003_v43  ;;  %v566_v1 = vld [vmem:[#allocation8 + $0x50] sm:$0xff]  ;;  %v567_v2 = vld [vmem:[#allocation8 + $0x58] sm:$0xff]  ;;  %v1036_v8 = vld [vmem:[#allocation14 + $0x70] sm:$0xff] }
 0x123   : > { %3006 = vmatprep.subr.bf16.mxu0 %v3005_v44  ;;  %v570_v5 = vld [vmem:[#allocation8 + $0x70] sm:$0xff]  ;;  %v571_v6 = vld [vmem:[#allocation8 + $0x78] sm:$0xff]  ;;  %v1037_v9 = vld [vmem:[#allocation14 + $0x78] sm:$0xff] }
 0x124   : > { %v3069_v10 = vpack.c.bf16 %v1037_v9, %v1036_v8 }
 0x125   : > { %3040 = vmatpush1.bf16.msra.mxu1 %v3039_v12 }
 0x126   : > { %3074 = vmatprep.subr.bf16.mxu1 %v4324_v17  ;;  %3008 = vmatpush1.bf16.msra.mxu0 %v3007_v51 }
 0x127   : > { %3042 = vmatprep.subr.bf16.mxu0 %v4324_v17 }
 0x128   : > { %862 = vmatmul.mubr.f32.vlgmr.msra.gmra.mrb[0].mxu1 %v556_v22 }
 0x129   : > { %867 = vmatprep.mubr.f32.mxu1 %v3871_v7  ;;  %3076 = vmatpush3.bf16.msra.mxu1 %v4324_v17 }
 0x12a   : > { %3078 = vmatprep.subr.bf16.mxu1 %v4327_v29  ;;  %701 = vmatmul.mubr.f32.vlgmr.msra.gmra.mrb[0].mxu0 %v556_v22 }
 0x12b   : > { %706 = vmatprep.mubr.f32.mxu0 %v3871_v7  ;;  %3044 = vmatpush3.bf16.msra.mxu0 %v4324_v17 }
 0x12c   : > { %868 = vmatmul.mubr.f32.gmra.mrb[2].mxu1 %v557_v32  ;;  %3046 = vmatprep.subr.bf16.mxu0 %v4327_v29 }
 0x12d   : > { %873 = vmatprep.mubr.f32.mxu1 %v3871_v7  ;;  %3080 = vmatpush3.bf16.msra.mxu1 %v4327_v29 }
 0x12e   : > { %3082 = vmatprep.subr.bf16.mxu1 %v3049_v39  ;;  %707 = vmatmul.mubr.f32.gmra.mrb[2].mxu0 %v557_v32 }
 0x12f   : > { %712 = vmatprep.mubr.f32.mxu0 %v3871_v7  ;;  %3048 = vmatpush3.bf16.msra.mxu0 %v4327_v29 }
 0x130   : > { %874 = vmatmul.mubr.f32.gmra.mrb[4].mxu1 %v558_v42  ;;  %3050 = vmatprep.subr.bf16.mxu0 %v3049_v39 }
 0x131   : > { %879 = vmatprep.mubr.f32.mxu1 %v3871_v7  ;;  %3084 = vmatpush3.bf16.msra.mxu1 %v3049_v39 }
 0x132   : > { %3086 = vmatprep.subr.bf16.mxu1 %v3053_v47  ;;  %713 = vmatmul.mubr.f32.gmra.mrb[4].mxu0 %v558_v42 }
 0x133   : > { %718 = vmatprep.mubr.f32.mxu0 %v3871_v7  ;;  %3052 = vmatpush3.bf16.msra.mxu0 %v3049_v39 }
 0x134   : > { %880 = vmatmul.mubr.f32.gmra.mrb[6].mxu1 %v559_v50  ;;  %3054 = vmatprep.subr.bf16.mxu0 %v3053_v47 }
 0x135   : > { %885 = vmatprep.mubr.f32.mxu1 %v3871_v7  ;;  %3088 = vmatpush3.bf16.msra.mxu1 %v3053_v47 }
 0x136   : > { %3090 = vmatprep.subr.bf16.mxu1 %v3057_v52  ;;  %719 = vmatmul.mubr.f32.gmra.mrb[6].mxu0 %v559_v50 }
 0x137   : > { %724 = vmatprep.mubr.f32.mxu0 %v3871_v7  ;;  %3056 = vmatpush3.bf16.msra.mxu0 %v3053_v47 }
 0x138   : > { %886 = vmatmul.mubr.f32.gmra.mrb[8].mxu1 %v560_v55  ;;  %3058 = vmatprep.subr.bf16.mxu0 %v3057_v52 }
 0x139   : > { %891 = vmatprep.mubr.f32.mxu1 %v3871_v7  ;;  %3092 = vmatpush3.bf16.msra.mxu1 %v3057_v52 }
 0x13a   : > { %3094 = vmatprep.subr.bf16.mxu1 %v3061_v56  ;;  %725 = vmatmul.mubr.f32.gmra.mrb[8].mxu0 %v560_v55 }
 0x13b   : > { %730 = vmatprep.mubr.f32.mxu0 %v3871_v7  ;;  %3060 = vmatpush3.bf16.msra.mxu0 %v3057_v52 }
 0x13c   : > { %892 = vmatmul.mubr.f32.gmra.mrb[10].mxu1 %v561_v59  ;;  %3062 = vmatprep.subr.bf16.mxu0 %v3061_v56 }
 0x13d   : > { %897 = vmatprep.mubr.f32.mxu1 %v3871_v7  ;;  %3096 = vmatpush3.bf16.msra.mxu1 %v3061_v56 }
 0x13e   : > { %3098 = vmatprep.subr.bf16.mxu1 %v3065_v60  ;;  %731 = vmatmul.mubr.f32.gmra.mrb[10].mxu0 %v561_v59 }
 0x13f   : > { %736 = vmatprep.mubr.f32.mxu0 %v3871_v7  ;;  %3064 = vmatpush3.bf16.msra.mxu0 %v3061_v56 }
 0x140   : > { %898 = vmatmul.mubr.f32.gmra.mrb[12].mxu1 %v562_v61  ;;  %3066 = vmatprep.subr.bf16.mxu0 %v3065_v60 }
 0x141   : > { %903 = vmatprep.mubr.f32.mxu1 %v3871_v7  ;;  %3100 = vmatpush3.bf16.msra.mxu1 %v3065_v60 }
 0x142   : > { %737 = vmatmul.mubr.f32.gmra.mrb[12].mxu0 %v562_v61  ;;  %3102 = vmatprep.subr.bf16.mxu1 %v3069_v10 }
 0x143   : > { %742 = vmatprep.mubr.f32.mxu0 %v3871_v7  ;;  %3068 = vmatpush3.bf16.msra.mxu0 %v3065_v60 }
 0x144   : > { %904 = vmatmul.mubr.f32.gmra.mrb[14].mxu1 %v563_v62  ;;  %3070 = vmatprep.subr.bf16.mxu0 %v3069_v10 }
 0x145   : > { %909 = vmatprep.mubr.f32.mxu1 %v3871_v7  ;;  %3104 = vmatpush3.bf16.msra.mxu1 %v3069_v10 }
 0x146   : > { %743 = vmatmul.mubr.f32.gmra.mrb[14].mxu0 %v563_v62 }
 0x147   : > { %748 = vmatprep.mubr.f32.mxu0 %v3871_v7  ;;  %3072 = vmatpush3.bf16.msra.mxu0 %v3069_v10 }
 0x148   : > { %910 = vmatmul.mubr.f32.gmra.mrb[16].mxu1 %v564_v63 }
 0x149   : > { %915 = vmatprep.mubr.f32.mxu1 %v3871_v7 }
 0x14a   : > { %749 = vmatmul.mubr.f32.gmra.mrb[16].mxu0 %v564_v63 }
 0x14b   : > { %754 = vmatprep.mubr.f32.mxu0 %v3871_v7 }
 0x14c   : > { %916 = vmatmul.mubr.f32.gmra.mrb[18].mxu1 %v565_v0 }
 0x14d   : > { %921 = vmatprep.mubr.f32.mxu1 %v3871_v7 }
 0x14e   : > { %755 = vmatmul.mubr.f32.gmra.mrb[18].mxu0 %v565_v0 }
 0x14f   : > { %760 = vmatprep.mubr.f32.mxu0 %v3871_v7 }
 0x150   : > { %922 = vmatmul.mubr.f32.gmra.mrb[20].mxu1 %v566_v1 }
 0x151   : > { %927 = vmatprep.mubr.f32.mxu1 %v3871_v7 }
 0x152   : > { %761 = vmatmul.mubr.f32.gmra.mrb[20].mxu0 %v566_v1 }
 0x153   : > { %766 = vmatprep.mubr.f32.mxu0 %v3871_v7 }
 0x154   : > { %928 = vmatmul.mubr.f32.gmra.mrb[22].mxu1 %v567_v2 }
 0x155   : > { %933 = vmatprep.mubr.f32.mxu1 %v3871_v7 }
 0x156   : > { %767 = vmatmul.mubr.f32.gmra.mrb[22].mxu0 %v567_v2 }
 0x157   : > { %772 = vmatprep.mubr.f32.mxu0 %v3871_v7 }
 0x158   : > { %934 = vmatmul.mubr.f32.gmra.mrb[24].mxu1 %v568_v3 }
 0x159   : > { %939 = vmatprep.mubr.f32.mxu1 %v3871_v7 }
 0x15a   : > { %773 = vmatmul.mubr.f32.gmra.mrb[24].mxu0 %v568_v3 }
 0x15b   : > { %778 = vmatprep.mubr.f32.mxu0 %v3871_v7 }
 0x15c   : > { %940 = vmatmul.mubr.f32.gmra.mrb[26].mxu1 %v569_v4 }
 0x15d   : > { %945 = vmatprep.mubr.f32.mxu1 %v3871_v7 }
 0x15e   : > { %779 = vmatmul.mubr.f32.gmra.mrb[26].mxu0 %v569_v4 }
 0x15f   : > { %784 = vmatprep.mubr.f32.mxu0 %v3871_v7 }
 0x160   : > { %946 = vmatmul.mubr.f32.gmra.mrb[28].mxu1 %v570_v5 }
 0x161   : > { %951 = vmatprep.mubr.f32.mxu1 %v3871_v7 }
 0x162   : > { %785 = vmatmul.mubr.f32.gmra.mrb[28].mxu0 %v570_v5 }
 0x163   : > { %790 = vmatprep.mubr.f32.mxu0 %v3871_v7 }
 0x164   : > { %952 = vmatmul.mubr.f32.gmra.mrb[30].mxu1 %v571_v6 }
 0x166   : > { %791 = vmatmul.mubr.f32.gmra.mrb[30].mxu0 %v571_v6 }
 0x1fb   : > { %v863_v11 = vpop.f32.mrb[0].mxu1 }
 0x1fc   : > { %960 = vst [vmem:[%s4317_s16 + $0x10] sm:$0xff] %v863_v11  ;;  %v865_v12 = vpop.f32.mrb[1].mxu1  ;;  %2745 = vmatprep.mubr.f32.mxu0 %v863_v11 }
 0x1fd   : > { %961 = vst [vmem:[%s4317_s16 + $0x18] sm:$0xff] %v865_v12  ;;  %2801 = vmatprep.mubr.f32.mxu1 %v865_v12  ;;  %v702_v19 = vpop.f32.mrb[0].mxu0 }
 0x1fe   : > { %958 = vst [vmem:[%s4317_s16] sm:$0xff] %v702_v19  ;;  %1038 = vst [vmem:[#allocation2] sm:$0xff] %v702_v19  ;;  %v704_v21 = vpop.f32.mrb[1].mxu0 }
 0x1ff   : > { %v869_v7 = vpop.f32.mrb[2].mxu1  ;;  %959 = vst [vmem:[%s4317_s16 + $0x8] sm:$0xff] %v704_v21  ;;  %1216 = vst [vmem:[#allocation2 + $0x80] sm:$0xff] %v704_v21 }
 0x200   : > { %964 = vst [vmem:[%s4317_s16 + $0x30] sm:$0xff] %v869_v7  ;;  %v871_v13 = vpop.f32.mrb[3].mxu1  ;;  %2746 = vmatmul.mubr.f32.vlgmr.msra.gmra.mrb[32].mxu0 %v869_v7 }
 0x201   : > { %965 = vst [vmem:[%s4317_s16 + $0x38] sm:$0xff] %v871_v13  ;;  %2802 = vmatmul.mubr.f32.vlgmr.msra.gmra.mrb[32].mxu1 %v871_v13  ;;  %v708_v23 = vpop.f32.mrb[2].mxu0 }
 0x202   : > { %962 = vst [vmem:[%s4317_s16 + $0x20] sm:$0xff] %v708_v23  ;;  %1039 = vst [vmem:[#allocation2 + $0x8] sm:$0xff] %v708_v23  ;;  %v710_v25 = vpop.f32.mrb[3].mxu0 }
 0x203   : > { %v875_v14 = vpop.f32.mrb[4].mxu1  ;;  %963 = vst [vmem:[%s4317_s16 + $0x28] sm:$0xff] %v710_v25  ;;  %1217 = vst [vmem:[#allocation2 + $0x88] sm:$0xff] %v710_v25 }
 0x204   : > { %968 = vst [vmem:[%s4317_s16 + $0x50] sm:$0xff] %v875_v14  ;;  %v877_v15 = vpop.f32.mrb[5].mxu1  ;;  %2748 = vmatprep.mubr.f32.mxu0 %v875_v14 }
 0x205   : > { %969 = vst [vmem:[%s4317_s16 + $0x58] sm:$0xff] %v877_v15  ;;  %2804 = vmatprep.mubr.f32.mxu1 %v877_v15  ;;  %v714_v27 = vpop.f32.mrb[4].mxu0 }
 0x206   : > { %966 = vst [vmem:[%s4317_s16 + $0x40] sm:$0xff] %v714_v27  ;;  %1040 = vst [vmem:[#allocation2 + $0x10] sm:$0xff] %v714_v27  ;;  %v716_v29 = vpop.f32.mrb[5].mxu0 }
 0x207   : > { %v881_v16 = vpop.f32.mrb[6].mxu1  ;;  %967 = vst [vmem:[%s4317_s16 + $0x48] sm:$0xff] %v716_v29  ;;  %1218 = vst [vmem:[#allocation2 + $0x90] sm:$0xff] %v716_v29 }
 0x208   : > { %972 = vst [vmem:[%s4317_s16 + $0x70] sm:$0xff] %v881_v16  ;;  %v883_v17 = vpop.f32.mrb[7].mxu1  ;;  %2749 = vmatmul.mubr.f32.gmra.mrb[34].mxu0 %v881_v16 }
 0x209   : > { %973 = vst [vmem:[%s4317_s16 + $0x78] sm:$0xff] %v883_v17  ;;  %2805 = vmatmul.mubr.f32.gmra.mrb[34].mxu1 %v883_v17  ;;  %v720_v31 = vpop.f32.mrb[6].mxu0 }
 0x20a   : > { %970 = vst [vmem:[%s4317_s16 + $0x60] sm:$0xff] %v720_v31  ;;  %1041 = vst [vmem:[#allocation2 + $0x18] sm:$0xff] %v720_v31  ;;  %v722_v33 = vpop.f32.mrb[7].mxu0 }
 0x20b   : > { %v887_v18 = vpop.f32.mrb[8].mxu1  ;;  %971 = vst [vmem:[%s4317_s16 + $0x68] sm:$0xff] %v722_v33  ;;  %1219 = vst [vmem:[#allocation2 + $0x98] sm:$0xff] %v722_v33 }
 0x20c   : > { %976 = vst [vmem:[%s4317_s16 + $0x90] sm:$0xff] %v887_v18  ;;  %v889_v20 = vpop.f32.mrb[9].mxu1  ;;  %2751 = vmatprep.mubr.f32.mxu0 %v887_v18 }
 0x20d   : > { %977 = vst [vmem:[%s4317_s16 + $0x98] sm:$0xff] %v889_v20  ;;  %2807 = vmatprep.mubr.f32.mxu1 %v889_v20  ;;  %v726_v35 = vpop.f32.mrb[8].mxu0 }
 0x20e   : > { %974 = vst [vmem:[%s4317_s16 + $0x80] sm:$0xff] %v726_v35  ;;  %1042 = vst [vmem:[#allocation2 + $0x20] sm:$0xff] %v726_v35  ;;  %v728_v37 = vpop.f32.mrb[9].mxu0 }
 0x20f   : > { %v893_v22 = vpop.f32.mrb[10].mxu1  ;;  %975 = vst [vmem:[%s4317_s16 + $0x88] sm:$0xff] %v728_v37  ;;  %1220 = vst [vmem:[#allocation2 + $0xa0] sm:$0xff] %v728_v37 }
 0x210   : > { %980 = vst [vmem:[%s4317_s16 + $0xb0] sm:$0xff] %v893_v22  ;;  %v895_v24 = vpop.f32.mrb[11].mxu1  ;;  %2752 = vmatmul.mubr.f32.gmra.mrb[36].mxu0 %v893_v22 }
 0x211   : > { %981 = vst [vmem:[%s4317_s16 + $0xb8] sm:$0xff] %v895_v24  ;;  %2808 = vmatmul.mubr.f32.gmra.mrb[36].mxu1 %v895_v24  ;;  %v732_v39 = vpop.f32.mrb[10].mxu0 }
 0x212   : > { %978 = vst [vmem:[%s4317_s16 + $0xa0] sm:$0xff] %v732_v39  ;;  %1043 = vst [vmem:[#allocation2 + $0x28] sm:$0xff] %v732_v39  ;;  %v734_v41 = vpop.f32.mrb[11].mxu0 }
 0x213   : > { %v899_v26 = vpop.f32.mrb[12].mxu1  ;;  %979 = vst [vmem:[%s4317_s16 + $0xa8] sm:$0xff] %v734_v41  ;;  %1221 = vst [vmem:[#allocation2 + $0xa8] sm:$0xff] %v734_v41 }
 0x214   : > { %984 = vst [vmem:[%s4317_s16 + $0xd0] sm:$0xff] %v899_v26  ;;  %v901_v28 = vpop.f32.mrb[13].mxu1  ;;  %2754 = vmatprep.mubr.f32.mxu0 %v899_v26 }
 0x215   : > { %985 = vst [vmem:[%s4317_s16 + $0xd8] sm:$0xff] %v901_v28  ;;  %2810 = vmatprep.mubr.f32.mxu1 %v901_v28  ;;  %v738_v43 = vpop.f32.mrb[12].mxu0 }
 0x216   : > { %982 = vst [vmem:[%s4317_s16 + $0xc0] sm:$0xff] %v738_v43  ;;  %1044 = vst [vmem:[#allocation2 + $0x30] sm:$0xff] %v738_v43  ;;  %v740_v45 = vpop.f32.mrb[13].mxu0 }
 0x217   : > { %v905_v30 = vpop.f32.mrb[14].mxu1  ;;  %983 = vst [vmem:[%s4317_s16 + $0xc8] sm:$0xff] %v740_v45  ;;  %1222 = vst [vmem:[#allocation2 + $0xb0] sm:$0xff] %v740_v45 }
 0x218   : > { %988 = vst [vmem:[%s4317_s16 + $0xf0] sm:$0xff] %v905_v30  ;;  %v907_v32 = vpop.f32.mrb[15].mxu1  ;;  %2755 = vmatmul.mubr.f32.gmra.mrb[38].mxu0 %v905_v30 }
 0x219   : > { %989 = vst [vmem:[%s4317_s16 + $0xf8] sm:$0xff] %v907_v32  ;;  %2811 = vmatmul.mubr.f32.gmra.mrb[38].mxu1 %v907_v32  ;;  %v744_v47 = vpop.f32.mrb[14].mxu0 }
 0x21a   : > { %986 = vst [vmem:[%s4317_s16 + $0xe0] sm:$0xff] %v744_v47  ;;  %1045 = vst [vmem:[#allocation2 + $0x38] sm:$0xff] %v744_v47  ;;  %v746_v49 = vpop.f32.mrb[15].mxu0 }
 0x21b   : > { %v911_v34 = vpop.f32.mrb[16].mxu1  ;;  %987 = vst [vmem:[%s4317_s16 + $0xe8] sm:$0xff] %v746_v49  ;;  %1223 = vst [vmem:[#allocation2 + $0xb8] sm:$0xff] %v746_v49 }
 0x21c   : > { %992 = vst [vmem:[%s4317_s16 + $0x110] sm:$0xff] %v911_v34  ;;  %v913_v36 = vpop.f32.mrb[17].mxu1  ;;  %2757 = vmatprep.mubr.f32.mxu0 %v911_v34 }
 0x21d   : > { %993 = vst [vmem:[%s4317_s16 + $0x118] sm:$0xff] %v913_v36  ;;  %2813 = vmatprep.mubr.f32.mxu1 %v913_v36  ;;  %v750_v51 = vpop.f32.mrb[16].mxu0 }
 0x21e   : > { %990 = vst [vmem:[%s4317_s16 + $0x100] sm:$0xff] %v750_v51  ;;  %1046 = vst [vmem:[#allocation2 + $0x40] sm:$0xff] %v750_v51  ;;  %v752_v53 = vpop.f32.mrb[17].mxu0 }
 0x21f   : > { %v917_v38 = vpop.f32.mrb[18].mxu1  ;;  %991 = vst [vmem:[%s4317_s16 + $0x108] sm:$0xff] %v752_v53  ;;  %1224 = vst [vmem:[#allocation2 + $0xc0] sm:$0xff] %v752_v53 }
 0x220   : > { %996 = vst [vmem:[%s4317_s16 + $0x130] sm:$0xff] %v917_v38  ;;  %v919_v40 = vpop.f32.mrb[19].mxu1  ;;  %2758 = vmatmul.mubr.f32.gmra.mrb[40].mxu0 %v917_v38 }
 0x221   : > { %997 = vst [vmem:[%s4317_s16 + $0x138] sm:$0xff] %v919_v40  ;;  %2814 = vmatmul.mubr.f32.gmra.mrb[40].mxu1 %v919_v40  ;;  %v756_v55 = vpop.f32.mrb[18].mxu0 }
 0x222   : > { %994 = vst [vmem:[%s4317_s16 + $0x120] sm:$0xff] %v756_v55  ;;  %1047 = vst [vmem:[#allocation2 + $0x48] sm:$0xff] %v756_v55  ;;  %v758_v57 = vpop.f32.mrb[19].mxu0 }
 0x223   : > { %v923_v42 = vpop.f32.mrb[20].mxu1  ;;  %995 = vst [vmem:[%s4317_s16 + $0x128] sm:$0xff] %v758_v57  ;;  %1225 = vst [vmem:[#allocation2 + $0xc8] sm:$0xff] %v758_v57 }
 0x224   : > { %1000 = vst [vmem:[%s4317_s16 + $0x150] sm:$0xff] %v923_v42  ;;  %v925_v44 = vpop.f32.mrb[21].mxu1  ;;  %2760 = vmatprep.mubr.f32.mxu0 %v923_v42 }
 0x225   : > { %1001 = vst [vmem:[%s4317_s16 + $0x158] sm:$0xff] %v925_v44  ;;  %2816 = vmatprep.mubr.f32.mxu1 %v925_v44  ;;  %v762_v59 = vpop.f32.mrb[20].mxu0 }
 0x226   : > { %998 = vst [vmem:[%s4317_s16 + $0x140] sm:$0xff] %v762_v59  ;;  %1048 = vst [vmem:[#allocation2 + $0x50] sm:$0xff] %v762_v59  ;;  %v764_v61 = vpop.f32.mrb[21].mxu0 }
 0x227   : > { %v929_v46 = vpop.f32.mrb[22].mxu1  ;;  %999 = vst [vmem:[%s4317_s16 + $0x148] sm:$0xff] %v764_v61  ;;  %1226 = vst [vmem:[#allocation2 + $0xd0] sm:$0xff] %v764_v61 }
 0x228   : > { %1004 = vst [vmem:[%s4317_s16 + $0x170] sm:$0xff] %v929_v46  ;;  %v931_v48 = vpop.f32.mrb[23].mxu1  ;;  %2761 = vmatmul.mubr.f32.gmra.mrb[42].mxu0 %v929_v46 }
 0x229   : > { %1005 = vst [vmem:[%s4317_s16 + $0x178] sm:$0xff] %v931_v48  ;;  %2817 = vmatmul.mubr.f32.gmra.mrb[42].mxu1 %v931_v48  ;;  %v768_v63 = vpop.f32.mrb[22].mxu0 }
 0x22a   : > { %1002 = vst [vmem:[%s4317_s16 + $0x160] sm:$0xff] %v768_v63  ;;  %1049 = vst [vmem:[#allocation2 + $0x58] sm:$0xff] %v768_v63  ;;  %v770_v1 = vpop.f32.mrb[23].mxu0 }
 0x22b   : > { %v935_v50 = vpop.f32.mrb[24].mxu1  ;;  %1003 = vst [vmem:[%s4317_s16 + $0x168] sm:$0xff] %v770_v1  ;;  %1227 = vst [vmem:[#allocation2 + $0xd8] sm:$0xff] %v770_v1 }
 0x22c   : > { %1008 = vst [vmem:[%s4317_s16 + $0x190] sm:$0xff] %v935_v50  ;;  %v937_v52 = vpop.f32.mrb[25].mxu1  ;;  %2763 = vmatprep.mubr.f32.mxu0 %v935_v50 }
 0x22d   : > { %1009 = vst [vmem:[%s4317_s16 + $0x198] sm:$0xff] %v937_v52  ;;  %2819 = vmatprep.mubr.f32.mxu1 %v937_v52  ;;  %v774_v2 = vpop.f32.mrb[24].mxu0 }
 0x22e   : > { %1006 = vst [vmem:[%s4317_s16 + $0x180] sm:$0xff] %v774_v2  ;;  %1050 = vst [vmem:[#allocation2 + $0x60] sm:$0xff] %v774_v2  ;;  %v776_v3 = vpop.f32.mrb[25].mxu0 }
 0x22f   : > { %v941_v54 = vpop.f32.mrb[26].mxu1  ;;  %1007 = vst [vmem:[%s4317_s16 + $0x188] sm:$0xff] %v776_v3  ;;  %1228 = vst [vmem:[#allocation2 + $0xe0] sm:$0xff] %v776_v3 }
 0x230   : > { %1012 = vst [vmem:[%s4317_s16 + $0x1b0] sm:$0xff] %v941_v54  ;;  %v943_v56 = vpop.f32.mrb[27].mxu1  ;;  %2764 = vmatmul.mubr.f32.gmra.mrb[44].mxu0 %v941_v54 }
 0x231   : > { %1013 = vst [vmem:[%s4317_s16 + $0x1b8] sm:$0xff] %v943_v56  ;;  %2820 = vmatmul.mubr.f32.gmra.mrb[44].mxu1 %v943_v56  ;;  %v780_v4 = vpop.f32.mrb[26].mxu0 }
 0x232   : > { %1010 = vst [vmem:[%s4317_s16 + $0x1a0] sm:$0xff] %v780_v4  ;;  %1051 = vst [vmem:[#allocation2 + $0x68] sm:$0xff] %v780_v4  ;;  %v782_v5 = vpop.f32.mrb[27].mxu0 }
 0x233   : > { %v947_v58 = vpop.f32.mrb[28].mxu1  ;;  %1011 = vst [vmem:[%s4317_s16 + $0x1a8] sm:$0xff] %v782_v5  ;;  %1229 = vst [vmem:[#allocation2 + $0xe8] sm:$0xff] %v782_v5 }
 0x234   : > { %1016 = vst [vmem:[%s4317_s16 + $0x1d0] sm:$0xff] %v947_v58  ;;  %v949_v60 = vpop.f32.mrb[29].mxu1  ;;  %2766 = vmatprep.mubr.f32.mxu0 %v947_v58 }
 0x235   : > { %1017 = vst [vmem:[%s4317_s16 + $0x1d8] sm:$0xff] %v949_v60  ;;  %2822 = vmatprep.mubr.f32.mxu1 %v949_v60  ;;  %v786_v6 = vpop.f32.mrb[28].mxu0 }
 0x236   : > { %1014 = vst [vmem:[%s4317_s16 + $0x1c0] sm:$0xff] %v786_v6  ;;  %1052 = vst [vmem:[#allocation2 + $0x70] sm:$0xff] %v786_v6  ;;  %v788_v8 = vpop.f32.mrb[29].mxu0 }
 0x237   : > { %v953_v62 = vpop.f32.mrb[30].mxu1  ;;  %1015 = vst [vmem:[%s4317_s16 + $0x1c8] sm:$0xff] %v788_v8  ;;  %1230 = vst [vmem:[#allocation2 + $0xf0] sm:$0xff] %v788_v8 }
 0x238   : > { %1020 = vst [vmem:[%s4317_s16 + $0x1f0] sm:$0xff] %v953_v62  ;;  %v955_v0 = vpop.f32.mrb[31].mxu1  ;;  %2767 = vmatmul.mubr.f32.gmra.mrb[46].mxu0 %v953_v62 }
 0x239   : > { %1021 = vst [vmem:[%s4317_s16 + $0x1f8] sm:$0xff] %v955_v0  ;;  %2823 = vmatmul.mubr.f32.gmra.mrb[46].mxu1 %v955_v0  ;;  %v792_v9 = vpop.f32.mrb[30].mxu0 }
 0x23a   : > { %1018 = vst [vmem:[%s4317_s16 + $0x1e0] sm:$0xff] %v792_v9  ;;  %1053 = vst [vmem:[#allocation2 + $0x78] sm:$0xff] %v792_v9  ;;  %v794_v10 = vpop.f32.mrb[31].mxu0 }
 0x23b   : > { %1019 = vst [vmem:[%s4317_s16 + $0x1e8] sm:$0xff] %v794_v10  ;;  %1231 = vst [vmem:[#allocation2 + $0xf8] sm:$0xff] %v794_v10 }
 0x2d3   : > { %v2747_v11 = vpop.f32.mrb[32].mxu0 }
 0x2d4   : > { %1200 = vst [vmem:[#allocation3 + $0x8] sm:$0xff] %v2747_v11  ;;  %v1120_v12 = vpop.f32.mrb[33].mxu0  ;;  %v2803_v7 = vpop.f32.mrb[32].mxu1 }
 0x2d5   : > { %1199 = vst [vmem:[#allocation3] sm:$0xff] %v1120_v12  ;;  %1379 = vst [vmem:[#allocation3 + $0x88] sm:$0xff] %v2803_v7  ;;  %v1298_v13 = vpop.f32.mrb[33].mxu1 }
 0x2d6   : > { %1378 = vst [vmem:[#allocation3 + $0x80] sm:$0xff] %v1298_v13 }
 0x2db   : > { %v2750_v14 = vpop.f32.mrb[34].mxu0 }
 0x2dc   : > { %1202 = vst [vmem:[#allocation3 + $0x18] sm:$0xff] %v2750_v14  ;;  %v1130_v15 = vpop.f32.mrb[35].mxu0  ;;  %v2806_v16 = vpop.f32.mrb[34].mxu1 }
 0x2dd   : > { %1201 = vst [vmem:[#allocation3 + $0x10] sm:$0xff] %v1130_v15  ;;  %1381 = vst [vmem:[#allocation3 + $0x98] sm:$0xff] %v2806_v16  ;;  %v1308_v17 = vpop.f32.mrb[35].mxu1 }
 0x2de   : > { %1380 = vst [vmem:[#allocation3 + $0x90] sm:$0xff] %v1308_v17 }
 0x2e3   : > { %v2753_v18 = vpop.f32.mrb[36].mxu0 }
 0x2e4   : > { %1204 = vst [vmem:[#allocation3 + $0x28] sm:$0xff] %v2753_v18  ;;  %v1140_v19 = vpop.f32.mrb[37].mxu0  ;;  %v2809_v20 = vpop.f32.mrb[36].mxu1 }
 0x2e5   : > { %1203 = vst [vmem:[#allocation3 + $0x20] sm:$0xff] %v1140_v19  ;;  %1383 = vst [vmem:[#allocation3 + $0xa8] sm:$0xff] %v2809_v20  ;;  %v1318_v21 = vpop.f32.mrb[37].mxu1 }
 0x2e6   : > { %1382 = vst [vmem:[#allocation3 + $0xa0] sm:$0xff] %v1318_v21 }
 0x2eb   : > { %v2756_v22 = vpop.f32.mrb[38].mxu0 }
 0x2ec   : > { %1206 = vst [vmem:[#allocation3 + $0x38] sm:$0xff] %v2756_v22  ;;  %v1150_v23 = vpop.f32.mrb[39].mxu0  ;;  %v2812_v24 = vpop.f32.mrb[38].mxu1 }
 0x2ed   : > { %1205 = vst [vmem:[#allocation3 + $0x30] sm:$0xff] %v1150_v23  ;;  %1385 = vst [vmem:[#allocation3 + $0xb8] sm:$0xff] %v2812_v24  ;;  %v1328_v25 = vpop.f32.mrb[39].mxu1 }
 0x2ee   : > { %1384 = vst [vmem:[#allocation3 + $0xb0] sm:$0xff] %v1328_v25 }
 0x2f3   : > { %v2759_v26 = vpop.f32.mrb[40].mxu0 }
 0x2f4   : > { %1208 = vst [vmem:[#allocation3 + $0x48] sm:$0xff] %v2759_v26  ;;  %v1160_v27 = vpop.f32.mrb[41].mxu0  ;;  %v2815_v28 = vpop.f32.mrb[40].mxu1 }
 0x2f5   : > { %1207 = vst [vmem:[#allocation3 + $0x40] sm:$0xff] %v1160_v27  ;;  %1387 = vst [vmem:[#allocation3 + $0xc8] sm:$0xff] %v2815_v28  ;;  %v1338_v29 = vpop.f32.mrb[41].mxu1 }
 0x2f6   : > { %1386 = vst [vmem:[#allocation3 + $0xc0] sm:$0xff] %v1338_v29 }
 0x2fb   : > { %v2762_v30 = vpop.f32.mrb[42].mxu0 }
 0x2fc   : > { %1210 = vst [vmem:[#allocation3 + $0x58] sm:$0xff] %v2762_v30  ;;  %v1170_v31 = vpop.f32.mrb[43].mxu0  ;;  %v2818_v32 = vpop.f32.mrb[42].mxu1 }
 0x2fd   : > { %1209 = vst [vmem:[#allocation3 + $0x50] sm:$0xff] %v1170_v31  ;;  %1389 = vst [vmem:[#allocation3 + $0xd8] sm:$0xff] %v2818_v32  ;;  %v1348_v33 = vpop.f32.mrb[43].mxu1 }
 0x2fe   : > { %1388 = vst [vmem:[#allocation3 + $0xd0] sm:$0xff] %v1348_v33 }
 0x303   : > { %v2765_v34 = vpop.f32.mrb[44].mxu0 }
 0x304   : > { %1212 = vst [vmem:[#allocation3 + $0x68] sm:$0xff] %v2765_v34  ;;  %v1180_v35 = vpop.f32.mrb[45].mxu0  ;;  %v2821_v36 = vpop.f32.mrb[44].mxu1 }
 0x305   : > { %1211 = vst [vmem:[#allocation3 + $0x60] sm:$0xff] %v1180_v35  ;;  %1391 = vst [vmem:[#allocation3 + $0xe8] sm:$0xff] %v2821_v36  ;;  %v1358_v37 = vpop.f32.mrb[45].mxu1 }
 0x306   : > { %1390 = vst [vmem:[#allocation3 + $0xe0] sm:$0xff] %v1358_v37 }
 0x30b   : > { %v2768_v38 = vpop.f32.mrb[46].mxu0 }
 0x30c   : > { %1214 = vst [vmem:[#allocation3 + $0x78] sm:$0xff] %v2768_v38  ;;  %v1190_v39 = vpop.f32.mrb[47].mxu0  ;;  %v2824_v40 = vpop.f32.mrb[46].mxu1 }
 0x30d   : > { %1213 = vst [vmem:[#allocation3 + $0x70] sm:$0xff] %v1190_v39  ;;  %1393 = vst [vmem:[#allocation3 + $0xf8] sm:$0xff] %v2824_v40  ;;  %v1368_v41 = vpop.f32.mrb[47].mxu1 }
 0x30e   : > { %1392 = vst [vmem:[#allocation3 + $0xf0] sm:$0xff] %v1368_v41 }
 0x30f PF: > { %v1399_v42 = vld [vmem:[#allocation11 + $0x8] sm:$0xff]  ;;  %v1401_v43 = vld [vmem:[#allocation11 + $0x18] sm:$0xff]  ;;  %v1398_v44 = vld [vmem:[#allocation11] sm:$0xff]  ;;  %v3872_v49 = vmov 0.0   ;;  %s4844_s7 = sld [smem:[#allocation48_spill]]  ;;  %s4845_s18 = sld [smem:[#allocation33_spill]] }
 0x310   : > { %v3105_v45 = vpack.c.bf16 %v1401_v43, %v1399_v42  ;;  %v1400_v46 = vld [vmem:[#allocation11 + $0x10] sm:$0xff]  ;;  %v1403_v47 = vld [vmem:[#allocation11 + $0x28] sm:$0xff]  ;;  %v1405_v48 = vld [vmem:[#allocation11 + $0x38] sm:$0xff]  ;;  %1494 = vmatprep.mubr.f32.mxu0 %v3872_v49  ;;  %s4846_s20 = sld [smem:[#allocation36_spill]]  ;;  %s2260_s13 = sshll.u32 %s4317_s16, 4  ;;  %s4577_s13 = int_to_ptr.vmem [resolvable:$true] %s2260_s13 }
 0x311   : > { %v3107_v50 = vpack.c.bf16 %v1400_v46, %v1398_v44  ;;  %v3109_v51 = vpack.c.bf16 %v1405_v48, %v1403_v47  ;;  %v1402_v52 = vld [vmem:[#allocation11 + $0x20] sm:$0xff]  ;;  %v1404_v53 = vld [vmem:[#allocation11 + $0x30] sm:$0xff]  ;;  %v1407_v54 = vld [vmem:[#allocation11 + $0x48] sm:$0xff]  ;;  %s4581_s10 = scalar_lea.sflag [#allocation17], %s464_s0  ;;  %s3874_s27 = smov [#allocation16]  }
 0x312   : > { %3106 = vmatprep.subr.bf16.mxu0 %v3105_v45  ;;  %v1409_v55 = vld [vmem:[#allocation11 + $0x58] sm:$0xff]  ;;  %v3111_v56 = vpack.c.bf16 %v1404_v53, %v1402_v52  ;;  %v1406_v58 = vld [vmem:[#allocation11 + $0x40] sm:$0xff]  ;;  %v1408_v59 = vld [vmem:[#allocation11 + $0x50] sm:$0xff]  ;;  %s3687_s24 = sshll.u32 %s3874_s27, 4  ;;  %s3688_s24 = int_to_ptr.vmem [resolvable:$false] %s3687_s24 }
 0x313   : > { %3108 = vmatpush1.bf16.msra.mxu0 %v3107_v50  ;;  %v3113_v57 = vpack.c.bf16 %v1409_v55, %v1407_v54  ;;  %v1411_v60 = vld [vmem:[#allocation11 + $0x68] sm:$0xff]  ;;  %v1413_v61 = vld [vmem:[#allocation11 + $0x78] sm:$0xff]  ;;  %v3115_v62 = vpack.c.bf16 %v1408_v59, %v1406_v58  ;;  %v1410_v0 = vld [vmem:[#allocation11 + $0x60] sm:$0xff]  ;;  %s3689_s17 = scalar_lea.vmem %s3688_s24, 16384  ;;  %p3690_p3 = scmp.lt.s32.totalorder %s4577_s13, %s3688_s24 }
 0x314   : > { %3110 = vmatprep.subr.bf16.mxu0 %v3109_v51  ;;  %v3117_v63 = vpack.c.bf16 %v1413_v61, %v1411_v60  ;;  %v1412_v1 = vld [vmem:[#allocation11 + $0x70] sm:$0xff]  ;;  %v1415_v2 = vld [vmem:[#allocation11 + $0x88] sm:$0xff]  ;;  %v1417_v3 = vld [vmem:[#allocation11 + $0x98] sm:$0xff] }
 0x315   : > { %v3119_v4 = vpack.c.bf16 %v1412_v1, %v1410_v0  ;;  %v1414_v5 = vld [vmem:[#allocation11 + $0x80] sm:$0xff]  ;;  %v1536_v6 = vld [vmem:[#allocation2] sm:$0xff]  ;;  %v1537_v8 = vld [vmem:[#allocation2 + $0x8] sm:$0xff]  ;;  %v3121_v9 = vpack.c.bf16 %v1417_v3, %v1415_v2  ;;  %s2568_s6 = sshll.u32 %s4845_s18, 13 }
 0x316   : > { %v1416_v10 = vld [vmem:[#allocation11 + $0x90] sm:$0xff]  ;;  %v3137_v11 = vpack.c.bf16 %v1537_v8, %v1536_v6  ;;  %v1538_v12 = vld [vmem:[#allocation2 + $0x10] sm:$0xff]  ;;  %v1539_v7 = vld [vmem:[#allocation2 + $0x18] sm:$0xff]  ;;  %p4848_p5 = scmp.ne.s32.totalorder %s4846_s20, 0 }
 0x317   : > { %3112 = vmatpush1.bf16.msra.mxu0 %v3111_v56  ;;  %v1419_v13 = vld [vmem:[#allocation11 + $0xa8] sm:$0xff]  ;;  %v1421_v14 = vld [vmem:[#allocation11 + $0xb8] sm:$0xff]  ;;  %v3141_v15 = vpack.c.bf16 %v1539_v7, %v1538_v12  ;;  %v3123_v16 = vpack.c.bf16 %v1416_v10, %v1414_v5  ;;  %v1418_v18 = vld [vmem:[#allocation11 + $0xa0] sm:$0xff] }
 0x318   : > { %3114 = vmatprep.subr.bf16.mxu0 %v3113_v57  ;;  %3138 = vmatprep.subr.bf16.mxu1 %v3137_v11  ;;  %v3125_v17 = vpack.c.bf16 %v1421_v14, %v1419_v13  ;;  %v1420_v19 = vld [vmem:[#allocation11 + $0xb0] sm:$0xff]  ;;  %v1423_v20 = vld [vmem:[#allocation11 + $0xc8] sm:$0xff]  ;;  %v1425_v21 = vld [vmem:[#allocation11 + $0xd8] sm:$0xff] }
 0x319   : > { %3140 = vmatpush3.bf16.xpose.msra.mxu1 %v3137_v11  ;;  %v1540_v22 = vld [vmem:[#allocation2 + $0x20] sm:$0xff]  ;;  %v1541_v23 = vld [vmem:[#allocation2 + $0x28] sm:$0xff]  ;;  %v3127_v24 = vpack.c.bf16 %v1420_v19, %v1418_v18  ;;  %v3129_v25 = vpack.c.bf16 %v1425_v21, %v1423_v20  ;;  %v1422_v26 = vld [vmem:[#allocation11 + $0xc0] sm:$0xff] }
 0x31a   : > { %3142 = vmatprep.subr.bf16.mxu1 %v3141_v15  ;;  %v1424_v27 = vld [vmem:[#allocation11 + $0xd0] sm:$0xff]  ;;  %v3145_v28 = vpack.c.bf16 %v1541_v23, %v1540_v22  ;;  %v1427_v29 = vld [vmem:[#allocation11 + $0xe8] sm:$0xff]  ;;  %v1429_v30 = vld [vmem:[#allocation11 + $0xf8] sm:$0xff] }
 0x31b   : > { %3116 = vmatpush1.bf16.msra.mxu0 %v3115_v62  ;;  %v3131_v31 = vpack.c.bf16 %v1424_v27, %v1422_v26  ;;  %v3133_v32 = vpack.c.bf16 %v1429_v30, %v1427_v29  ;;  %v1426_v33 = vld [vmem:[#allocation11 + $0xe0] sm:$0xff]  ;;  %v1428_v34 = vld [vmem:[#allocation11 + $0xf0] sm:$0xff]  ;;  %v1553_v36 = vld [vmem:[#allocation2 + $0x88] sm:$0xff] }
 0x31c   : > { %3118 = vmatprep.subr.bf16.mxu0 %v3117_v63  ;;  %v1552_v35 = vld [vmem:[#allocation2 + $0x80] sm:$0xff]  ;;  %v1542_v37 = vld [vmem:[#allocation2 + $0x30] sm:$0xff]  ;;  %v1543_v38 = vld [vmem:[#allocation2 + $0x38] sm:$0xff]  ;;  %v3135_v39 = vpack.c.bf16 %v1428_v34, %v1426_v33 }
 0x31d   : > { %v3169_v40 = vpack.c.bf16 %v1553_v36, %v1552_v35  ;;  %v3149_v41 = vpack.c.bf16 %v1543_v38, %v1542_v37  ;;  %v1394_v42 = vld [vmem:[%s4288_s9] sm:$0xff]  ;;  %v1545_v44 = vld [vmem:[#allocation2 + $0x48] sm:$0xff]  ;;  %v1554_v45 = vld [vmem:[#allocation2 + $0x90] sm:$0xff] }
 0x31e   : > { %v1544_v43 = vld [vmem:[#allocation2 + $0x40] sm:$0xff]  ;;  %v1555_v46 = vld [vmem:[#allocation2 + $0x98] sm:$0xff]  ;;  %v1395_v47 = vld [vmem:[%s4288_s9 + $0x8] sm:$0xff] }
 0x31f   : > { %3120 = vmatpush1.bf16.msra.mxu0 %v3119_v4  ;;  %v3153_v48 = vpack.c.bf16 %v1545_v44, %v1544_v43  ;;  %v3173_v50 = vpack.c.bf16 %v1555_v46, %v1554_v45  ;;  %v1396_v51 = vld [vmem:[%s4288_s9 + $0x10] sm:$0xff]  ;;  %v1547_v53 = vld [vmem:[#allocation2 + $0x58] sm:$0xff]  ;;  %v1556_v54 = vld [vmem:[#allocation2 + $0xa0] sm:$0xff] }
 0x320   : > { %3122 = vmatprep.subr.bf16.mxu0 %v3121_v9  ;;  %v1546_v52 = vld [vmem:[#allocation2 + $0x50] sm:$0xff]  ;;  %v1557_v55 = vld [vmem:[#allocation2 + $0xa8] sm:$0xff]  ;;  %v1397_v56 = vld [vmem:[%s4288_s9 + $0x18] sm:$0xff]  ;;  %s4847_s9 = sld [smem:[#allocation52_spill]] }
 0x321   : > { %3144 = vmatpush3.bf16.xpose.msra.mxu1 %v3141_v15  ;;  %v3157_v57 = vpack.c.bf16 %v1547_v53, %v1546_v52  ;;  %v3177_v58 = vpack.c.bf16 %v1557_v55, %v1556_v54  ;;  %v1548_v59 = vld [vmem:[#allocation2 + $0x60] sm:$0xff]  ;;  %v1549_v60 = vld [vmem:[#allocation2 + $0x68] sm:$0xff]  ;;  %v1558_v61 = vld [vmem:[#allocation2 + $0xb0] sm:$0xff] }
 0x322   : > { %3146 = vmatprep.subr.bf16.mxu1 %v3145_v28  ;;  %v1559_v62 = vld [vmem:[#allocation2 + $0xb8] sm:$0xff]  ;;  %v3161_v63 = vpack.c.bf16 %v1549_v60, %v1548_v59  ;;  %v1550_v1 = vld [vmem:[#allocation2 + $0x70] sm:$0xff]  ;;  %v1560_v2 = vld [vmem:[#allocation2 + $0xc0] sm:$0xff] }
 0x323   : > { %3124 = vmatpush1.bf16.msra.mxu0 %v3123_v16  ;;  %v3181_v0 = vpack.c.bf16 %v1559_v62, %v1558_v61  ;;  %v1561_v3 = vld [vmem:[#allocation2 + $0xc8] sm:$0xff]  ;;  %v1562_v6 = vld [vmem:[#allocation2 + $0xd0] sm:$0xff]  ;;  %v1563_v8 = vld [vmem:[#allocation2 + $0xd8] sm:$0xff] }
 0x324   : > { %3126 = vmatprep.subr.bf16.mxu0 %v3125_v17  ;;  %v3185_v5 = vpack.c.bf16 %v1561_v3, %v1560_v2  ;;  %v3189_v9 = vpack.c.bf16 %v1563_v8, %v1562_v6  ;;  %v1564_v10 = vld [vmem:[#allocation2 + $0xe0] sm:$0xff]  ;;  %v1565_v11 = vld [vmem:[#allocation2 + $0xe8] sm:$0xff]  ;;  %v1566_v7 = vld [vmem:[#allocation2 + $0xf0] sm:$0xff] }
 0x325   : > { %v3193_v12 = vpack.c.bf16 %v1565_v11, %v1564_v10  ;;  %v1567_v13 = vld [vmem:[#allocation2 + $0xf8] sm:$0xff]  ;;  %v1857_v23 = vld [vmem:[#allocation3] sm:$0xff]  ;;  %v1862_v30 = vld [vmem:[#allocation3 + $0x28] sm:$0xff] }
 0x326   : > { %v3197_v14 = vpack.c.bf16 %v1567_v13, %v1566_v7  ;;  %v1860_v27 = vld [vmem:[#allocation3 + $0x18] sm:$0xff]  ;;  %v1863_v35 = vld [vmem:[#allocation3 + $0x30] sm:$0xff]  ;;  %v1738_v38 = vld [vmem:[%s4299_s8] sm:$0xff]  ;;  %s4575_s11 = scalar_lea.hbm %s4847_s9, %s2568_s6  ;;  %s3683_s8 = scalar_lea.vmem %s4577_s13, 8192 }
 0x327   : > { %3128 = vmatpush1.bf16.msra.mxu0 %v3127_v24  ;;  %v1858_v24 = vld [vmem:[#allocation3 + $0x8] sm:$0xff]  ;;  %v1864_v36 = vld [vmem:[#allocation3 + $0x38] sm:$0xff]  ;;  %vm1739_vm0 = vnez %v1738_v38  ;;  %v1875_v13 = vld [vmem:[#allocation3 + $0x90] sm:$0xff]  ;;  %p3684_p7 = scmp.ne.s32.totalorder %s4577_s13, %s3683_s8  ;;  %p3691_p11 = scmp.lt.s32.totalorder %s3689_s17, %s3683_s8 }
 0x328   : > { %3130 = vmatprep.subr.bf16.mxu0 %v3129_v25  ;;  %v1859_v25 = vld [vmem:[#allocation3 + $0x10] sm:$0xff]  ;;  %v3201_v26 = vpack.c.bf16 %v1858_v24, %v1857_v23  ;;  %v3213_v37 = vpack.c.bf16 %v1864_v36, %v1863_v35  ;;  %v1868_v23 = vld [vmem:[#allocation3 + $0x58] sm:$0xff] }
 0x329   : > { %3148 = vmatpush3.bf16.xpose.msra.mxu1 %v3145_v28  ;;  %v1861_v28 = vld [vmem:[#allocation3 + $0x20] sm:$0xff]  ;;  %v3205_v29 = vpack.c.bf16 %v1860_v27, %v1859_v25  ;;  %v1879_v25 = vld [vmem:[#allocation3 + $0xb0] sm:$0xff]  ;;  %v1872_v36 = vld [vmem:[#allocation3 + $0x78] sm:$0xff]  ;;  %p3685_p4 = pnand %p3684_p7, %p4848_p5  ;;  %p3692_p6 = por %p3691_p11, %p3690_p3 }
 0x32a   : > { %3150 = vmatprep.subr.bf16.mxu1 %v3149_v41  ;;  %v3209_v34 = vpack.c.bf16 %v1862_v30, %v1861_v28  ;;  %v1869_v28 = vld [vmem:[#allocation3 + $0x60] sm:$0xff]  ;;  %v1871_v35 = vld [vmem:[#allocation3 + $0x70] sm:$0xff] }
 0x32b   : > { %3132 = vmatpush1.bf16.msra.mxu0 %v3131_v31  ;;  %v1873_v31 = vld [vmem:[#allocation3 + $0x80] sm:$0xff]  ;;  %v1883_v38 = vld [vmem:[#allocation3 + $0xd0] sm:$0xff]  ;;  %p3686_p9 = pneg %p3685_p4 }
 0x32c   : > { %3134 = vmatprep.subr.bf16.mxu0 %v3133_v32  ;;  %v1874_v32 = vld [vmem:[#allocation3 + $0x88] sm:$0xff] }
 0x32d   : > { %v4438_v33 = vpack.c.bf16 %v1874_v32, %v1873_v31  ;;  %v1881_v31 = vld [vmem:[#allocation3 + $0xc0] sm:$0xff]  ;;  %v1882_v32 = vld [vmem:[#allocation3 + $0xc8] sm:$0xff]  ;;  %p3693_p2 = pnand %p3692_p6, %p3686_p9 }
 0x32f   : > { %3136 = vmatpush1.bf16.msra.mxu0 %v3135_v39  ;;  %v3873_v39 = vmov 0  }
 0x330   : > { %3170 = vmatprep.subr.bf16.mxu0 %v3169_v40 }
 0x331   : > { %3152 = vmatpush3.bf16.xpose.msra.mxu1 %v3149_v41 }
 0x332   : > { %1495 = vmatmul.mubr.f32.vlgmr.msra.gmra.mrb[0].mxu0 %v1394_v42  ;;  %3154 = vmatprep.subr.bf16.mxu1 %v3153_v48 }
 0x333   : > { %1500 = vmatprep.mubr.f32.mxu0 %v3872_v49 }
 0x336   : > { %1501 = vmatmul.mubr.f32.gmra.mrb[2].mxu0 %v1395_v47 }
 0x337   : > { %1506 = vmatprep.mubr.f32.mxu0 %v3872_v49 }
 0x338   : > { %3172 = vmatpush3.bf16.xpose.msra.mxu0 %v3169_v40  ;;  %v1740_v40 = vsel %vm1739_vm0, 16843009, %v3873_v39 }
 0x339   : > { %3174 = vmatprep.subr.bf16.mxu0 %v3173_v50  ;;  %3156 = vmatpush3.bf16.xpose.msra.mxu1 %v3153_v48  ;;  %v1742_v41 = vunpack.c.1.s8 %v1740_v40  ;;  %v1741_v42 = vunpack.c.0.s8 %v1740_v40  ;;  %v1744_v46 = vunpack.c.3.s8 %v1740_v40  ;;  %v1743_v48 = vunpack.c.2.s8 %v1740_v40 }
 0x33a   : > { %1507 = vmatmul.mubr.f32.gmra.mrb[4].mxu0 %v1396_v51  ;;  %3158 = vmatprep.subr.bf16.mxu1 %v3157_v57 }
 0x33b   : > { %1512 = vmatprep.mubr.f32.mxu0 %v3872_v49  ;;  %v1551_v49 = vld [vmem:[#allocation2 + $0x78] sm:$0xff]  ;;  %v1747_v43 = vpack.c.b16 %v1742_v41, %v1742_v41  ;;  %v1745_v44 = vpack.c.b16 %v1741_v42, %v1741_v42  ;;  %v1749_v51 = vpack.c.b16 %v1743_v48, %v1743_v48  ;;  %v1885_v41 = vld [vmem:[#allocation3 + $0xe0] sm:$0xff]  ;;  %v1886_v42 = vld [vmem:[#allocation3 + $0xe8] sm:$0xff] }
 0x33c   : > { %v3165_v4 = vpack.c.bf16 %v1551_v49, %v1550_v1 }
 0x33d   : > { %v1748_v45 = vpack.c.b8 %v1747_v43, %v1747_v43  ;;  %v1746_v47 = vpack.c.b8 %v1745_v44, %v1745_v44  ;;  %v1750_v55 = vpack.c.b8 %v1749_v51, %v1749_v51  ;;  %v4504_v43 = vpack.c.bf16 %v1886_v42, %v1885_v41  ;;  %v1887_v44 = vld [vmem:[#allocation3 + $0xf0] sm:$0xff] }
 0x33e   : > { %1513 = vmatmul.mubr.f32.gmra.mrb[6].mxu0 %v1397_v56 }
 0x33f   : > { %vm1754_vm1 = vnez %v1748_v45  ;;  %vm1753_vm2 = vnez %v1746_v47  ;;  %vm1755_vm4 = vnez %v1750_v55  ;;  %v1888_v45 = vld [vmem:[#allocation3 + $0xf8] sm:$0xff] }
 0x340   : > { %3176 = vmatpush3.bf16.xpose.msra.mxu0 %v3173_v50  ;;  %v1751_v50 = vpack.c.b16 %v1744_v46, %v1744_v46  ;;  %v1758_v52 = vsel %vm1754_vm1, 16843009, %v3873_v39  ;;  %v1757_v53 = vsel %vm1753_vm2, 16843009, %v3873_v39  ;;  %v1759_v60 = vsel %vm1755_vm4, 16843009, %v3873_v39 }
 0x341   : > { %3178 = vmatprep.subr.bf16.mxu0 %v3177_v58  ;;  %3160 = vmatpush3.bf16.xpose.msra.mxu1 %v3157_v57  ;;  %v1762_v56 = vunpack.c.0.s8 %v1758_v52  ;;  %v1761_v57 = vunpack.c.0.s8 %v1757_v53  ;;  %v4508_v46 = vpack.c.bf16 %v1888_v45, %v1887_v44 }
 0x342   : > { %3162 = vmatprep.subr.bf16.mxu1 %v3161_v63  ;;  %v1752_v54 = vpack.c.b8 %v1751_v50, %v1751_v50 }
 0x343   : > { %vm1766_vm5 = vcmp.ne.s32.totalorder %v1762_v56, 0  ;;  %vm1765_vm6 = vcmp.ne.s32.totalorder %v1761_v57, 0 }
 0x344   : > { %vm1756_vm3 = vnez %v1752_v54 }
 0x348   : > { %3180 = vmatpush3.bf16.xpose.msra.mxu0 %v3177_v58  ;;  %v1760_v58 = vsel %vm1756_vm3, 16843009, %v3873_v39  ;;  %v1884_v39 = vld [vmem:[#allocation3 + $0xd8] sm:$0xff] }
 0x349   : > { %3182 = vmatprep.subr.bf16.mxu0 %v3181_v0  ;;  %3164 = vmatpush3.bf16.xpose.msra.mxu1 %v3161_v63  ;;  %v1764_v2 = vunpack.c.0.s8 %v1760_v58  ;;  %v4499_v40 = vpack.c.bf16 %v1884_v39, %v1883_v38 }
 0x34a   : > { %3166 = vmatprep.subr.bf16.mxu1 %v3165_v4 }
 0x34b   : > { %vm1768_vm7 = vcmp.ne.s32.totalorder %v1764_v2, 0 }
 0x350   : > { %3184 = vmatpush3.bf16.xpose.msra.mxu0 %v3181_v0 }
 0x351   : > { %3186 = vmatprep.subr.bf16.mxu0 %v3185_v5  ;;  %3168 = vmatpush3.bf16.xpose.msra.mxu1 %v3165_v4  ;;  %v1763_v4 = vunpack.c.0.s8 %v1759_v60 }
 0x352   : > { %3202 = vmatprep.subr.bf16.mxu1 %v3201_v26 }
 0x353   : > { %vm1767_vm8 = vcmp.ne.s32.totalorder %v1763_v4, 0 }
 0x358   : > { %3188 = vmatpush3.bf16.xpose.msra.mxu0 %v3185_v5 }
 0x359   : > { %3190 = vmatprep.subr.bf16.mxu0 %v3189_v9 }
 0x360   : > { %3192 = vmatpush3.bf16.xpose.msra.mxu0 %v3189_v9 }
 0x361   : > { %3194 = vmatprep.subr.bf16.mxu0 %v3193_v12 }
 0x368   : > { %3196 = vmatpush3.bf16.xpose.msra.mxu0 %v3193_v12 }
 0x369   : > { %3198 = vmatprep.subr.bf16.mxu0 %v3197_v14 }
 0x370   : > { %3200 = vmatpush3.bf16.xpose.msra.mxu0 %v3197_v14  ;;  %v1876_v14 = vld [vmem:[#allocation3 + $0x98] sm:$0xff] }
 0x371   : > { %3234 = vmatprep.subr.bf16.mxu0 %v4438_v33 }
 0x405   : > { %v1496_v15 = vpop.f32.mrb[0].mxu0 }
 0x406   : > { %v1498_v16 = vpop.f32.mrb[1].mxu0  ;;  %2857 = vmatprep.mubr.f32.mxu1 %v1496_v15  ;;  %v4480_v15 = vpack.c.bf16 %v1876_v14, %v1875_v13 }
 0x407   : > { %2895 = vmatprep.mubr.f32.mxu0 %v1498_v16  ;;  %v1865_v16 = vld [vmem:[#allocation3 + $0x40] sm:$0xff] }
 0x409   : > { %v1502_v17 = vpop.f32.mrb[2].mxu0 }
 0x40a   : > { %v1504_v18 = vpop.f32.mrb[3].mxu0  ;;  %2858 = vmatmul.mubr.f32.vlgmr.msra.gmra.mrb[0].mxu1 %v1502_v17  ;;  %v1866_v17 = vld [vmem:[#allocation3 + $0x48] sm:$0xff] }
 0x40b   : > { %2896 = vmatmul.mubr.f32.vlgmr.msra.gmra.mrb[8].mxu0 %v1504_v18  ;;  %3204 = vmatpush3.bf16.msra.mxu1 %v3201_v26  ;;  %v3217_v18 = vpack.c.bf16 %v1866_v17, %v1865_v16  ;;  %v1880_v26 = vld [vmem:[#allocation3 + $0xb8] sm:$0xff] }
 0x40c   : > { %3206 = vmatprep.subr.bf16.mxu1 %v3205_v29  ;;  %3236 = vmatpush3.bf16.msra.mxu0 %v4438_v33  ;;  %v4491_v27 = vpack.c.bf16 %v1880_v26, %v1879_v25 }
 0x40d   : > { %v1508_v19 = vpop.f32.mrb[4].mxu0  ;;  %3238 = vmatprep.subr.bf16.mxu0 %v4480_v15 }
 0x40e   : > { %v1510_v20 = vpop.f32.mrb[5].mxu0  ;;  %2860 = vmatprep.mubr.f32.mxu1 %v1508_v19  ;;  %v1877_v19 = vld [vmem:[#allocation3 + $0xa0] sm:$0xff] }
 0x40f   : > { %2898 = vmatprep.mubr.f32.mxu0 %v1510_v20  ;;  %3208 = vmatpush3.bf16.msra.mxu1 %v3205_v29  ;;  %v1878_v20 = vld [vmem:[#allocation3 + $0xa8] sm:$0xff] }
 0x410   : > { %3210 = vmatprep.subr.bf16.mxu1 %v3209_v34  ;;  %3240 = vmatpush3.bf16.msra.mxu0 %v4480_v15  ;;  %v1870_v29 = vld [vmem:[#allocation3 + $0x68] sm:$0xff] }
 0x411   : > { %v1514_v21 = vpop.f32.mrb[6].mxu0  ;;  %v3225_v30 = vpack.c.bf16 %v1870_v29, %v1869_v28 }
 0x412   : > { %2861 = vmatmul.mubr.f32.gmra.mrb[2].mxu1 %v1514_v21  ;;  %v1516_v22 = vpop.f32.mrb[7].mxu0  ;;  %v4486_v21 = vpack.c.bf16 %v1878_v20, %v1877_v19 }
 0x413   : > { %2899 = vmatmul.mubr.f32.gmra.mrb[10].mxu0 %v1516_v22  ;;  %3212 = vmatpush3.bf16.msra.mxu1 %v3209_v34  ;;  %v1867_v22 = vld [vmem:[#allocation3 + $0x50] sm:$0xff]  ;;  %v4495_v34 = vpack.c.bf16 %v1882_v32, %v1881_v31 }
 0x414   : > { %3214 = vmatprep.subr.bf16.mxu1 %v3213_v37  ;;  %3242 = vmatprep.subr.bf16.mxu0 %v4486_v21  ;;  %v3221_v24 = vpack.c.bf16 %v1868_v23, %v1867_v22  ;;  %v2549_v22 = vld [vmem:[%s4844_s7] ss:$0 sm:$0xff] }
 0x415   : > { %3244 = vmatpush3.bf16.msra.mxu0 %v4486_v21 }
 0x416   : > { %3246 = vmatprep.subr.bf16.mxu0 %v4491_v27 }
 0x417   : > { %3216 = vmatpush3.bf16.msra.mxu1 %v3213_v37  ;;  %v3229_v37 = vpack.c.bf16 %v1872_v36, %v1871_v35 }
 0x418   : > { %3218 = vmatprep.subr.bf16.mxu1 %v3217_v18 }
 0x419   : > { %3248 = vmatpush3.bf16.msra.mxu0 %v4491_v27 }
 0x41a   : > { %3250 = vmatprep.subr.bf16.mxu0 %v4495_v34 }
 0x41b   : > { %3220 = vmatpush3.bf16.msra.mxu1 %v3217_v18 }
 0x41c   : > { %3222 = vmatprep.subr.bf16.mxu1 %v3221_v24 }
 0x41d   : > { %3252 = vmatpush3.bf16.msra.mxu0 %v4495_v34 }
 0x41e   : > { %3254 = vmatprep.subr.bf16.mxu0 %v4499_v40 }
 0x41f   : > { %3224 = vmatpush3.bf16.msra.mxu1 %v3221_v24 }
 0x420   : > { %3226 = vmatprep.subr.bf16.mxu1 %v3225_v30 }
 0x421   : > { %3256 = vmatpush3.bf16.msra.mxu0 %v4499_v40 }
 0x422   : > { %3258 = vmatprep.subr.bf16.mxu0 %v4504_v43 }
 0x423   : > { %3228 = vmatpush3.bf16.msra.mxu1 %v3225_v30 }
 0x424   : > { %3230 = vmatprep.subr.bf16.mxu1 %v3229_v37 }
 0x425   : > { %3260 = vmatpush3.bf16.msra.mxu0 %v4504_v43 }
 0x426   : > { %3262 = vmatprep.subr.bf16.mxu0 %v4508_v46 }
 0x427   : > { %3232 = vmatpush3.bf16.msra.mxu1 %v3229_v37 }
 0x428   : > { %3265 = vmatprep.subr.bf16.mxu1 %v4438_v33 }
 0x429   : > { %3264 = vmatpush3.bf16.msra.mxu0 %v4508_v46 }
 0x4dd   : > { %v2859_v59 = vpop.f32.mrb[0].mxu1 }
 0x4de   : > { %v4443_v61 = vsel %vm1766_vm5, -60000.0, %v2859_v59  ;;  %v1634_v62 = vpop.f32.mrb[1].mxu1  ;;  %v2897_v63 = vpop.f32.mrb[8].mxu0 }
 0x4df   : > { %1786 = vst [vmem:[%s4319_s14 + $0x8] sm:$0xff] %v4443_v61  ;;  %v4447_v0 = vsel %vm1765_vm6, -60000.0, %v1634_v62  ;;  %v4449_v1 = vsel %vm1766_vm5, -60000.0, %v2897_v63  ;;  %v1719_v49 = vpop.f32.mrb[9].mxu0 }
 0x4e0   : > { %1785 = vst [vmem:[%s4319_s14] sm:$0xff] %v4447_v0  ;;  %1790 = vst [vmem:[%s4319_s14 + $0x28] sm:$0xff] %v4449_v1  ;;  %v4455_v3 = vsel %vm1765_vm6, -60000.0, %v1719_v49  ;;  %1793 = vmax.xlane.f32.xlu0 %v4447_v0 }
 0x4e1   : > { %1789 = vst [vmem:[%s4319_s14 + $0x20] sm:$0xff] %v4455_v3 }
 0x4e4   : > { %1795 = vmax.xlane.f32.xlu0 %v4443_v61 }
 0x4e5   : > { %v2862_v5 = vpop.f32.mrb[2].mxu1 }
 0x4e6   : > { %v4461_v6 = vsel %vm1768_vm7, -60000.0, %v2862_v5  ;;  %v1644_v8 = vpop.f32.mrb[3].mxu1  ;;  %v2900_v9 = vpop.f32.mrb[10].mxu0 }
 0x4e7   : > { %1788 = vst [vmem:[%s4319_s14 + $0x18] sm:$0xff] %v4461_v6  ;;  %1799 = vmax.xlane.f32.xlu1 %v4461_v6  ;;  %v4466_v10 = vsel %vm1767_vm8, -60000.0, %v1644_v8  ;;  %v4468_v11 = vsel %vm1768_vm7, -60000.0, %v2900_v9  ;;  %v1729_v12 = vpop.f32.mrb[11].mxu0 }
 0x4e8   : > { %1801 = vmax.xlane.f32.xlu0 %v4455_v3  ;;  %1787 = vst [vmem:[%s4319_s14 + $0x10] sm:$0xff] %v4466_v10  ;;  %1792 = vst [vmem:[%s4319_s14 + $0x38] sm:$0xff] %v4468_v11  ;;  %v4475_v7 = vsel %vm1767_vm8, -60000.0, %v1729_v12 }
 0x4e9   : > { %1791 = vst [vmem:[%s4319_s14 + $0x30] sm:$0xff] %v4475_v7 }
 0x4eb   : > { %1797 = vmax.xlane.f32.xlu1 %v4466_v10 }
 0x4ec   : > { %1803 = vmax.xlane.f32.xlu0 %v4449_v1 }
 0x4ef   : > { %1805 = vmax.xlane.f32.xlu1 %v4475_v7 }
 0x4f3   : > { %1807 = vmax.xlane.f32.xlu1 %v4468_v11 }
 0x56d   : > { %v1794_v47 = vpop.xlane.xlu0 %1793 }
 0x56e   : > { %v1809_v48 = vsub.f32 %v4447_v0, %v1794_v47 }
 0x570   : > { %v1817_v50 = vmul.f32 1.442695, %v1809_v48 }
 0x571   : > { %v1796_v51 = vpop.xlane.xlu0 %1795 }
 0x572   : > { %3461 = vpow2.f32 %v1817_v50  ;;  %v1810_v52 = vsub.f32 %v4443_v61, %v1796_v51 }
 0x574   : > { %v1819_v53 = vmul.f32 1.442695, %v1810_v52  ;;  %v1800_v54 = vpop.xlane.xlu1 %1799 }
 0x575   : > { %v1812_v55 = vsub.f32 %v4461_v6, %v1800_v54  ;;  %v1802_v56 = vpop.xlane.xlu0 %1801 }
 0x576   : > { %3463 = vpow2.f32 %v1819_v53  ;;  %v1813_v57 = vsub.f32 %v4455_v3, %v1802_v56 }
 0x577   : > { %v1823_v58 = vmul.f32 1.442695, %v1812_v55 }
 0x578   : > { %v1825_v59 = vmul.f32 1.442695, %v1813_v57  ;;  %v1798_v60 = vpop.xlane.xlu1 %1797 }
 0x579   : > { %v1811_v62 = vsub.f32 %v4466_v10, %v1798_v60  ;;  %v1804_v63 = vpop.xlane.xlu0 %1803 }
 0x57a   : > { %3465 = vpow2.f32 %v1825_v59  ;;  %v1814_v0 = vsub.f32 %v4449_v1, %v1804_v63 }
 0x57b   : > { %v1821_v49 = vmul.f32 1.442695, %v1811_v62  ;;  %3467 = vpow2.f32 %v1823_v58 }
 0x57c   : > { %v3462_v2 = vpop.eup %3461  ;;  %v1827_v61 = vmul.f32 1.442695, %v1814_v0  ;;  %v1806_v4 = vpop.xlane.xlu1 %1805 }
 0x57d   : > { %3469 = vpow2.f32 %v1821_v49  ;;  %v1815_v5 = vsub.f32 %v4475_v7, %v1806_v4  ;;  %2933 = vmatprep.mubr.f32.mxu1 %v3462_v2  ;;  %1833 = vadd.xlane.f32.xlu0 %v3462_v2 }
 0x57e   : > { %3471 = vpow2.f32 %v1827_v61 }
 0x57f   : > { %v1829_v3 = vmul.f32 1.442695, %v1815_v5 }
 0x580   : > { %v3464_v6 = vpop.eup %3463  ;;  %v1808_v8 = vpop.xlane.xlu1 %1807 }
 0x581   : > { %3473 = vpow2.f32 %v1829_v3  ;;  %v1816_v9 = vsub.f32 %v4468_v11, %v1808_v8  ;;  %2934 = vmatmul.mubr.f32.vlgmr.msra.gmra.mrb[4].mxu1 %v3464_v6  ;;  %1835 = vadd.xlane.f32.xlu1 %v3464_v6 }
 0x582   : > { %3273 = vmatpush3.bf16.msra.mxu1 %v4438_v33 }
 0x583   : > { %v1831_v1 = vmul.f32 1.442695, %v1816_v9  ;;  %3266 = vmatprep.subr.bf16.mxu1 %v4480_v15 }
 0x584   : > { %v3466_v10 = vpop.eup %3465 }
 0x585   : > { %1841 = vadd.xlane.f32.xlu0 %v3466_v10  ;;  %2971 = vmatprep.mubr.f32.mxu0 %v3466_v10  ;;  %v3468_v12 = vpop.eup %3467  ;;  %3475 = vpow2.f32 %v1831_v1 }
 0x586   : > { %3274 = vmatpush3.bf16.msra.mxu1 %v4480_v15 }
 0x587   : > { %v3470_v7 = vpop.eup %3469  ;;  %3267 = vmatprep.subr.bf16.mxu1 %v4486_v21 }
 0x588   : > { %v3472_v13 = vpop.eup %3471  ;;  %2936 = vmatprep.mubr.f32.mxu1 %v3470_v7 }
 0x589   : > { %2937 = vmatmul.mubr.f32.gmra.mrb[6].mxu1 %v3468_v12  ;;  %1837 = vadd.xlane.f32.xlu0 %v3470_v7 }
 0x58a   : > { %3275 = vmatpush3.bf16.msra.mxu1 %v4486_v21  ;;  %2972 = vmatmul.mubr.f32.vlgmr.msra.gmra.mrb[12].mxu0 %v3472_v13 }
 0x58b   : > { %v3474_v33 = vpop.eup %3473  ;;  %1843 = vadd.xlane.f32.xlu1 %v3472_v13  ;;  %3268 = vmatprep.subr.bf16.mxu1 %v4491_v27 }
 0x58c   : > { %2974 = vmatprep.mubr.f32.mxu1 %v3474_v33 }
 0x58d   : > { %1845 = vadd.xlane.f32.xlu0 %v3474_v33 }
 0x58e   : > { %3276 = vmatpush3.bf16.msra.mxu1 %v4491_v27 }
 0x58f   : > { %1839 = vadd.xlane.f32.xlu1 %v3468_v12  ;;  %3269 = vmatprep.subr.bf16.mxu1 %v4495_v34  ;;  %v3476_v11 = vpop.eup %3475 }
 0x592   : > { %3277 = vmatpush3.bf16.msra.mxu1 %v4495_v34 }
 0x593   : > { %1847 = vadd.xlane.f32.xlu1 %v3476_v11  ;;  %3270 = vmatprep.subr.bf16.mxu1 %v4499_v40 }
 0x596   : > { %3278 = vmatpush3.bf16.msra.mxu1 %v4499_v40 }
 0x597   : > { %3271 = vmatprep.subr.bf16.mxu1 %v4504_v43 }
 0x59a   : > { %3279 = vmatpush3.bf16.msra.mxu1 %v4504_v43 }
 0x59b   : > { %3272 = vmatprep.subr.bf16.mxu1 %v4508_v46 }
 0x59e   : > { %3280 = vmatpush3.bf16.msra.mxu1 %v4508_v46 }
 0x5a1   : > { %2975 = vmatmul.mubr.f32.vlgmr.msra.gmra.mrb[8].mxu1 %v3476_v11 }
 0x60a   : > { %v1834_v15 = vpop.xlane.xlu0 %1833 }
 0x60e   : > { %v1836_v14 = vpop.xlane.xlu1 %1835 }
 0x60f   : > { %3477 = vrcp.f32 %v1836_v14 }
 0x610   : > { %3479 = vrcp.f32 %v1834_v15 }
 0x612   : > { %v1842_v17 = vpop.xlane.xlu0 %1841 }
 0x613   : > { %3481 = vrcp.f32 %v1842_v17 }
 0x616   : > { %v1838_v19 = vpop.xlane.xlu0 %1837 }
 0x618   : > { %v1844_v16 = vpop.xlane.xlu1 %1843 }
 0x619   : > { %3483 = vrcp.f32 %v1844_v16  ;;  %v3478_v20 = vpop.eup %3477 }
 0x61a   : > { %v3480_v23 = vpop.eup %3479  ;;  %v1846_v54 = vpop.xlane.xlu0 %1845 }
 0x61c   : > { %v1840_v18 = vpop.xlane.xlu1 %1839 }
 0x61d   : > { %3485 = vrcp.f32 %v1840_v18  ;;  %v3482_v31 = vpop.eup %3481 }
 0x61e   : > { %3487 = vrcp.f32 %v1838_v19 }
 0x620   : > { %v1848_v52 = vpop.xlane.xlu1 %1847 }
 0x621   : > { %3489 = vrcp.f32 %v1848_v52 }
 0x622   : > { %3491 = vrcp.f32 %v1846_v54 }
 0x623   : > { %v3484_v32 = vpop.eup %3483 }
 0x627   : > { %v3486_v35 = vpop.eup %3485 }
 0x628   : > { %v3488_v38 = vpop.eup %3487 }
 0x62b   : > { %v3490_v55 = vpop.eup %3489 }
 0x62c   : > { %v3492_v57 = vpop.eup %3491 }
 0x654   : > { %v2935_v21 = vpop.f32.mrb[4].mxu1 }
 0x655   : > { %v2060_v24 = vmul.f32 %v3478_v20, %v2935_v21  ;;  %v1955_v25 = vpop.f32.mrb[5].mxu1 }
 0x656   : > { %v2059_v26 = vmul.f32 %v3480_v23, %v1955_v25 }
 0x657   : > { %v2075_v27 = vadd.f32 %v2549_v22, %v2060_v24 }
 0x658   : > { %v2074_v28 = vadd.f32 %v2549_v22, %v2059_v26 }
 0x659   : > { %v2083_v29 = vmax.f32 %v2075_v27, 0.0 }
 0x65a   : > { %v2082_v30 = vmax.f32 %v2074_v28, 0.0 }
 0x65b   : > { %2092 = vadd.xlane.f32.xlu1 %v2083_v29 }
 0x65c   : > { %v2938_v34 = vpop.f32.mrb[6].mxu1  ;;  %2090 = vadd.xlane.f32.xlu0 %v2082_v30 }
 0x65d   : > { %v2973_v36 = vpop.f32.mrb[12].mxu0  ;;  %v1965_v37 = vpop.f32.mrb[7].mxu1  ;;  %v2062_v39 = vmul.f32 %v3486_v35, %v2938_v34 }
 0x65e   : > { %v2064_v40 = vmul.f32 %v3484_v32, %v2973_v36  ;;  %v2040_v41 = vpop.f32.mrb[13].mxu0  ;;  %v2061_v42 = vmul.f32 %v3488_v38, %v1965_v37 }
 0x65f   : > { %v2063_v43 = vmul.f32 %v3482_v31, %v2040_v41  ;;  %v2077_v47 = vadd.f32 %v2549_v22, %v2062_v39 }
 0x660   : > { %v2079_v44 = vadd.f32 %v2549_v22, %v2064_v40  ;;  %v2076_v50 = vadd.f32 %v2549_v22, %v2061_v42 }
 0x661   : > { %v2078_v45 = vadd.f32 %v2549_v22, %v2063_v43  ;;  %v2085_v51 = vmax.f32 %v2077_v47, 0.0 }
 0x662   : > { %v2087_v46 = vmax.f32 %v2079_v44, 0.0  ;;  %v2084_v53 = vmax.f32 %v2076_v50, 0.0 }
 0x663   : > { %v2086_v48 = vmax.f32 %v2078_v45, 0.0 }
 0x664   : > { %2100 = vadd.xlane.f32.xlu1 %v2087_v46 }
 0x665   : > { %2098 = vadd.xlane.f32.xlu0 %v2086_v48 }
 0x668   : > { %2096 = vadd.xlane.f32.xlu1 %v2085_v51 }
 0x669   : > { %2094 = vadd.xlane.f32.xlu0 %v2084_v53 }
 0x674   : > { %v2976_v56 = vpop.f32.mrb[8].mxu1 }
 0x675   : > { %v2066_v58 = vmul.f32 %v3490_v55, %v2976_v56  ;;  %v2050_v59 = vpop.f32.mrb[9].mxu1 }
 0x676   : > { %v2065_v60 = vmul.f32 %v3492_v57, %v2050_v59 }
 0x677   : > { %v2081_v62 = vadd.f32 %v2549_v22, %v2066_v58 }
 0x678   : > { %v2080_v63 = vadd.f32 %v2549_v22, %v2065_v60 }
 0x679   : > { %v2089_v0 = vmax.f32 %v2081_v62, 0.0 }
 0x67a   : > { %v2088_v49 = vmax.f32 %v2080_v63, 0.0 }
 0x67b   : > { %2104 = vadd.xlane.f32.xlu1 %v2089_v0 }
 0x67c   : > { %2102 = vadd.xlane.f32.xlu0 %v2088_v49 }
 0x6e8   : > { %v2093_v2 = vpop.xlane.xlu1 %2092 }
 0x6e9   : > { %v2108_v61 = vmul.f32 0.0078125, %v2093_v2  ;;  %v2091_v4 = vpop.xlane.xlu0 %2090 }
 0x6ea   : > { %v2107_v5 = vmul.f32 0.0078125, %v2091_v4 }
 0x6eb   : > { %v4538_v3 = vsub.f32 %v2083_v29, %v2108_v61 }
 0x6ec   : > { %v4540_v6 = vsub.f32 %v2082_v30, %v2107_v5 }
 0x6ed   : > { %v2124_v8 = vmul.f32 %v4538_v3, %v4538_v3 }
 0x6ee   : > { %v2123_v9 = vmul.f32 %v4540_v6, %v4540_v6 }
 0x6ef   : > { %2133 = vadd.xlane.f32.xlu1 %v2124_v8 }
 0x6f0   : > { %2131 = vadd.xlane.f32.xlu0 %v2123_v9 }
 0x6f1   : > { %v2101_v1 = vpop.xlane.xlu1 %2100 }
 0x6f2   : > { %v2112_v10 = vmul.f32 0.0078125, %v2101_v1  ;;  %v2099_v12 = vpop.xlane.xlu0 %2098 }
 0x6f3   : > { %v2111_v7 = vmul.f32 0.0078125, %v2099_v12 }
 0x6f4   : > { %v4546_v13 = vsub.f32 %v2087_v46, %v2112_v10 }
 0x6f5   : > { %v4548_v33 = vsub.f32 %v2086_v48, %v2111_v7  ;;  %v2097_v11 = vpop.xlane.xlu1 %2096 }
 0x6f6   : > { %v2110_v14 = vmul.f32 0.0078125, %v2097_v11  ;;  %v2095_v15 = vpop.xlane.xlu0 %2094  ;;  %v2128_v16 = vmul.f32 %v4546_v13, %v4546_v13 }
 0x6f7   : > { %v2109_v17 = vmul.f32 0.0078125, %v2095_v15  ;;  %v2127_v18 = vmul.f32 %v4548_v33, %v4548_v33 }
 0x6f8   : > { %v4554_v19 = vsub.f32 %v2085_v51, %v2110_v14  ;;  %2141 = vadd.xlane.f32.xlu1 %v2128_v16 }
 0x6f9   : > { %v4556_v20 = vsub.f32 %v2084_v53, %v2109_v17  ;;  %2139 = vadd.xlane.f32.xlu0 %v2127_v18 }
 0x6fa   : > { %v2126_v21 = vmul.f32 %v4554_v19, %v4554_v19 }
 0x6fb   : > { %v2125_v22 = vmul.f32 %v4556_v20, %v4556_v20 }
 0x6fc   : > { %2137 = vadd.xlane.f32.xlu1 %v2126_v21 }
 0x6fd   : > { %2135 = vadd.xlane.f32.xlu0 %v2125_v22 }
 0x708   : > { %v2105_v23 = vpop.xlane.xlu1 %2104 }
 0x709   : > { %v2114_v24 = vmul.f32 0.0078125, %v2105_v23  ;;  %v2103_v25 = vpop.xlane.xlu0 %2102 }
 0x70a   : > { %v2113_v26 = vmul.f32 0.0078125, %v2103_v25 }
 0x70b   : > { %v4562_v27 = vsub.f32 %v2089_v0, %v2114_v24 }
 0x70c   : > { %v4564_v28 = vsub.f32 %v2088_v49, %v2113_v26 }
 0x70d   : > { %v2130_v29 = vmul.f32 %v4562_v27, %v4562_v27 }
 0x70e   : > { %v2129_v30 = vmul.f32 %v4564_v28, %v4564_v28 }
 0x70f   : > { %2145 = vadd.xlane.f32.xlu1 %v2130_v29 }
 0x710   : > { %2143 = vadd.xlane.f32.xlu0 %v2129_v30 }
 0x711   : > { %3696 = shalt.err (!%p3693_p2)
}
 0x712   : > { %s3697_s28 = scalar_lea.hbm %s4575_s11, 8192  ;;  %s3701_s16 = scalar_lea.hbm %s4847_s9, 16384 }
 0x713   : > { %p3698_p10 = scmp.ne.s32.totalorder %s4575_s11, %s3697_s28  ;;  %p3702_p1 = scmp.lt.u32.totalorder %s4575_s11, %s4847_s9 }
 0x714   : > { %p3703_p13 = scmp.lt.u32.totalorder %s3701_s16, %s3697_s28  ;;  %p3705_p7 = scmp.lt.u32.totalorder %s3697_s28, %s4575_s11 }
 0x715   : > { %p3699_p8 = pnand %p3698_p10, %p4848_p5 }
 0x716   : > { %p3704_p0 = por %p3703_p13, %p3702_p1 }
 0x717   : > { %p3700_p12 = pneg %p3699_p8 }
 0x718   : > { %p3706_p4 = por %p3705_p7, %p3704_p0 }
 0x71a   : > { %p3707_p9 = pnand %p3706_p4, %p3700_p12 }
 0x71c   : > { %3710 = shalt.err (!%p3707_p9)
}
 0x71d   : > { %s3875_s1 = smov 512   ;;  %s3876_s7 = smov 32  }
 0x71e   : > { %3300 = dma.vmem_to_hbm [thread:$0]  (%p4848_p5), %s4577_s13, 8192, %s4575_s11, %s4581_s10, %s3875_s1, %s3875_s1, %s3876_s7  }
 0x71f   : > { %s4849_s13 = sld [smem:[#allocation49_spill]]  ;;  %s4850_s11 = sld [smem:[#allocation50_spill]] }
 0x720   : > { %s4851_s8 = sld [smem:[#allocation32_spill]]  ;;  %s2557_s24 = sshll.u32 %s4845_s18, 4 }
 0x721   : > { %s4852_s28 = sld [smem:[#allocation39_spill]]  ;;  %s2244_s12 = sshll.u32 %s4315_s30, 4  ;;  %s4635_s12 = int_to_ptr.vmem [resolvable:$true] %s2244_s12 }
 0x722   : > { %s4853_s29 = sld [smem:[#allocation51_spill]]  ;;  %s2218_s7 = scalar_lea.sflag [#allocation7], %s4283_s4 }
 0x723   : > { %s3711_s20 = scalar_lea.vmem %s4635_s12, 1024  ;;  %s3877_s6 = smov [#allocation15]  }
 0x724   : > { %p3712_p5 = scmp.ne.s32.totalorder %s4635_s12, %s3711_s20 }
 0x725   : > { %v2550_v48 = vld [vmem:[%s4849_s13] ss:$0 sm:$0xff]  ;;  %s3715_s13 = sshll.u32 %s3877_s6, 4  ;;  %s3716_s13 = int_to_ptr.vmem [resolvable:$false] %s3715_s13 }
 0x726   : > { %v2551_v54 = vld [vmem:[%s4850_s11] ss:$0 sm:$0xff]  ;;  %s2567_s27 = sshll.u32 %s4851_s8, 3  ;;  %s3717_s19 = scalar_lea.vmem %s3716_s13, 2048 }
 0x727   : > { %s2241_s17 = sadd.s32 %s2567_s27, %s2557_s24  ;;  %p4854_p3 = scmp.ne.s32.totalorder %s4852_s28, 0 }
 0x728   : > { %s2558_s0 = sshll.u32 %s2241_s17, 7  ;;  %p3718_p2 = scmp.lt.s32.totalorder %s4635_s12, %s3716_s13 }
 0x729   : > { %s4633_s1 = scalar_lea.hbm %s4853_s29, %s2558_s0  ;;  %p3713_p11 = pnand %p3712_p5, %p4854_p3 }
 0x72a   : > { %p3719_p10 = scmp.lt.s32.totalorder %s3717_s19, %s3711_s20 }
 0x72b   : > { %p3714_p6 = pneg %p3713_p11 }
 0x72c   : > { %p3720_p8 = por %p3719_p10, %p3718_p2 }
 0x72e   : > { %p3721_p12 = pnand %p3720_p8, %p3714_p6 }
 0x77c   : > { %v2134_v31 = vpop.xlane.xlu1 %2133 }
 0x77d   : > { %v2148_v32 = vmul.f32 0.0078125, %v2134_v31  ;;  %v2132_v34 = vpop.xlane.xlu0 %2131 }
 0x77e   : > { %v2147_v35 = vmul.f32 0.0078125, %v2132_v34 }
 0x77f   : > { %v2156_v36 = vadd.f32 1e-05, %v2148_v32 }
 0x780   : > { %v2155_v37 = vadd.f32 1e-05, %v2147_v35 }
 0x781   : > { %3493 = vrsqrt.f32 %v2156_v36 }
 0x782   : > { %3495 = vrsqrt.f32 %v2155_v37 }
 0x785   : > { %v2142_v38 = vpop.xlane.xlu1 %2141 }
 0x786   : > { %v2152_v39 = vmul.f32 0.0078125, %v2142_v38  ;;  %v2140_v40 = vpop.xlane.xlu0 %2139 }
 0x787   : > { %v2151_v41 = vmul.f32 0.0078125, %v2140_v40 }
 0x788   : > { %v2160_v42 = vadd.f32 1e-05, %v2152_v39 }
 0x789   : > { %v2159_v43 = vadd.f32 1e-05, %v2151_v41  ;;  %v2138_v44 = vpop.xlane.xlu1 %2137 }
 0x78a   : > { %3497 = vrsqrt.f32 %v2160_v42  ;;  %v2150_v45 = vmul.f32 0.0078125, %v2138_v44  ;;  %v2136_v46 = vpop.xlane.xlu0 %2135 }
 0x78b   : > { %v3494_v47 = vpop.eup %3493  ;;  %3499 = vrsqrt.f32 %v2159_v43  ;;  %v2149_v50 = vmul.f32 0.0078125, %v2136_v46 }
 0x78c   : > { %v3496_v51 = vpop.eup %3495  ;;  %v2172_v52 = vmul.f32 %v3494_v47, %v4538_v3  ;;  %v2158_v53 = vadd.f32 1e-05, %v2150_v45 }
 0x78d   : > { %v2171_v55 = vmul.f32 %v3496_v51, %v4540_v6  ;;  %v2157_v56 = vadd.f32 1e-05, %v2149_v50 }
 0x78e   : > { %v2187_v57 = vmul.f32 %v2550_v48, %v2172_v52  ;;  %3501 = vrsqrt.f32 %v2158_v53 }
 0x78f   : > { %v2186_v58 = vmul.f32 %v2550_v48, %v2171_v55  ;;  %3503 = vrsqrt.f32 %v2157_v56 }
 0x790   : > { %v2202_v59 = vadd.f32 %v2551_v54, %v2187_v57 }
 0x791   : > { %v2201_v60 = vadd.f32 %v2551_v54, %v2186_v58 }
 0x792   : > { %2211 = vst [vmem:[%s4315_s30 + $0x10] sm:$0xff] %v2202_v59 }
 0x793   : > { %2209 = vst [vmem:[%s4315_s30] sm:$0xff] %v2201_v60 }
 0x794   : > { %v3498_v62 = vpop.eup %3497 }
 0x795   : > { %v3500_v63 = vpop.eup %3499  ;;  %v2176_v0 = vmul.f32 %v3498_v62, %v4546_v13 }
 0x796   : > { %v2175_v49 = vmul.f32 %v3500_v63, %v4548_v33 }
 0x797   : > { %v2191_v2 = vmul.f32 %v2550_v48, %v2176_v0 }
 0x798   : > { %v3502_v61 = vpop.eup %3501  ;;  %v2190_v4 = vmul.f32 %v2550_v48, %v2175_v49 }
 0x799   : > { %v3504_v5 = vpop.eup %3503  ;;  %v2206_v3 = vadd.f32 %v2551_v54, %v2191_v2  ;;  %v2174_v6 = vmul.f32 %v3502_v61, %v4554_v19 }
 0x79a   : > { %v2205_v8 = vadd.f32 %v2551_v54, %v2190_v4  ;;  %v2173_v9 = vmul.f32 %v3504_v5, %v4556_v20 }
 0x79b   : > { %2212 = vst [vmem:[%s4315_s30 + $0x18] sm:$0xff] %v2206_v3  ;;  %v2189_v1 = vmul.f32 %v2550_v48, %v2174_v6 }
 0x79c   : > { %2210 = vst [vmem:[%s4315_s30 + $0x8] sm:$0xff] %v2205_v8  ;;  %v2188_v10 = vmul.f32 %v2550_v48, %v2173_v9  ;;  %v2146_v12 = vpop.xlane.xlu1 %2145 }
 0x79d   : > { %v2204_v7 = vadd.f32 %v2551_v54, %v2189_v1  ;;  %v2154_v13 = vmul.f32 0.0078125, %v2146_v12  ;;  %v2144_v33 = vpop.xlane.xlu0 %2143 }
 0x79e   : > { %v2203_v11 = vadd.f32 %v2551_v54, %v2188_v10  ;;  %v2153_v14 = vmul.f32 0.0078125, %v2144_v33 }
 0x79f   : > { %2215 = vst [vmem:[%s4315_s30 + $0x30] sm:$0xff] %v2204_v7  ;;  %v2162_v15 = vadd.f32 1e-05, %v2154_v13 }
 0x7a0   : > { %2213 = vst [vmem:[%s4315_s30 + $0x20] sm:$0xff] %v2203_v11  ;;  %v2161_v16 = vadd.f32 1e-05, %v2153_v14 }
 0x7a1   : > { %3505 = vrsqrt.f32 %v2162_v15 }
 0x7a2   : > { %3507 = vrsqrt.f32 %v2161_v16 }
 0x7ab   : > { %v3506_v17 = vpop.eup %3505 }
 0x7ac   : > { %v3508_v18 = vpop.eup %3507  ;;  %v2178_v19 = vmul.f32 %v3506_v17, %v4562_v27 }
 0x7ad   : > { %v2177_v20 = vmul.f32 %v3508_v18, %v4564_v28 }
 0x7ae   : > { %v2193_v21 = vmul.f32 %v2550_v48, %v2178_v19 }
 0x7af   : > { %v2192_v22 = vmul.f32 %v2550_v48, %v2177_v20 }
 0x7b0   : > { %v2208_v23 = vadd.f32 %v2551_v54, %v2193_v21 }
 0x7b1   : > { %v2207_v24 = vadd.f32 %v2551_v54, %v2192_v22 }
 0x7b2   : > { %2216 = vst [vmem:[%s4315_s30 + $0x38] sm:$0xff] %v2208_v23 }
 0x7b3   : > { %2214 = vst [vmem:[%s4315_s30 + $0x28] sm:$0xff] %v2207_v24 }
 0x7b4   : > { %3724 = shalt.err (!%p3721_p12)
}
 0x7b5   : > { %s3725_s30 = scalar_lea.hbm %s4633_s1, 1024  ;;  %s3729_s27 = scalar_lea.hbm %s4853_s29, 4096 }
 0x7b6   : > { %p3726_p1 = scmp.ne.s32.totalorder %s4633_s1, %s3725_s30  ;;  %p3730_p7 = scmp.lt.u32.totalorder %s4633_s1, %s4853_s29 }
 0x7b7   : > { %p3731_p4 = scmp.lt.u32.totalorder %s3729_s27, %s3725_s30  ;;  %p3733_p5 = scmp.lt.u32.totalorder %s3725_s30, %s4633_s1 }
 0x7b8   : > { %p3727_p13 = pnand %p3726_p1, %p4854_p3 }
 0x7b9   : > { %p3732_p9 = por %p3731_p4, %p3730_p7 }
 0x7ba   : > { %p3728_p0 = pneg %p3727_p13 }
 0x7bb   : > { %p3734_p11 = por %p3733_p5, %p3732_p9 }
 0x7bd   : > { %p3735_p6 = pnand %p3734_p11, %p3728_p0 }
 0x7bf   : > { %3738 = shalt.err (!%p3735_p6)
}
 0x7c0   : > { %s3878_s16 = smov 256   ;;  %s3879_s15 = smov 16  }
 0x7c1   : > { %3299 = dma.vmem_to_hbm [thread:$0]  (%p4854_p3), %s4635_s12, 1024, %s4633_s1, %s2218_s7, %s3878_s16, %s3878_s16, %s3879_s15  }
 0x7c2   : > { %s2561_s20 = sshll.u32 %s4851_s8, 2  ;;  %s2294_s6 = sshll.u32 %s4319_s14, 4  ;;  %s2295_s6 = int_to_ptr.vmem [resolvable:$true] %s2294_s6 }
 0x7c3   : > { %s2275_s13 = sadd.s32 %s2561_s20, %s2557_s24  ;;  %s4855_s12 = sld [smem:[#allocation53_spill]] }
 0x7c4   : > { %s2563_s19 = sshll.u32 %s2275_s13, 7  ;;  %s3880_s7 = smov 512  }
 0x7c5   : > { %3301 = sst [smem:[#allocation20]] (%p4854_p3), %s3880_s7  ;;  %s3881_s23 = smov 1024  }
 0x7c6   : > { %3302 = sst [smem:[#allocation20 + $0x1]] (%p4854_p3), %s3881_s23  ;;  %s3882_s11 = smov 4  }
 0x7c7   : > { %3303 = sst [smem:[#allocation20 + $0x2]] (%p4854_p3), %s3882_s11  ;;  %s3883_s14 = smov 128  }
 0x7c8   : > { %3304 = sst [smem:[#allocation20 + $0x3]] (%p4854_p3), %s3883_s14  ;;  %s3884_s18 = smov 8  }
 0x7c9   : > { %s2277_s1 = scalar_lea.hbm %s4855_s12, %s2563_s19  ;;  %3305 = sst [smem:[#allocation20 + $0x4]] (%p4854_p3), %s3883_s14 }
 0x7ca   : > { %3306 = sst [smem:[#allocation20 + $0x5]] (%p4854_p3), %s3884_s18  ;;  %s3885_s8 = smov [#allocation19]  }
 0x7cb   : > { %s3886_s24 = smov 0  }
 0x7cc   : > { %3307 = dma.general (%p4854_p3), %s2295_s6, 1024, %s2277_s1, %s4581_s10, %s3885_s8, [#allocation20], %s3886_s24, 0  }
 0x7cd PF: > { %s4856_s27 = sld [smem:[#allocation34_spill]]  ;;  %s4857_s17 = sld [smem:[#allocation31_spill]] }
 0x7ce   : > { %s4858_s0 = sld [smem:[#allocation42_spill]] }
 0x7d3   : > { %p3348_p2 = scmp.ge.s32.totalorder %s4856_s27, 2  ;;  %s2322_s16 = sand.u32 1, %s4857_s17  }
 0x7d4   : > { %p4859_p10 = scmp.ne.s32.totalorder %s4858_s0, 0  ;;  %s2323_s15 = scalar_lea.sflag [#allocation7], %s2322_s16 }
 0x7d6   : > { %p3332_p8 = pnand %p3348_p2, %p4859_p10 }
 0x7d8   : > { %3804 = dma.done.wait (!%p3332_p8), %s2323_s15, 1024  }
 0x7d9   : > { %3806 = vsyncadd (!%p3332_p8), %s2323_s15, 4294966272  ;;  %s4860_s20 = sadd.s32 4294967294, %s4856_s27   ;;  %s4861_s13 = sld [smem:[#allocation37_spill]] }
 0x7da   : > { %s2331_s19 = sand.u32 1, %s4860_s20  }
 0x7db   : > { %s2332_s30 = scalar_lea.sflag [#allocation17], %s2331_s19 }
 0x7df   : > { %p4862_p12 = scmp.ne.s32.totalorder %s4861_s13, 0 }
 0x7e1   : > { %p3335_p1 = pnand %p3348_p2, %p4862_p12 }
 0x7e3   : > { %3808 = dma.done.wait (!%p3335_p1), %s2332_s30, 8192  }
 0x7e4   : > { %3810 = vsyncadd (!%p3335_p1), %s2332_s30, 4294959104 }
 0x7e5   : > { %3812 = dma.done.wait (!%p3332_p8), %s2332_s30, 1024  }
 0x7e6   : > { %3814 = vsyncadd (!%p3332_p8), %s2332_s30, 4294966272  ;;  %s33_s27 = sadd.s32 1, %s4856_s27   ;;  %s4863_s17 = sld [smem:[#allocation29_spill]] }
 0x7e7   : > { %p30_p3 = scmp.ge.s32.totalorder %s33_s27, 6   ;;  %s4864_s18 = sld [smem:[#allocation30_spill]] }
 0x7e8   : > { %s4865_s19 = sld [smem:[#allocation43_spill]]  ;;  %s4866_s10 = sld [smem:[#allocation44_spill]] }
 0x7e9   : > { %s4867_s28 = sld [smem:[#allocation38_spill]]  ;;  %s4868_s6 = sld [smem:[#allocation40_spill]] }
 0x7ea   : > { %s4869_s20 = smov %s3833_s21  ;;  %s4870_s21 = smov %s3837_s22 }
 0x7eb   : > { %s4872_s23 = smov %s3849_s25  ;;  %s4873_s24 = smov %s3853_s26 }
 0x7ec   :  { %32 = sbr.rel (!%p30_p3) target bundleno = 23 (0x17), region = 173 }
 0x7ee   : > { %s4871_s22 = smov %s4866_s10 }
 0x7ef   : > { %s4874_s25 = smov %s4867_s28  ;;  %s4875_s26 = smov %s4868_s6 }
 0x7f3   :  { %2346 = vsyncpa [#allocation6], 1 }
 0x7f4   :  { %2348 = vsyncpa [#allocation6 + $0x1], 1 }
 0x7f5   :  { %2349 = vsyncpa [#allocation9], 1 }
 0x7f6   :  { %2350 = vsyncpa [#allocation13], 1 }
 0x7f7   :  { %2351 = vsyncpa [#allocation7], 1 }
 0x7f8   :  { %2353 = vsyncpa [#allocation7 + $0x1], 1 }
 0x7f9   :  { %2354 = vsyncpa [#allocation17], 1 }
 0x7fa   :  { %2356 = vsyncpa [#allocation17 + $0x1], 1 }

// kernel: tpu_custom_call.1
= control target key start
LH: loop header
LB: loop body
LE: loop exit
PB: predicated region body
PF: predicated region fallthrough
CT: control target
= control target key end

     0   :  { %s4779_s0 = inlined_call_operand.hbm [shape: f32[2,64,128], index: 0, kind: input, shape index: {}]   ;;  %s4780_s1 = inlined_call_operand.hbm [shape: f32[2,128,128], index: 1, kind: input, shape index: {}]   ;;  %s4781_s2 = inlined_call_operand.hbm [shape: s8[2,64,128], index: 2, kind: input, shape index: {}]   ;;  %s4782_s3 = inlined_call_operand.hbm [shape: f32[128,256], index: 3, kind: input, shape index: {}]   ;;  %s4783_s4 = inlined_call_operand.hbm [shape: f32[128,512], index: 4, kind: input, shape index: {}]   ;;  %s4784_s5 = inlined_call_operand.hbm [shape: f32[128,128], index: 5, kind: input, shape index: {}]   ;;  %s4785_s6 = inlined_call_operand.vmem [shape: f32[1,128], index: 6, kind: input, shape index: {}]   ;;  %s4786_s7 = inlined_call_operand.vmem [shape: f32[1,128], index: 7, kind: input, shape index: {}]   ;;  %s4787_s8 = inlined_call_operand.vmem [shape: f32[1,128], index: 8, kind: input, shape index: {}]   ;;  %s4788_s9 = inlined_call_operand.hbm [shape: f32[2,64,256], index: 9, kind: output, shape index: {0}]   ;;  %s4789_s10 = inlined_call_operand.hbm [shape: f32[2,128,512], index: 10, kind: output, shape index: {1}]   ;;  %s4790_s11 = inlined_call_operand.hbm [shape: f32[2,2,64,128], index: 11, kind: output, shape index: {2}]  }
   0x1   :  { %4825 = sst [smem:[#allocation43_spill]] %s4780_s1 }
   0x2   :  { %4826 = sst [smem:[#allocation44_spill]] %s4782_s3 }
   0x3   :  { %4827 = sst [smem:[#allocation45_spill]] %s4783_s4 }
   0x4   :  { %4828 = sst [smem:[#allocation46_spill]] %s4784_s5 }
   0x5   :  { %4829 = sst [smem:[#allocation47_spill]] %s4785_s6 }
   0x6   :  { %4830 = sst [smem:[#allocation48_spill]] %s4786_s7 }
   0x7   :  { %4831 = sst [smem:[#allocation49_spill]] %s4787_s8 }
   0x8   :  { %4832 = sst [smem:[#allocation50_spill]] %s4788_s9 }
   0x9   :  { %4833 = sst [smem:[#allocation51_spill]] %s4789_s10 }
   0xa   :  { %4834 = sst [smem:[#allocation52_spill]] %s4790_s11 }
   0xb   :  { %17 = vsyncpa [#allocation6], 0 }
   0xc   :  { %19 = vsyncpa [#allocation6 + $0x1], 0 }
   0xd   :  { %20 = vsyncpa [#allocation9], 0 }
   0xe   :  { %22 = vsyncpa [#allocation9 + $0x1], 0 }
   0xf   :  { %23 = vsyncpa [#allocation12], 0 }
  0x10   :  { %24 = vsyncpa [#allocation15], 0 }
  0x11   :  { %25 = vsyncpa [#allocation7], 0 }
  0x12   :  { %27 = vsyncpa [#allocation7 + $0x1], 0 }
  0x13   :  { %28 = vsyncpa [#allocation18], 0 }
  0x14   :  { %30 = vsyncpa [#allocation18 + $0x1], 0  ;;  %s3978_s17 = smov 0   ;;  %s3980_s18 = smov 0  }
  0x15   :  { %s3982_s19 = smov 0   ;;  %s3984_s20 = smov 0  }
  0x16   :  { %s3986_s21 = smov 0   ;;  %s3988_s22 = smov 0  }
  0x17   :  { %s3990_s23 = smov 0   ;;  %s3992_s24 = smov 0  }
  0x18   :  { %s3994_s25 = smov 0   ;;  %s3996_s26 = smov 0  }
  0x19   :  { %s3998_s27 = smov 0  }
  0x1a LB: > { %4835 = sst [smem:[#allocation30_spill]] %s3852_s18  ;;  %s4032_s28 = sadd.s32 4294967295, %s3888_s27   ;;  %s3888_s27 = sphi %s3998_s27, %s36_s27   ;;  %s3884_s26 = sphi %s3996_s26, %s4915_s26   ;;  %s3880_s25 = sphi %s3994_s25, %s4914_s25   ;;  %s3876_s24 = sphi %s3992_s24, %s4913_s24   ;;  %s3872_s23 = sphi %s3990_s23, %s4912_s23   ;;  %s3868_s22 = sphi %s3988_s22, %s4911_s22   ;;  %s3864_s21 = sphi %s3986_s21, %s4910_s21   ;;  %s3860_s20 = sphi %s3984_s20, %s4909_s20   ;;  %s3856_s19 = sphi %s3982_s19, %s4908_s19   ;;  %s3852_s18 = sphi %s3980_s18, %s4907_s18   ;;  %s3848_s17 = sphi %s3978_s17, %s4904_s17  }
  0x1b   : > { %4836 = sst [smem:[#allocation31_spill]] %s3860_s20  ;;  %s4791_s29 = sadd.s32 4294967294, %s3888_s27  }
  0x1c   : > { %4837 = sst [smem:[#allocation32_spill]] %s3872_s23  ;;  %p70_p0 = scmp.ne.s32.totalorder %s3864_s21, %s3860_s20 }
  0x1d   : > { %4838 = sst [smem:[#allocation33_spill]] %s3876_s24  ;;  %p4797_p1 = scmp.eq.s32.totalorder %s4032_s28, 0 }
  0x1e   : > { %4839 = sst [smem:[#allocation34_spill]] %s4032_s28  ;;  %p96_p2 = scmp.ne.s32.totalorder %s3852_s18, %s3848_s17 }
  0x1f   : > { %p4042_p4 = por %p4797_p1, %p70_p0  ;;  %p282_p5 = scmp.eq.s32.totalorder %s4791_s29, 3 }
  0x20   : > { %p4050_p6 = por %p96_p2, %p4797_p1  ;;  %p2555_p7 = scmp.ge.s32.totalorder %s3888_s27, 1 }
  0x21   : > { %s4840_s30 = scalar_select %p4042_p4, 1, 0 }
  0x22   : > { %s4842_s12 = scalar_select %p4050_p6, 1, 0 }
  0x23   : > { %4841 = sst [smem:[#allocation35_spill]] %s4840_s30  ;;  %p4055_p8 = por %p282_p5, %p70_p0 }
  0x24   : > { %4843 = sst [smem:[#allocation36_spill]] %s4842_s12  ;;  %p4059_p9 = por %p282_p5, %p96_p2 }
  0x25   : > { %s4844_s13 = scalar_select %p4055_p8, 1, 0 }
  0x26   : > { %s4846_s14 = scalar_select %p4059_p9, 1, 0 }
  0x27   : > { %4845 = sst [smem:[#allocation37_spill]] %s4844_s13  ;;  %p343_p10 = scmp.lt.s32.totalorder %s3888_s27, 5 }
  0x28   : > { %4847 = sst [smem:[#allocation38_spill]] %s4846_s14  ;;  %s3890_s16 = smov [#allocation11]  }
  0x29   : > { %p4064_p11 = pnand %p2555_p7, %p343_p10  ;;  %s355_s17 = sshll.u32 %s3890_s16, 4  ;;  %s356_s17 = int_to_ptr.vmem [resolvable:$true] %s355_s17 }
  0x2a   : > { %s4850_s3 = sld [smem:[#allocation44_spill]] }
  0x2b   : > { %s4848_s15 = scalar_select %p4064_p11, 1, 0 }
  0x2c   : > { %p3343_p12 = pneg %p4064_p11 }
  0x2e   : > { %p4072_p13 = pnand %p3343_p12, %p4797_p1 }
  0x30   : > { %s4849_s29 = scalar_select %p4072_p13, 1, 0 }
  0x31   : > { %s3540_s11 = scalar_lea.hbm %s4850_s3, 4096  ;;  %p4086_p5 = pneg %p4072_p13 }
  0x32   : > { %p3541_p2 = scmp.ne.s32.totalorder %s4850_s3, %s3540_s11  ;;  %p3547_p12 = scmp.lt.u32.totalorder %s3540_s11, %s4850_s3 }
  0x34   : > { %p3543_p7 = pnand %p4086_p5, %p3541_p2 }
  0x36   : > { %p3544_p10 = pneg %p3543_p7 }
  0x38   : > { %p3549_p1 = pnand %p3547_p12, %p3544_p10 }
  0x3a   : > { %3552 = shalt.err (!%p3549_p1)
}
  0x3b   : > { %s3553_s20 = scalar_lea.vmem %s356_s17, 4096  ;;  %p3561_p8 = scmp.lt.s32.totalorder %s356_s17, %s356_s17 }
  0x3c   : > { %p3554_p3 = scmp.ne.s32.totalorder %s356_s17, %s3553_s20  ;;  %p3562_p6 = scmp.lt.s32.totalorder %s3553_s20, %s3553_s20 }
  0x3e   : > { %p3556_p0 = pnand %p3554_p3, %p4086_p5  ;;  %p3563_p4 = por %p3562_p6, %p3561_p8 }
  0x40   : > { %p3557_p9 = pneg %p3556_p0 }
  0x42   : > { %p3564_p11 = pnand %p3563_p4, %p3557_p9 }
  0x44   : > { %3567 = shalt.err (!%p3564_p11)
}
  0x45   : > { %s3891_s8 = smov 256   ;;  %s3892_s7 = smov 16  }
  0x46   : > { %3346 = dma.hbm_to_vmem [thread:$0]  (!%p4072_p13), %s4850_s3, 4096, %s356_s17, [#allocation12], %s3891_s8, %s3891_s8, %s3892_s7  }
  0x47   : > { %p90_p1 = scmp.ne.s32.totalorder %s3856_s19, %s3852_s18  ;;  %p4805_p3 = scmp.lt.s32.totalorder %s3888_s27, 4 }
  0x48   : > { %p4852_p4 = scmp.eq.s32.totalorder %s3888_s27, 0  ;;  %p4853_p8 = scmp.eq.s32.totalorder %s4032_s28, 3 }
  0x49   : > { %s427_s14 = sand.u32 1, %s3888_s27   ;;  %s429_s20 = sand.u32 1, %s3856_s19  }
  0x4a   : > { %p92_p6 = por %p90_p1, %p4852_p4  ;;  %p4109_p9 = por %p4853_p8, %p90_p1 }
  0x4b   : > { %s2564_s13 = sshll.u32 %s429_s20, 7  ;;  %s2598_s24 = sshll.u32 %s3884_s26, 11 }
  0x4c   : > { %s4854_s11 = scalar_select %p4109_p9, 1, 0 }
  0x4d   : > { %s4856_s1 = sld [smem:[#allocation43_spill]]  ;;  %s431_s17 = scalar_lea.vmem [#allocation8], %s2564_s13 }
  0x4e   : > { %4855 = sst [smem:[#allocation39_spill]] %s4854_s11  ;;  %s438_s8 = sshll.u32 %s431_s17, 4  ;;  %s4121_s8 = int_to_ptr.vmem [resolvable:$true] %s438_s8 }
  0x4f   : > { %p4125_p11 = pnand %p4805_p3, %p92_p6  ;;  %s3893_s9 = smov [#allocation13]  }
  0x50   : > { %s4129_s10 = sshll.u32 %s3893_s9, 4  ;;  %s4131_s6 = scalar_lea.sflag [#allocation9], %s427_s14  ;;  %s369_s10 = int_to_ptr.vmem [resolvable:$true] %s4129_s10 }
  0x51   : > { %p3570_p2 = pneg %p4125_p11 }
  0x53   : > { %s4119_s12 = scalar_lea.hbm %s4856_s1, %s2598_s24  ;;  %s3573_s20 = scalar_lea.hbm %s4856_s1, 4096 }
  0x54   : > { %s3568_s23 = scalar_lea.hbm %s4119_s12, 2048  ;;  %p3574_p12 = scmp.lt.u32.totalorder %s4119_s12, %s4856_s1 }
  0x55   : > { %p3569_p0 = scmp.ne.s32.totalorder %s4119_s12, %s3568_s23  ;;  %p3575_p1 = scmp.lt.u32.totalorder %s3573_s20, %s3568_s23 }
  0x56   : > { %p3577_p6 = scmp.lt.u32.totalorder %s3568_s23, %s4119_s12 }
  0x57   : > { %p3571_p7 = pnand %p3570_p2, %p3569_p0  ;;  %p3576_p4 = por %p3575_p1, %p3574_p12 }
  0x59   : > { %p3572_p10 = pneg %p3571_p7  ;;  %p3578_p8 = por %p3577_p6, %p3576_p4 }
  0x5b   : > { %p3579_p3 = pnand %p3578_p8, %p3572_p10 }
  0x5d   : > { %3582 = shalt.err (!%p3579_p3)
}
  0x5e   : > { %s3583_s14 = scalar_lea.vmem %s4121_s8, 2048  ;;  %s3894_s9 = smov [#allocation8]  }
  0x5f   : > { %p3584_p0 = scmp.ne.s32.totalorder %s4121_s8, %s3583_s14  ;;  %s3588_s24 = sshll.u32 %s3894_s9, 4  ;;  %s3589_s24 = int_to_ptr.vmem [resolvable:$false] %s3588_s24 }
  0x60   : > { %s3590_s3 = scalar_lea.vmem %s3589_s24, 4096  ;;  %p3591_p13 = scmp.lt.s32.totalorder %s4121_s8, %s3589_s24 }
  0x61   : > { %p3586_p7 = pnand %p3584_p0, %p3570_p2  ;;  %p3592_p12 = scmp.lt.s32.totalorder %s3590_s3, %s3583_s14 }
  0x63   : > { %p3587_p9 = pneg %p3586_p7  ;;  %p3593_p1 = por %p3592_p12, %p3591_p13 }
  0x65   : > { %p3594_p4 = pnand %p3593_p1, %p3587_p9 }
  0x67   : > { %3597 = shalt.err (!%p3594_p4)
}
  0x68   : > { %s4809_s23 = smov 128   ;;  %s4811_s13 = smov 8  }
  0x69   : > { %3359 = dma.hbm_to_vmem [thread:$0]  (!%p4125_p11), %s4119_s12, 2048, %s4121_s8, %s4131_s6, %s4809_s23, %s4809_s23, %s4811_s13  }
  0x6a   : > { %s4858_s4 = sld [smem:[#allocation45_spill]] }
  0x70   : > { %s3598_s14 = scalar_lea.hbm %s4858_s4, 8192 }
  0x71   : > { %p3599_p13 = scmp.ne.s32.totalorder %s4858_s4, %s3598_s14  ;;  %p3605_p2 = scmp.lt.u32.totalorder %s3598_s14, %s4858_s4 }
  0x73   : > { %p3601_p3 = pnand %p3599_p13, %p4086_p5 }
  0x75   : > { %p3602_p9 = pneg %p3601_p3 }
  0x77   : > { %p3607_p10 = pnand %p3605_p2, %p3602_p9 }
  0x79   : > { %3610 = shalt.err (!%p3607_p10)
}
  0x7a   : > { %s3611_s7 = scalar_lea.vmem %s369_s10, 8192  ;;  %p3619_p0 = scmp.lt.s32.totalorder %s369_s10, %s369_s10 }
  0x7b   : > { %p3612_p11 = scmp.ne.s32.totalorder %s369_s10, %s3611_s7  ;;  %p3620_p7 = scmp.lt.s32.totalorder %s3611_s7, %s3611_s7 }
  0x7d   : > { %p3614_p6 = pnand %p3612_p11, %p4086_p5  ;;  %p3621_p12 = por %p3620_p7, %p3619_p0 }
  0x7f   : > { %p3615_p8 = pneg %p3614_p6 }
  0x81   : > { %p3622_p1 = pnand %p3621_p12, %p3615_p8 }
  0x83   : > { %3625 = shalt.err (!%p3622_p1)
}
  0x84   : > { %s3897_s12 = smov 512   ;;  %s3898_s8 = smov 32  }
  0x85   : > { %p4859_p4 = scmp.ne.s32.totalorder %s4849_s29, 0  ;;  %s3899_s17 = smov [#allocation14]  }
  0x86   : > { %s381_s14 = sshll.u32 %s3899_s17, 4  ;;  %s4860_s5 = sld [smem:[#allocation46_spill]]  ;;  %s382_s14 = int_to_ptr.vmem [resolvable:$true] %s381_s14 }
  0x87   : > { %3349 = dma.hbm_to_vmem [thread:$0]  (!%p4859_p4), %s4858_s4, 8192, %s369_s10, [#allocation12], %s3897_s12, %s3897_s12, %s3898_s8  }
  0x8c   : > { %s3626_s3 = scalar_lea.hbm %s4860_s5, 2048 }
  0x8d   : > { %p3627_p13 = scmp.ne.s32.totalorder %s4860_s5, %s3626_s3  ;;  %p3633_p2 = scmp.lt.u32.totalorder %s3626_s3, %s4860_s5 }
  0x8f   : > { %p3629_p3 = pnand %p3627_p13, %p4086_p5 }
  0x91   : > { %p3630_p9 = pneg %p3629_p3 }
  0x93   : > { %p3635_p10 = pnand %p3633_p2, %p3630_p9 }
  0x95   : > { %3638 = shalt.err (!%p3635_p10)
}
  0x96   : > { %s3639_s10 = scalar_lea.vmem %s382_s14, 2048  ;;  %p3647_p0 = scmp.lt.s32.totalorder %s382_s14, %s382_s14 }
  0x97   : > { %p3640_p11 = scmp.ne.s32.totalorder %s382_s14, %s3639_s10  ;;  %p3648_p7 = scmp.lt.s32.totalorder %s3639_s10, %s3639_s10 }
  0x99   : > { %p3642_p6 = pnand %p3640_p11, %p4086_p5  ;;  %p3649_p12 = por %p3648_p7, %p3647_p0 }
  0x9b   : > { %p3643_p8 = pneg %p3642_p6 }
  0x9d   : > { %p3650_p1 = pnand %p3649_p12, %p3643_p8 }
  0x9f   : > { %3653 = shalt.err (!%p3650_p1)
}
  0xa0   : > { %s4861_s23 = smov 8   ;;  %s4862_s12 = smov 128  }
  0xa1   : > { %3352 = dma.hbm_to_vmem [thread:$0]  (!%p4859_p4), %s4860_s5, 2048, %s382_s14, [#allocation15], %s4862_s12, %s4862_s12, %s4861_s23  }
  0xa2   : > { %s45_s29 = sadd.s32 1, %s3880_s25  ;;  %s48_s16 = sadd.s32 1, %s3884_s26 }
  0xa3   : > { %p46_p5 = scmp.ge.s32.totalorder %s45_s29, 2  ;;  %s57_s8 = sadd.s32 1, %s3868_s22 }
  0xa4   : > { %p64_p13 = scmp.ne.s32.totalorder %s3868_s22, %s3864_s21  ;;  %p4864_p3 = scmp.eq.s32.totalorder %s3888_s27, 0 }
  0xa5   : > { %s4917_s29 = smov (%p46_p5, %s45_s29), 0  ;;  %s4919_s16 = smov (!%p46_p5, %s48_s16), %s3884_s26 }
  0xa6   : > { %4863 = sst [smem:[#allocation40_spill]] %s4917_s29  ;;  %s53_s1 = ssub.s32 %s3880_s25, %s4917_s29 }
  0xa7   : > { %p4214_p9 = por %p4864_p3, %p64_p13  ;;  %p50_p4 = scmp.ge.s32.totalorder %s4919_s16, 2 }
  0xa8   : > { %p4866_p2 = scmp.eq.s32.totalorder %s4032_s28, 3  ;;  %s4225_s14 = sand.u32 1, %s3868_s22  }
  0xa9   : > { %s2561_s9 = sshll.u32 %s3880_s25, 2  ;;  %s4921_s16 = smov (%p50_p4, %s4919_s16), 0 }
  0xaa   : > { %p4220_p10 = por %p4866_p2, %p64_p13  ;;  %4869 = sst [smem:[#allocation42_spill]] %s4921_s16 }
  0xab   : > { %s2560_s24 = sshll.u32 %s4225_s14, 5  ;;  %s52_s3 = ssub.s32 %s3884_s26, %s4921_s16 }
  0xac   : > { %s4867_s17 = scalar_select %p4220_p10, 1, 0 }
  0xad   : > { %s54_s7 = sor.u32 %s53_s1, %s52_s3  ;;  %p81_p11 = scmp.eq.s32.totalorder %s52_s3, 0 }
  0xae   : > { %4868 = sst [smem:[#allocation41_spill]] %s4867_s17  ;;  %p55_p6 = scmp.eq.s32.totalorder %s54_s7, 0 }
  0xaf   : > { %s2562_s10 = sshll.u32 %s3884_s26, 3  ;;  %s4870_s11 = sadd.s32 1, %s3856_s19 }
  0xb0   : > { %s4237_s13 = scalar_select %p81_p11, %s3856_s19, %s4870_s11  }
  0xb1   : > { %s4240_s4 = scalar_select %p55_p6, %s3868_s22, %s57_s8  }
  0xb2   : > { %s414_s5 = sadd.s32 %s2562_s10, %s2561_s9  ;;  %s408_s29 = scalar_lea.vmem [#allocation5], %s2560_s24 }
  0xb3   : > { %s417_s17 = sshll.u32 %s408_s29, 4  ;;  %s2563_s18 = sshll.u32 %s414_s5, 7  ;;  %s4242_s17 = int_to_ptr.vmem [resolvable:$true] %s417_s17 }
  0xb4   : > { %s4247_s16 = scalar_lea.hbm %s4779_s0, %s2563_s18  ;;  %p4871_p8 = scmp.lt.s32.totalorder %s3888_s27, 4 }
  0xb5   : > { %s2567_s5 = sshll.u32 %s4225_s14, 3  ;;  %s2568_s29 = sshll.u32 %s3884_s26, 1 }
  0xb6   : > { %p4253_p0 = pnand %p4871_p8, %p4214_p9  ;;  %s405_s1 = scalar_lea.sflag [#allocation6], %s4225_s14 }
  0xb7   : > { %s3654_s9 = scalar_lea.hbm %s4247_s16, 512  ;;  %s3659_s30 = scalar_lea.hbm %s4779_s0, 2048 }
  0xb8   : > { %p3655_p7 = scmp.ne.s32.totalorder %s4247_s16, %s3654_s9  ;;  %p3656_p12 = pneg %p4253_p0 }
  0xb9   : > { %p3660_p13 = scmp.lt.u32.totalorder %s4247_s16, %s4779_s0  ;;  %p3661_p3 = scmp.lt.u32.totalorder %s3659_s30, %s3654_s9 }
  0xba   : > { %p3657_p1 = pnand %p3656_p12, %p3655_p7  ;;  %p3663_p4 = scmp.lt.u32.totalorder %s3654_s9, %s4247_s16 }
  0xbb   : > { %p3662_p9 = por %p3661_p3, %p3660_p13 }
  0xbc   : > { %p3658_p5 = pneg %p3657_p1 }
  0xbd   : > { %p3664_p2 = por %p3663_p4, %p3662_p9 }
  0xbf   : > { %p3665_p11 = pnand %p3664_p2, %p3658_p5 }
  0xc1   : > { %3668 = shalt.err (!%p3665_p11)
}
  0xc2   : > { %s3669_s3 = scalar_lea.vmem %s4242_s17, 512  ;;  %s3900_s7 = smov [#allocation5]  }
  0xc3   : > { %p3670_p6 = scmp.ne.s32.totalorder %s4242_s17, %s3669_s3  ;;  %s3674_s10 = sshll.u32 %s3900_s7, 4  ;;  %s3675_s10 = int_to_ptr.vmem [resolvable:$false] %s3674_s10 }
  0xc4   : > { %s3676_s11 = scalar_lea.vmem %s3675_s10, 1024  ;;  %p3677_p1 = scmp.lt.s32.totalorder %s4242_s17, %s3675_s10 }
  0xc5   : > { %p3672_p8 = pnand %p3670_p6, %p3656_p12  ;;  %p3678_p13 = scmp.lt.s32.totalorder %s3676_s11, %s3669_s3 }
  0xc7   : > { %p3673_p7 = pneg %p3672_p8  ;;  %p3679_p3 = por %p3678_p13, %p3677_p1 }
  0xc9   : > { %p3680_p9 = pnand %p3679_p3, %p3673_p7 }
  0xcb   : > { %3683 = shalt.err (!%p3680_p9)
}
  0xcc   : > { %3356 = dma.hbm_to_vmem [thread:$0]  (!%p4253_p0), %s4247_s16, 512, %s4242_s17, %s405_s1, %s4862_s12, %s4862_s12, %s4861_s23  }
  0xcd   : > { %s457_s9 = sadd.s32 %s3880_s25, %s2568_s29  ;;  %s452_s18 = scalar_lea.vmem [#allocation10], %s2567_s5 }
  0xce   : > { %s461_s28 = sshll.u32 %s452_s18, 4  ;;  %s2569_s30 = sshll.u32 %s457_s9, 7  ;;  %s462_s28 = int_to_ptr.vmem [resolvable:$true] %s461_s28 }
  0xcf   : > { %s459_s3 = scalar_lea.hbm %s4781_s2, %s2569_s30  ;;  %s3689_s23 = scalar_lea.hbm %s4781_s2, 512 }
  0xd0   : > { %s3684_s7 = scalar_lea.hbm %s459_s3, 128  ;;  %p3690_p11 = scmp.lt.u32.totalorder %s459_s3, %s4781_s2 }
  0xd1   : > { %p3685_p5 = scmp.ne.s32.totalorder %s459_s3, %s3684_s7  ;;  %p3691_p6 = scmp.lt.u32.totalorder %s3689_s23, %s3684_s7 }
  0xd2   : > { %p3693_p7 = scmp.lt.u32.totalorder %s3684_s7, %s459_s3 }
  0xd3   : > { %p3687_p4 = pnand %p3685_p5, %p3656_p12  ;;  %p3692_p8 = por %p3691_p6, %p3690_p11 }
  0xd5   : > { %p3688_p2 = pneg %p3687_p4  ;;  %p3694_p1 = por %p3693_p7, %p3692_p8 }
  0xd7   : > { %p3695_p13 = pnand %p3694_p1, %p3688_p2 }
  0xd9   : > { %3698 = shalt.err (!%p3695_p13)
}
  0xda   : > { %s3699_s17 = scalar_lea.vmem %s462_s28, 128  ;;  %s3901_s14 = smov [#allocation10]  }
  0xdb   : > { %p3700_p3 = scmp.ne.s32.totalorder %s462_s28, %s3699_s17  ;;  %s3704_s5 = sshll.u32 %s3901_s14, 4  ;;  %s3705_s5 = int_to_ptr.vmem [resolvable:$false] %s3704_s5 }
  0xdc   : > { %s3706_s29 = scalar_lea.vmem %s3705_s5, 256  ;;  %p3707_p4 = scmp.lt.s32.totalorder %s462_s28, %s3705_s5 }
  0xdd   : > { %p3702_p9 = pnand %p3700_p3, %p3656_p12  ;;  %p3708_p10 = scmp.lt.s32.totalorder %s3706_s29, %s3699_s17 }
  0xdf   : > { %p3703_p5 = pneg %p3702_p9  ;;  %p3709_p6 = por %p3708_p10, %p3707_p4 }
  0xe1   : > { %p3710_p11 = pnand %p3709_p6, %p3703_p5 }
  0xe3   : > { %3713 = shalt.err (!%p3710_p11)
}
  0xe4   : > { %3362 = dma.hbm_to_vmem [thread:$0]  (!%p4253_p0), %s459_s3, 128, %s462_s28, %s4131_s6  }
  0xe5   : > { %p4873_p2 = scmp.ne.s32.totalorder %s4848_s15, 0 }
  0xe6   : > { %s4874_s1 = sld [smem:[#allocation35_spill]] (!%p4873_p2)  ;;  %s4316_s9 = sand.u32 (!%p4873_p2), 1, %s3864_s21  }
  0xe7   : > { %470 = sbr.rel (%p4873_p2) target bundleno = 2006 (0x7d6), region = 56  ;;  %s2571_s18 = sshll.u32 (!%p4873_p2), %s4316_s9, 5 }
  0xe8   : > { %s473_s30 = scalar_lea.sflag (!%p4873_p2), [#allocation6], %s4316_s9  ;;  %s4320_s20 = scalar_lea.vmem (!%p4873_p2), [#allocation5], %s2571_s18 }
  0xec   : > { %p4875_p10 = scmp.ne.s32.totalorder (!%p4873_p2), %s4874_s1, 0 }
  0xee   : > { %3815 = dma.done.wait (%p4875_p10), %s473_s30, 512  }
  0xef   : > { %3817 = vsyncadd (%p4875_p10), %s473_s30, 4294966784  ;;  %s4876_s8 = sld [smem:[#allocation34_spill]]  ;;  %s4877_s6 = sld [smem:[#allocation30_spill]] }
  0xf0   : > { %s4878_s15 = sld [smem:[#allocation36_spill]] }
  0xf5   : > { %s481_s28 = sand.u32 1, %s4876_s8   ;;  %s483_s24 = sand.u32 1, %s4877_s6  }
  0xf6   : > { %s2572_s3 = sshll.u32 %s483_s24, 7  ;;  %s482_s7 = scalar_lea.sflag [#allocation9], %s481_s28 }
  0xf7   : > { %s4330_s10 = scalar_lea.vmem [#allocation8], %s2572_s3  ;;  %p4879_p0 = scmp.ne.s32.totalorder %s4878_s15, 0 }
  0xf9   : > { %3819 = dma.done.wait (%p4879_p0), %s482_s7, 2048  }
  0xfa   : > { %3821 = vsyncadd (%p4879_p0), %s482_s7, 4294965248  ;;  %s2573_s11 = sshll.u32 %s4316_s9, 3 }
  0xfb   : > { %s4337_s23 = scalar_lea.vmem [#allocation10], %s2573_s11 }
  0xfc   : > { %3823 = dma.done.wait (%p4875_p10), %s482_s7, 128  }
  0xfd   : > { %3825 = vsyncadd (%p4875_p10), %s482_s7, 4294967168  ;;  %p4880_p12 = scmp.eq.s32.totalorder %s4876_s8, 0 }
  0xff   : > { %3827 = dma.done.wait (%p4880_p12), [#allocation12], 12288   ;;  %p4881_p8 = pmov %p4880_p12 }
 0x101   : > { %3829 = vsyncadd (%p4881_p8), [#allocation12], 4294955008  ;;  %p4882_p7 = pmov %p4881_p8 }
 0x103   : > { %3831 = dma.done.wait (%p4882_p7), [#allocation15], 2048   ;;  %p4883_p1 = pmov %p4882_p7 }
 0x104   : > { %s2577_s12 = sshll.u32 %s4316_s9, 6  ;;  %s2578_s16 = sshll.u32 %s483_s24, 9 }
 0x105   : > { %3833 = vsyncadd (%p4883_p1), [#allocation15], 4294965248  ;;  %s4352_s17 = scalar_lea.vmem [#allocation16], %s2577_s12  ;;  %s4354_s14 = scalar_lea.vmem [#allocation17], %s2578_s16 }
 0x106   : > { %s4356_s5 = scalar_lea.vmem [#allocation19], %s2577_s12  ;;  %s4884_s29 = sld [smem:[#allocation32_spill]] }
 0x10c   : > { %p2580_p13 = scmp.ne.s32.totalorder %s4884_s29, 0 }
 0x10d   : > { %v593_v0 = vld [vmem:[#allocation13 + $0x18] sm:$0xff] (!%p2580_p13)  ;;  %v592_v2 = vld [vmem:[#allocation13 + $0x10] sm:$0xff] (!%p2580_p13)  ;;  %v3902_v7 = vmov (!%p2580_p13), 0.0   ;;  %v591_v37 = vld [vmem:[#allocation13 + $0x8] sm:$0xff] (!%p2580_p13) }
 0x10e   : > { %573 = sbr.rel (%p2580_p13) target bundleno = 792 (0x318), region = 84  ;;  %v597_v1 = vld [vmem:[#allocation13 + $0x38] sm:$0xff] (!%p2580_p13)  ;;  %v596_v4 = vld [vmem:[#allocation13 + $0x30] sm:$0xff] (!%p2580_p13)  ;;  %879 = vmatprep.mubr.f32.mxu1 (!%p2580_p13), %v3902_v7  ;;  %718 = vmatprep.mubr.f32.mxu0 (!%p2580_p13), %v3902_v7  ;;  %v595_v38 = vld [vmem:[#allocation13 + $0x28] sm:$0xff] (!%p2580_p13) }
 0x10f   : > { %v3041_v3 = vpack.c.bf16 (!%p2580_p13), %v597_v1, %v593_v0  ;;  %v601_v5 = vld [vmem:[#allocation13 + $0x58] sm:$0xff] (!%p2580_p13)  ;;  %v3043_v8 = vpack.c.bf16 (!%p2580_p13), %v596_v4, %v592_v2  ;;  %v600_v10 = vld [vmem:[#allocation13 + $0x50] sm:$0xff] (!%p2580_p13)  ;;  %v590_v39 = vld [vmem:[#allocation13] sm:$0xff] (!%p2580_p13)  ;;  %v3009_v41 = vpack.c.bf16 (!%p2580_p13), %v595_v38, %v591_v37 }
 0x110   : > { %v605_v6 = vld [vmem:[#allocation13 + $0x78] sm:$0xff] (!%p2580_p13)  ;;  %v604_v11 = vld [vmem:[#allocation13 + $0x70] sm:$0xff] (!%p2580_p13)  ;;  %v594_v42 = vld [vmem:[#allocation13 + $0x20] sm:$0xff] (!%p2580_p13) }
 0x111   : > { %v3045_v9 = vpack.c.bf16 (!%p2580_p13), %v605_v6, %v601_v5  ;;  %v609_v12 = vld [vmem:[#allocation13 + $0x98] sm:$0xff] (!%p2580_p13)  ;;  %3042 = vmatprep.subr.bf16.mxu1 (!%p2580_p13), %v3041_v3  ;;  %v3047_v14 = vpack.c.bf16 (!%p2580_p13), %v604_v11, %v600_v10  ;;  %v608_v16 = vld [vmem:[#allocation13 + $0x90] sm:$0xff] (!%p2580_p13)  ;;  %v599_v43 = vld [vmem:[#allocation13 + $0x48] sm:$0xff] (!%p2580_p13)  ;;  %v3011_v45 = vpack.c.bf16 (!%p2580_p13), %v594_v42, %v590_v39  ;;  %3010 = vmatprep.subr.bf16.mxu0 (!%p2580_p13), %v3009_v41 }
 0x112   : > { %v613_v13 = vld [vmem:[#allocation13 + $0xb8] sm:$0xff] (!%p2580_p13)  ;;  %3044 = vmatpush1.bf16.msra.mxu1 (!%p2580_p13), %v3043_v8  ;;  %v612_v17 = vld [vmem:[#allocation13 + $0xb0] sm:$0xff] (!%p2580_p13)  ;;  %v603_v44 = vld [vmem:[#allocation13 + $0x68] sm:$0xff] (!%p2580_p13) }
 0x113   : > { %3046 = vmatprep.subr.bf16.mxu1 (!%p2580_p13), %v3045_v9  ;;  %v3049_v15 = vpack.c.bf16 (!%p2580_p13), %v613_v13, %v609_v12  ;;  %v617_v18 = vld [vmem:[#allocation13 + $0xd8] sm:$0xff] (!%p2580_p13)  ;;  %v3051_v20 = vpack.c.bf16 (!%p2580_p13), %v612_v17, %v608_v16  ;;  %v616_v22 = vld [vmem:[#allocation13 + $0xd0] sm:$0xff] (!%p2580_p13)  ;;  %v3013_v46 = vpack.c.bf16 (!%p2580_p13), %v603_v44, %v599_v43  ;;  %v598_v47 = vld [vmem:[#allocation13 + $0x40] sm:$0xff] (!%p2580_p13)  ;;  %3012 = vmatpush1.bf16.msra.mxu0 (!%p2580_p13), %v3011_v45 }
 0x114   : > { %v621_v19 = vld [vmem:[#allocation13 + $0xf8] sm:$0xff] (!%p2580_p13)  ;;  %v620_v23 = vld [vmem:[#allocation13 + $0xf0] sm:$0xff] (!%p2580_p13)  ;;  %v602_v48 = vld [vmem:[#allocation13 + $0x60] sm:$0xff] (!%p2580_p13) }
 0x115   : > { %v3053_v21 = vpack.c.bf16 %v621_v19, %v617_v18  ;;  %v625_v24 = vld [vmem:[#allocation13 + $0x118] sm:$0xff]  ;;  %v3055_v26 = vpack.c.bf16 %v620_v23, %v616_v22  ;;  %v624_v28 = vld [vmem:[#allocation13 + $0x110] sm:$0xff]  ;;  %v607_v49 = vld [vmem:[#allocation13 + $0x88] sm:$0xff]  ;;  %v3015_v54 = vpack.c.bf16 %v602_v48, %v598_v47  ;;  %3014 = vmatprep.subr.bf16.mxu0 %v3013_v46 }
 0x116   : > { %3048 = vmatpush1.bf16.msra.mxu1 %v3047_v14  ;;  %v629_v25 = vld [vmem:[#allocation13 + $0x138] sm:$0xff]  ;;  %v628_v29 = vld [vmem:[#allocation13 + $0x130] sm:$0xff]  ;;  %v611_v50 = vld [vmem:[#allocation13 + $0xa8] sm:$0xff] }
 0x117   : > { %3050 = vmatprep.subr.bf16.mxu1 %v3049_v15  ;;  %v3057_v27 = vpack.c.bf16 %v629_v25, %v625_v24  ;;  %v633_v30 = vld [vmem:[#allocation13 + $0x158] sm:$0xff]  ;;  %v632_v32 = vld [vmem:[#allocation13 + $0x150] sm:$0xff]  ;;  %v3059_v34 = vpack.c.bf16 %v628_v29, %v624_v28  ;;  %v3017_v57 = vpack.c.bf16 %v611_v50, %v607_v49  ;;  %v606_v58 = vld [vmem:[#allocation13 + $0x80] sm:$0xff]  ;;  %3016 = vmatpush1.bf16.msra.mxu0 %v3015_v54 }
 0x118   : > { %v637_v31 = vld [vmem:[#allocation13 + $0x178] sm:$0xff]  ;;  %v636_v33 = vld [vmem:[#allocation13 + $0x170] sm:$0xff]  ;;  %v610_v59 = vld [vmem:[#allocation13 + $0xa0] sm:$0xff] }
 0x119   : > { %v641_v35 = vld [vmem:[#allocation13 + $0x198] sm:$0xff]  ;;  %v3061_v40 = vpack.c.bf16 %v637_v31, %v633_v30  ;;  %v3063_v51 = vpack.c.bf16 %v636_v33, %v632_v32  ;;  %v640_v52 = vld [vmem:[#allocation13 + $0x190] sm:$0xff]  ;;  %v615_v61 = vld [vmem:[#allocation13 + $0xc8] sm:$0xff]  ;;  %v3019_v1 = vpack.c.bf16 %v610_v59, %v606_v58  ;;  %3018 = vmatprep.subr.bf16.mxu0 %v3017_v57 }
 0x11a   : > { %3052 = vmatpush1.bf16.msra.mxu1 %v3051_v20  ;;  %v645_v36 = vld [vmem:[#allocation13 + $0x1b8] sm:$0xff]  ;;  %v644_v53 = vld [vmem:[#allocation13 + $0x1b0] sm:$0xff]  ;;  %v619_v62 = vld [vmem:[#allocation13 + $0xe8] sm:$0xff] }
 0x11b   : > { %3054 = vmatprep.subr.bf16.mxu1 %v3053_v21  ;;  %v3065_v55 = vpack.c.bf16 %v645_v36, %v641_v35  ;;  %v649_v56 = vld [vmem:[#allocation13 + $0x1d8] sm:$0xff]  ;;  %v3067_v63 = vpack.c.bf16 %v644_v53, %v640_v52  ;;  %v648_v0 = vld [vmem:[#allocation13 + $0x1d0] sm:$0xff]  ;;  %v3021_v4 = vpack.c.bf16 %v619_v62, %v615_v61  ;;  %v614_v5 = vld [vmem:[#allocation13 + $0xc0] sm:$0xff]  ;;  %3020 = vmatpush1.bf16.msra.mxu0 %v3019_v1 }
 0x11c   : > { %v653_v60 = vld [vmem:[#allocation13 + $0x1f8] sm:$0xff]  ;;  %v652_v3 = vld [vmem:[#allocation13 + $0x1f0] sm:$0xff]  ;;  %v618_v6 = vld [vmem:[#allocation13 + $0xe0] sm:$0xff] }
 0x11d   : > { %v3069_v2 = vpack.c.bf16 %v653_v60, %v649_v56  ;;  %v623_v8 = vld [vmem:[#allocation13 + $0x108] sm:$0xff]  ;;  %v1040_v10 = vld [vmem:[#allocation14] sm:$0xff]  ;;  %v3071_v12 = vpack.c.bf16 %v652_v3, %v648_v0  ;;  %v3023_v13 = vpack.c.bf16 %v618_v6, %v614_v5  ;;  %3022 = vmatprep.subr.bf16.mxu0 %v3021_v4  ;;  %v1042_v20 = vld [vmem:[#allocation14 + $0x10] sm:$0xff] }
 0x11e   : > { %3056 = vmatpush1.bf16.msra.mxu1 %v3055_v26  ;;  %v627_v9 = vld [vmem:[#allocation13 + $0x128] sm:$0xff]  ;;  %v622_v15 = vld [vmem:[#allocation13 + $0x100] sm:$0xff]  ;;  %v1043_v21 = vld [vmem:[#allocation14 + $0x18] sm:$0xff] }
 0x11f   : > { %3058 = vmatprep.subr.bf16.mxu1 %v3057_v27  ;;  %v1041_v11 = vld [vmem:[#allocation14 + $0x8] sm:$0xff]  ;;  %v3025_v14 = vpack.c.bf16 %v627_v9, %v623_v8  ;;  %v626_v16 = vld [vmem:[#allocation13 + $0x120] sm:$0xff]  ;;  %v574_v22 = vld [vmem:[%s4330_s10] sm:$0xff]  ;;  %3024 = vmatpush1.bf16.msra.mxu0 %v3023_v13  ;;  %v4365_v29 = vpack.c.bf16 %v1043_v21, %v1042_v20 }
 0x120   : > { %v4361_v17 = vpack.c.bf16 %v1041_v11, %v1040_v10  ;;  %v631_v18 = vld [vmem:[#allocation13 + $0x148] sm:$0xff]  ;;  %v3027_v23 = vpack.c.bf16 %v626_v16, %v622_v15  ;;  %v630_v25 = vld [vmem:[#allocation13 + $0x140] sm:$0xff]  ;;  %v575_v32 = vld [vmem:[%s4330_s10 + $0x8] sm:$0xff] }
 0x121   : > { %v635_v19 = vld [vmem:[#allocation13 + $0x168] sm:$0xff]  ;;  %3026 = vmatprep.subr.bf16.mxu0 %v3025_v14  ;;  %v634_v26 = vld [vmem:[#allocation13 + $0x160] sm:$0xff]  ;;  %v1047_v41 = vld [vmem:[#allocation14 + $0x38] sm:$0xff] }
 0x122   : > { %3060 = vmatpush1.bf16.msra.mxu1 %v3059_v34  ;;  %v3029_v24 = vpack.c.bf16 %v635_v19, %v631_v18  ;;  %v639_v27 = vld [vmem:[#allocation13 + $0x188] sm:$0xff]  ;;  %v1044_v30 = vld [vmem:[#allocation14 + $0x20] sm:$0xff]  ;;  %v3031_v33 = vpack.c.bf16 %v634_v26, %v630_v25  ;;  %v1050_v53 = vld [vmem:[#allocation14 + $0x50] sm:$0xff] }
 0x123   : > { %3062 = vmatprep.subr.bf16.mxu1 %v3061_v40  ;;  %v643_v28 = vld [vmem:[#allocation13 + $0x1a8] sm:$0xff]  ;;  %3028 = vmatpush1.bf16.msra.mxu0 %v3027_v23  ;;  %v638_v35 = vld [vmem:[#allocation13 + $0x180] sm:$0xff]  ;;  %v1046_v40 = vld [vmem:[#allocation14 + $0x30] sm:$0xff] }
 0x124   : > { %v1045_v31 = vld [vmem:[#allocation14 + $0x28] sm:$0xff]  ;;  %3030 = vmatprep.subr.bf16.mxu0 %v3029_v24  ;;  %v3033_v34 = vpack.c.bf16 %v643_v28, %v639_v27  ;;  %v642_v36 = vld [vmem:[#allocation13 + $0x1a0] sm:$0xff]  ;;  %v3085_v47 = vpack.c.bf16 %v1047_v41, %v1046_v40  ;;  %v1051_v54 = vld [vmem:[#allocation14 + $0x58] sm:$0xff] }
 0x125   : > { %v647_v37 = vld [vmem:[#allocation13 + $0x1c8] sm:$0xff]  ;;  %v3081_v39 = vpack.c.bf16 %v1045_v31, %v1044_v30  ;;  %v576_v42 = vld [vmem:[%s4330_s10 + $0x10] sm:$0xff]  ;;  %v3035_v43 = vpack.c.bf16 %v642_v36, %v638_v35  ;;  %v3093_v56 = vpack.c.bf16 %v1051_v54, %v1050_v53  ;;  %v579_v59 = vld [vmem:[%s4330_s10 + $0x28] sm:$0xff] }
 0x126   : > { %3064 = vmatpush1.bf16.msra.mxu1 %v3063_v51  ;;  %v651_v38 = vld [vmem:[#allocation13 + $0x1e8] sm:$0xff]  ;;  %v646_v45 = vld [vmem:[#allocation13 + $0x1c0] sm:$0xff]  ;;  %v583_v0 = vld [vmem:[%s4330_s10 + $0x48] sm:$0xff] }
 0x127   : > { %3066 = vmatprep.subr.bf16.mxu1 %v3065_v55  ;;  %3032 = vmatpush1.bf16.msra.mxu0 %v3031_v33  ;;  %v3037_v44 = vpack.c.bf16 %v651_v38, %v647_v37  ;;  %v650_v46 = vld [vmem:[#allocation13 + $0x1e0] sm:$0xff]  ;;  %v1049_v49 = vld [vmem:[#allocation14 + $0x48] sm:$0xff]  ;;  %v578_v55 = vld [vmem:[%s4330_s10 + $0x20] sm:$0xff] }
 0x128   : > { %3034 = vmatprep.subr.bf16.mxu0 %v3033_v34  ;;  %v1048_v48 = vld [vmem:[#allocation14 + $0x40] sm:$0xff]  ;;  %v577_v50 = vld [vmem:[%s4330_s10 + $0x18] sm:$0xff]  ;;  %v3039_v51 = vpack.c.bf16 %v650_v46, %v646_v45  ;;  %v586_v3 = vld [vmem:[%s4330_s10 + $0x60] sm:$0xff] }
 0x129   : > { %v3089_v52 = vpack.c.bf16 %v1049_v49, %v1048_v48  ;;  %v1052_v57 = vld [vmem:[#allocation14 + $0x60] sm:$0xff]  ;;  %v1053_v58 = vld [vmem:[#allocation14 + $0x68] sm:$0xff]  ;;  %v587_v4 = vld [vmem:[%s4330_s10 + $0x68] sm:$0xff] }
 0x12a   : > { %3068 = vmatpush1.bf16.msra.mxu1 %v3067_v63  ;;  %v3097_v60 = vpack.c.bf16 %v1053_v58, %v1052_v57  ;;  %v580_v61 = vld [vmem:[%s4330_s10 + $0x30] sm:$0xff]  ;;  %v581_v62 = vld [vmem:[%s4330_s10 + $0x38] sm:$0xff]  ;;  %v582_v63 = vld [vmem:[%s4330_s10 + $0x40] sm:$0xff] }
 0x12b   : > { %3070 = vmatprep.subr.bf16.mxu1 %v3069_v2  ;;  %3036 = vmatpush1.bf16.msra.mxu0 %v3035_v43  ;;  %v584_v1 = vld [vmem:[%s4330_s10 + $0x50] sm:$0xff]  ;;  %v585_v2 = vld [vmem:[%s4330_s10 + $0x58] sm:$0xff]  ;;  %v1054_v8 = vld [vmem:[#allocation14 + $0x70] sm:$0xff] }
 0x12c   : > { %3038 = vmatprep.subr.bf16.mxu0 %v3037_v44  ;;  %v588_v5 = vld [vmem:[%s4330_s10 + $0x70] sm:$0xff]  ;;  %v589_v6 = vld [vmem:[%s4330_s10 + $0x78] sm:$0xff]  ;;  %v1055_v9 = vld [vmem:[#allocation14 + $0x78] sm:$0xff] }
 0x12d   : > { %v3101_v10 = vpack.c.bf16 %v1055_v9, %v1054_v8 }
 0x12e   : > { %3072 = vmatpush1.bf16.msra.mxu1 %v3071_v12 }
 0x12f   : > { %3106 = vmatprep.subr.bf16.mxu1 %v4361_v17  ;;  %3040 = vmatpush1.bf16.msra.mxu0 %v3039_v51 }
 0x130   : > { %3074 = vmatprep.subr.bf16.mxu0 %v4361_v17 }
 0x131   : > { %880 = vmatmul.mubr.f32.vlgmr.msra.gmra.mrb[0].mxu1 %v574_v22 }
 0x132   : > { %885 = vmatprep.mubr.f32.mxu1 %v3902_v7  ;;  %3108 = vmatpush3.bf16.msra.mxu1 %v4361_v17 }
 0x133   : > { %3110 = vmatprep.subr.bf16.mxu1 %v4365_v29  ;;  %719 = vmatmul.mubr.f32.vlgmr.msra.gmra.mrb[0].mxu0 %v574_v22 }
 0x134   : > { %724 = vmatprep.mubr.f32.mxu0 %v3902_v7  ;;  %3076 = vmatpush3.bf16.msra.mxu0 %v4361_v17 }
 0x135   : > { %886 = vmatmul.mubr.f32.gmra.mrb[2].mxu1 %v575_v32  ;;  %3078 = vmatprep.subr.bf16.mxu0 %v4365_v29 }
 0x136   : > { %891 = vmatprep.mubr.f32.mxu1 %v3902_v7  ;;  %3112 = vmatpush3.bf16.msra.mxu1 %v4365_v29 }
 0x137   : > { %3114 = vmatprep.subr.bf16.mxu1 %v3081_v39  ;;  %725 = vmatmul.mubr.f32.gmra.mrb[2].mxu0 %v575_v32 }
 0x138   : > { %730 = vmatprep.mubr.f32.mxu0 %v3902_v7  ;;  %3080 = vmatpush3.bf16.msra.mxu0 %v4365_v29 }
 0x139   : > { %892 = vmatmul.mubr.f32.gmra.mrb[4].mxu1 %v576_v42  ;;  %3082 = vmatprep.subr.bf16.mxu0 %v3081_v39 }
 0x13a   : > { %897 = vmatprep.mubr.f32.mxu1 %v3902_v7  ;;  %3116 = vmatpush3.bf16.msra.mxu1 %v3081_v39 }
 0x13b   : > { %3118 = vmatprep.subr.bf16.mxu1 %v3085_v47  ;;  %731 = vmatmul.mubr.f32.gmra.mrb[4].mxu0 %v576_v42 }
 0x13c   : > { %736 = vmatprep.mubr.f32.mxu0 %v3902_v7  ;;  %3084 = vmatpush3.bf16.msra.mxu0 %v3081_v39 }
 0x13d   : > { %898 = vmatmul.mubr.f32.gmra.mrb[6].mxu1 %v577_v50  ;;  %3086 = vmatprep.subr.bf16.mxu0 %v3085_v47 }
 0x13e   : > { %903 = vmatprep.mubr.f32.mxu1 %v3902_v7  ;;  %3120 = vmatpush3.bf16.msra.mxu1 %v3085_v47 }
 0x13f   : > { %3122 = vmatprep.subr.bf16.mxu1 %v3089_v52  ;;  %737 = vmatmul.mubr.f32.gmra.mrb[6].mxu0 %v577_v50 }
 0x140   : > { %742 = vmatprep.mubr.f32.mxu0 %v3902_v7  ;;  %3088 = vmatpush3.bf16.msra.mxu0 %v3085_v47 }
 0x141   : > { %904 = vmatmul.mubr.f32.gmra.mrb[8].mxu1 %v578_v55  ;;  %3090 = vmatprep.subr.bf16.mxu0 %v3089_v52 }
 0x142   : > { %909 = vmatprep.mubr.f32.mxu1 %v3902_v7  ;;  %3124 = vmatpush3.bf16.msra.mxu1 %v3089_v52 }
 0x143   : > { %3126 = vmatprep.subr.bf16.mxu1 %v3093_v56  ;;  %743 = vmatmul.mubr.f32.gmra.mrb[8].mxu0 %v578_v55 }
 0x144   : > { %748 = vmatprep.mubr.f32.mxu0 %v3902_v7  ;;  %3092 = vmatpush3.bf16.msra.mxu0 %v3089_v52 }
 0x145   : > { %910 = vmatmul.mubr.f32.gmra.mrb[10].mxu1 %v579_v59  ;;  %3094 = vmatprep.subr.bf16.mxu0 %v3093_v56 }
 0x146   : > { %915 = vmatprep.mubr.f32.mxu1 %v3902_v7  ;;  %3128 = vmatpush3.bf16.msra.mxu1 %v3093_v56 }
 0x147   : > { %3130 = vmatprep.subr.bf16.mxu1 %v3097_v60  ;;  %749 = vmatmul.mubr.f32.gmra.mrb[10].mxu0 %v579_v59 }
 0x148   : > { %754 = vmatprep.mubr.f32.mxu0 %v3902_v7  ;;  %3096 = vmatpush3.bf16.msra.mxu0 %v3093_v56 }
 0x149   : > { %916 = vmatmul.mubr.f32.gmra.mrb[12].mxu1 %v580_v61  ;;  %3098 = vmatprep.subr.bf16.mxu0 %v3097_v60 }
 0x14a   : > { %921 = vmatprep.mubr.f32.mxu1 %v3902_v7  ;;  %3132 = vmatpush3.bf16.msra.mxu1 %v3097_v60 }
 0x14b   : > { %755 = vmatmul.mubr.f32.gmra.mrb[12].mxu0 %v580_v61  ;;  %3134 = vmatprep.subr.bf16.mxu1 %v3101_v10 }
 0x14c   : > { %760 = vmatprep.mubr.f32.mxu0 %v3902_v7  ;;  %3100 = vmatpush3.bf16.msra.mxu0 %v3097_v60 }
 0x14d   : > { %922 = vmatmul.mubr.f32.gmra.mrb[14].mxu1 %v581_v62  ;;  %3102 = vmatprep.subr.bf16.mxu0 %v3101_v10 }
 0x14e   : > { %927 = vmatprep.mubr.f32.mxu1 %v3902_v7  ;;  %3136 = vmatpush3.bf16.msra.mxu1 %v3101_v10 }
 0x14f   : > { %761 = vmatmul.mubr.f32.gmra.mrb[14].mxu0 %v581_v62 }
 0x150   : > { %766 = vmatprep.mubr.f32.mxu0 %v3902_v7  ;;  %3104 = vmatpush3.bf16.msra.mxu0 %v3101_v10 }
 0x151   : > { %928 = vmatmul.mubr.f32.gmra.mrb[16].mxu1 %v582_v63 }
 0x152   : > { %933 = vmatprep.mubr.f32.mxu1 %v3902_v7 }
 0x153   : > { %767 = vmatmul.mubr.f32.gmra.mrb[16].mxu0 %v582_v63 }
 0x154   : > { %772 = vmatprep.mubr.f32.mxu0 %v3902_v7 }
 0x155   : > { %934 = vmatmul.mubr.f32.gmra.mrb[18].mxu1 %v583_v0 }
 0x156   : > { %939 = vmatprep.mubr.f32.mxu1 %v3902_v7 }
 0x157   : > { %773 = vmatmul.mubr.f32.gmra.mrb[18].mxu0 %v583_v0 }
 0x158   : > { %778 = vmatprep.mubr.f32.mxu0 %v3902_v7 }
 0x159   : > { %940 = vmatmul.mubr.f32.gmra.mrb[20].mxu1 %v584_v1 }
 0x15a   : > { %945 = vmatprep.mubr.f32.mxu1 %v3902_v7 }
 0x15b   : > { %779 = vmatmul.mubr.f32.gmra.mrb[20].mxu0 %v584_v1 }
 0x15c   : > { %784 = vmatprep.mubr.f32.mxu0 %v3902_v7 }
 0x15d   : > { %946 = vmatmul.mubr.f32.gmra.mrb[22].mxu1 %v585_v2 }
 0x15e   : > { %951 = vmatprep.mubr.f32.mxu1 %v3902_v7 }
 0x15f   : > { %785 = vmatmul.mubr.f32.gmra.mrb[22].mxu0 %v585_v2 }
 0x160   : > { %790 = vmatprep.mubr.f32.mxu0 %v3902_v7 }
 0x161   : > { %952 = vmatmul.mubr.f32.gmra.mrb[24].mxu1 %v586_v3 }
 0x162   : > { %957 = vmatprep.mubr.f32.mxu1 %v3902_v7 }
 0x163   : > { %791 = vmatmul.mubr.f32.gmra.mrb[24].mxu0 %v586_v3 }
 0x164   : > { %796 = vmatprep.mubr.f32.mxu0 %v3902_v7 }
 0x165   : > { %958 = vmatmul.mubr.f32.gmra.mrb[26].mxu1 %v587_v4 }
 0x166   : > { %963 = vmatprep.mubr.f32.mxu1 %v3902_v7 }
 0x167   : > { %797 = vmatmul.mubr.f32.gmra.mrb[26].mxu0 %v587_v4 }
 0x168   : > { %802 = vmatprep.mubr.f32.mxu0 %v3902_v7 }
 0x169   : > { %964 = vmatmul.mubr.f32.gmra.mrb[28].mxu1 %v588_v5 }
 0x16a   : > { %969 = vmatprep.mubr.f32.mxu1 %v3902_v7 }
 0x16b   : > { %803 = vmatmul.mubr.f32.gmra.mrb[28].mxu0 %v588_v5 }
 0x16c   : > { %808 = vmatprep.mubr.f32.mxu0 %v3902_v7 }
 0x16d   : > { %970 = vmatmul.mubr.f32.gmra.mrb[30].mxu1 %v589_v6 }
 0x16f   : > { %809 = vmatmul.mubr.f32.gmra.mrb[30].mxu0 %v589_v6 }
 0x204   : > { %v881_v11 = vpop.f32.mrb[0].mxu1 }
 0x205   : > { %978 = vst [vmem:[%s4354_s14 + $0x10] sm:$0xff] %v881_v11  ;;  %v883_v12 = vpop.f32.mrb[1].mxu1  ;;  %2777 = vmatprep.mubr.f32.mxu0 %v881_v11 }
 0x206   : > { %979 = vst [vmem:[%s4354_s14 + $0x18] sm:$0xff] %v883_v12  ;;  %2833 = vmatprep.mubr.f32.mxu1 %v883_v12  ;;  %v720_v19 = vpop.f32.mrb[0].mxu0 }
 0x207   : > { %976 = vst [vmem:[%s4354_s14] sm:$0xff] %v720_v19  ;;  %1056 = vst [vmem:[#allocation2] sm:$0xff] %v720_v19  ;;  %v722_v21 = vpop.f32.mrb[1].mxu0 }
 0x208   : > { %v887_v7 = vpop.f32.mrb[2].mxu1  ;;  %977 = vst [vmem:[%s4354_s14 + $0x8] sm:$0xff] %v722_v21  ;;  %1234 = vst [vmem:[#allocation2 + $0x80] sm:$0xff] %v722_v21 }
 0x209   : > { %982 = vst [vmem:[%s4354_s14 + $0x30] sm:$0xff] %v887_v7  ;;  %v889_v13 = vpop.f32.mrb[3].mxu1  ;;  %2778 = vmatmul.mubr.f32.vlgmr.msra.gmra.mrb[32].mxu0 %v887_v7 }
 0x20a   : > { %983 = vst [vmem:[%s4354_s14 + $0x38] sm:$0xff] %v889_v13  ;;  %2834 = vmatmul.mubr.f32.vlgmr.msra.gmra.mrb[32].mxu1 %v889_v13  ;;  %v726_v23 = vpop.f32.mrb[2].mxu0 }
 0x20b   : > { %980 = vst [vmem:[%s4354_s14 + $0x20] sm:$0xff] %v726_v23  ;;  %1057 = vst [vmem:[#allocation2 + $0x8] sm:$0xff] %v726_v23  ;;  %v728_v25 = vpop.f32.mrb[3].mxu0 }
 0x20c   : > { %v893_v14 = vpop.f32.mrb[4].mxu1  ;;  %981 = vst [vmem:[%s4354_s14 + $0x28] sm:$0xff] %v728_v25  ;;  %1235 = vst [vmem:[#allocation2 + $0x88] sm:$0xff] %v728_v25 }
 0x20d   : > { %986 = vst [vmem:[%s4354_s14 + $0x50] sm:$0xff] %v893_v14  ;;  %v895_v15 = vpop.f32.mrb[5].mxu1  ;;  %2780 = vmatprep.mubr.f32.mxu0 %v893_v14 }
 0x20e   : > { %987 = vst [vmem:[%s4354_s14 + $0x58] sm:$0xff] %v895_v15  ;;  %2836 = vmatprep.mubr.f32.mxu1 %v895_v15  ;;  %v732_v27 = vpop.f32.mrb[4].mxu0 }
 0x20f   : > { %984 = vst [vmem:[%s4354_s14 + $0x40] sm:$0xff] %v732_v27  ;;  %1058 = vst [vmem:[#allocation2 + $0x10] sm:$0xff] %v732_v27  ;;  %v734_v29 = vpop.f32.mrb[5].mxu0 }
 0x210   : > { %v899_v16 = vpop.f32.mrb[6].mxu1  ;;  %985 = vst [vmem:[%s4354_s14 + $0x48] sm:$0xff] %v734_v29  ;;  %1236 = vst [vmem:[#allocation2 + $0x90] sm:$0xff] %v734_v29 }
 0x211   : > { %990 = vst [vmem:[%s4354_s14 + $0x70] sm:$0xff] %v899_v16  ;;  %v901_v17 = vpop.f32.mrb[7].mxu1  ;;  %2781 = vmatmul.mubr.f32.gmra.mrb[34].mxu0 %v899_v16 }
 0x212   : > { %991 = vst [vmem:[%s4354_s14 + $0x78] sm:$0xff] %v901_v17  ;;  %2837 = vmatmul.mubr.f32.gmra.mrb[34].mxu1 %v901_v17  ;;  %v738_v31 = vpop.f32.mrb[6].mxu0 }
 0x213   : > { %988 = vst [vmem:[%s4354_s14 + $0x60] sm:$0xff] %v738_v31  ;;  %1059 = vst [vmem:[#allocation2 + $0x18] sm:$0xff] %v738_v31  ;;  %v740_v33 = vpop.f32.mrb[7].mxu0 }
 0x214   : > { %v905_v18 = vpop.f32.mrb[8].mxu1  ;;  %989 = vst [vmem:[%s4354_s14 + $0x68] sm:$0xff] %v740_v33  ;;  %1237 = vst [vmem:[#allocation2 + $0x98] sm:$0xff] %v740_v33 }
 0x215   : > { %994 = vst [vmem:[%s4354_s14 + $0x90] sm:$0xff] %v905_v18  ;;  %v907_v20 = vpop.f32.mrb[9].mxu1  ;;  %2783 = vmatprep.mubr.f32.mxu0 %v905_v18 }
 0x216   : > { %995 = vst [vmem:[%s4354_s14 + $0x98] sm:$0xff] %v907_v20  ;;  %2839 = vmatprep.mubr.f32.mxu1 %v907_v20  ;;  %v744_v35 = vpop.f32.mrb[8].mxu0 }
 0x217   : > { %992 = vst [vmem:[%s4354_s14 + $0x80] sm:$0xff] %v744_v35  ;;  %1060 = vst [vmem:[#allocation2 + $0x20] sm:$0xff] %v744_v35  ;;  %v746_v37 = vpop.f32.mrb[9].mxu0 }
 0x218   : > { %v911_v22 = vpop.f32.mrb[10].mxu1  ;;  %993 = vst [vmem:[%s4354_s14 + $0x88] sm:$0xff] %v746_v37  ;;  %1238 = vst [vmem:[#allocation2 + $0xa0] sm:$0xff] %v746_v37 }
 0x219   : > { %998 = vst [vmem:[%s4354_s14 + $0xb0] sm:$0xff] %v911_v22  ;;  %v913_v24 = vpop.f32.mrb[11].mxu1  ;;  %2784 = vmatmul.mubr.f32.gmra.mrb[36].mxu0 %v911_v22 }
 0x21a   : > { %999 = vst [vmem:[%s4354_s14 + $0xb8] sm:$0xff] %v913_v24  ;;  %2840 = vmatmul.mubr.f32.gmra.mrb[36].mxu1 %v913_v24  ;;  %v750_v39 = vpop.f32.mrb[10].mxu0 }
 0x21b   : > { %996 = vst [vmem:[%s4354_s14 + $0xa0] sm:$0xff] %v750_v39  ;;  %1061 = vst [vmem:[#allocation2 + $0x28] sm:$0xff] %v750_v39  ;;  %v752_v41 = vpop.f32.mrb[11].mxu0 }
 0x21c   : > { %v917_v26 = vpop.f32.mrb[12].mxu1  ;;  %997 = vst [vmem:[%s4354_s14 + $0xa8] sm:$0xff] %v752_v41  ;;  %1239 = vst [vmem:[#allocation2 + $0xa8] sm:$0xff] %v752_v41 }
 0x21d   : > { %1002 = vst [vmem:[%s4354_s14 + $0xd0] sm:$0xff] %v917_v26  ;;  %v919_v28 = vpop.f32.mrb[13].mxu1  ;;  %2786 = vmatprep.mubr.f32.mxu0 %v917_v26 }
 0x21e   : > { %1003 = vst [vmem:[%s4354_s14 + $0xd8] sm:$0xff] %v919_v28  ;;  %2842 = vmatprep.mubr.f32.mxu1 %v919_v28  ;;  %v756_v43 = vpop.f32.mrb[12].mxu0 }
 0x21f   : > { %1000 = vst [vmem:[%s4354_s14 + $0xc0] sm:$0xff] %v756_v43  ;;  %1062 = vst [vmem:[#allocation2 + $0x30] sm:$0xff] %v756_v43  ;;  %v758_v45 = vpop.f32.mrb[13].mxu0 }
 0x220   : > { %v923_v30 = vpop.f32.mrb[14].mxu1  ;;  %1001 = vst [vmem:[%s4354_s14 + $0xc8] sm:$0xff] %v758_v45  ;;  %1240 = vst [vmem:[#allocation2 + $0xb0] sm:$0xff] %v758_v45 }
 0x221   : > { %1006 = vst [vmem:[%s4354_s14 + $0xf0] sm:$0xff] %v923_v30  ;;  %v925_v32 = vpop.f32.mrb[15].mxu1  ;;  %2787 = vmatmul.mubr.f32.gmra.mrb[38].mxu0 %v923_v30 }
 0x222   : > { %1007 = vst [vmem:[%s4354_s14 + $0xf8] sm:$0xff] %v925_v32  ;;  %2843 = vmatmul.mubr.f32.gmra.mrb[38].mxu1 %v925_v32  ;;  %v762_v47 = vpop.f32.mrb[14].mxu0 }
 0x223   : > { %1004 = vst [vmem:[%s4354_s14 + $0xe0] sm:$0xff] %v762_v47  ;;  %1063 = vst [vmem:[#allocation2 + $0x38] sm:$0xff] %v762_v47  ;;  %v764_v49 = vpop.f32.mrb[15].mxu0 }
 0x224   : > { %v929_v34 = vpop.f32.mrb[16].mxu1  ;;  %1005 = vst [vmem:[%s4354_s14 + $0xe8] sm:$0xff] %v764_v49  ;;  %1241 = vst [vmem:[#allocation2 + $0xb8] sm:$0xff] %v764_v49 }
 0x225   : > { %1010 = vst [vmem:[%s4354_s14 + $0x110] sm:$0xff] %v929_v34  ;;  %v931_v36 = vpop.f32.mrb[17].mxu1  ;;  %2789 = vmatprep.mubr.f32.mxu0 %v929_v34 }
 0x226   : > { %1011 = vst [vmem:[%s4354_s14 + $0x118] sm:$0xff] %v931_v36  ;;  %2845 = vmatprep.mubr.f32.mxu1 %v931_v36  ;;  %v768_v51 = vpop.f32.mrb[16].mxu0 }
 0x227   : > { %1008 = vst [vmem:[%s4354_s14 + $0x100] sm:$0xff] %v768_v51  ;;  %1064 = vst [vmem:[#allocation2 + $0x40] sm:$0xff] %v768_v51  ;;  %v770_v53 = vpop.f32.mrb[17].mxu0 }
 0x228   : > { %v935_v38 = vpop.f32.mrb[18].mxu1  ;;  %1009 = vst [vmem:[%s4354_s14 + $0x108] sm:$0xff] %v770_v53  ;;  %1242 = vst [vmem:[#allocation2 + $0xc0] sm:$0xff] %v770_v53 }
 0x229   : > { %1014 = vst [vmem:[%s4354_s14 + $0x130] sm:$0xff] %v935_v38  ;;  %v937_v40 = vpop.f32.mrb[19].mxu1  ;;  %2790 = vmatmul.mubr.f32.gmra.mrb[40].mxu0 %v935_v38 }
 0x22a   : > { %1015 = vst [vmem:[%s4354_s14 + $0x138] sm:$0xff] %v937_v40  ;;  %2846 = vmatmul.mubr.f32.gmra.mrb[40].mxu1 %v937_v40  ;;  %v774_v55 = vpop.f32.mrb[18].mxu0 }
 0x22b   : > { %1012 = vst [vmem:[%s4354_s14 + $0x120] sm:$0xff] %v774_v55  ;;  %1065 = vst [vmem:[#allocation2 + $0x48] sm:$0xff] %v774_v55  ;;  %v776_v57 = vpop.f32.mrb[19].mxu0 }
 0x22c   : > { %v941_v42 = vpop.f32.mrb[20].mxu1  ;;  %1013 = vst [vmem:[%s4354_s14 + $0x128] sm:$0xff] %v776_v57  ;;  %1243 = vst [vmem:[#allocation2 + $0xc8] sm:$0xff] %v776_v57 }
 0x22d   : > { %1018 = vst [vmem:[%s4354_s14 + $0x150] sm:$0xff] %v941_v42  ;;  %v943_v44 = vpop.f32.mrb[21].mxu1  ;;  %2792 = vmatprep.mubr.f32.mxu0 %v941_v42 }
 0x22e   : > { %1019 = vst [vmem:[%s4354_s14 + $0x158] sm:$0xff] %v943_v44  ;;  %2848 = vmatprep.mubr.f32.mxu1 %v943_v44  ;;  %v780_v59 = vpop.f32.mrb[20].mxu0 }
 0x22f   : > { %1016 = vst [vmem:[%s4354_s14 + $0x140] sm:$0xff] %v780_v59  ;;  %1066 = vst [vmem:[#allocation2 + $0x50] sm:$0xff] %v780_v59  ;;  %v782_v61 = vpop.f32.mrb[21].mxu0 }
 0x230   : > { %v947_v46 = vpop.f32.mrb[22].mxu1  ;;  %1017 = vst [vmem:[%s4354_s14 + $0x148] sm:$0xff] %v782_v61  ;;  %1244 = vst [vmem:[#allocation2 + $0xd0] sm:$0xff] %v782_v61 }
 0x231   : > { %1022 = vst [vmem:[%s4354_s14 + $0x170] sm:$0xff] %v947_v46  ;;  %v949_v48 = vpop.f32.mrb[23].mxu1  ;;  %2793 = vmatmul.mubr.f32.gmra.mrb[42].mxu0 %v947_v46 }
 0x232   : > { %1023 = vst [vmem:[%s4354_s14 + $0x178] sm:$0xff] %v949_v48  ;;  %2849 = vmatmul.mubr.f32.gmra.mrb[42].mxu1 %v949_v48  ;;  %v786_v63 = vpop.f32.mrb[22].mxu0 }
 0x233   : > { %1020 = vst [vmem:[%s4354_s14 + $0x160] sm:$0xff] %v786_v63  ;;  %1067 = vst [vmem:[#allocation2 + $0x58] sm:$0xff] %v786_v63  ;;  %v788_v1 = vpop.f32.mrb[23].mxu0 }
 0x234   : > { %v953_v50 = vpop.f32.mrb[24].mxu1  ;;  %1021 = vst [vmem:[%s4354_s14 + $0x168] sm:$0xff] %v788_v1  ;;  %1245 = vst [vmem:[#allocation2 + $0xd8] sm:$0xff] %v788_v1 }
 0x235   : > { %1026 = vst [vmem:[%s4354_s14 + $0x190] sm:$0xff] %v953_v50  ;;  %v955_v52 = vpop.f32.mrb[25].mxu1  ;;  %2795 = vmatprep.mubr.f32.mxu0 %v953_v50 }
 0x236   : > { %1027 = vst [vmem:[%s4354_s14 + $0x198] sm:$0xff] %v955_v52  ;;  %2851 = vmatprep.mubr.f32.mxu1 %v955_v52  ;;  %v792_v2 = vpop.f32.mrb[24].mxu0 }
 0x237   : > { %1024 = vst [vmem:[%s4354_s14 + $0x180] sm:$0xff] %v792_v2  ;;  %1068 = vst [vmem:[#allocation2 + $0x60] sm:$0xff] %v792_v2  ;;  %v794_v3 = vpop.f32.mrb[25].mxu0 }
 0x238   : > { %v959_v54 = vpop.f32.mrb[26].mxu1  ;;  %1025 = vst [vmem:[%s4354_s14 + $0x188] sm:$0xff] %v794_v3  ;;  %1246 = vst [vmem:[#allocation2 + $0xe0] sm:$0xff] %v794_v3 }
 0x239   : > { %1030 = vst [vmem:[%s4354_s14 + $0x1b0] sm:$0xff] %v959_v54  ;;  %v961_v56 = vpop.f32.mrb[27].mxu1  ;;  %2796 = vmatmul.mubr.f32.gmra.mrb[44].mxu0 %v959_v54 }
 0x23a   : > { %1031 = vst [vmem:[%s4354_s14 + $0x1b8] sm:$0xff] %v961_v56  ;;  %2852 = vmatmul.mubr.f32.gmra.mrb[44].mxu1 %v961_v56  ;;  %v798_v4 = vpop.f32.mrb[26].mxu0 }
 0x23b   : > { %1028 = vst [vmem:[%s4354_s14 + $0x1a0] sm:$0xff] %v798_v4  ;;  %1069 = vst [vmem:[#allocation2 + $0x68] sm:$0xff] %v798_v4  ;;  %v800_v5 = vpop.f32.mrb[27].mxu0 }
 0x23c   : > { %v965_v58 = vpop.f32.mrb[28].mxu1  ;;  %1029 = vst [vmem:[%s4354_s14 + $0x1a8] sm:$0xff] %v800_v5  ;;  %1247 = vst [vmem:[#allocation2 + $0xe8] sm:$0xff] %v800_v5 }
 0x23d   : > { %1034 = vst [vmem:[%s4354_s14 + $0x1d0] sm:$0xff] %v965_v58  ;;  %v967_v60 = vpop.f32.mrb[29].mxu1  ;;  %2798 = vmatprep.mubr.f32.mxu0 %v965_v58 }
 0x23e   : > { %1035 = vst [vmem:[%s4354_s14 + $0x1d8] sm:$0xff] %v967_v60  ;;  %2854 = vmatprep.mubr.f32.mxu1 %v967_v60  ;;  %v804_v6 = vpop.f32.mrb[28].mxu0 }
 0x23f   : > { %1032 = vst [vmem:[%s4354_s14 + $0x1c0] sm:$0xff] %v804_v6  ;;  %1070 = vst [vmem:[#allocation2 + $0x70] sm:$0xff] %v804_v6  ;;  %v806_v8 = vpop.f32.mrb[29].mxu0 }
 0x240   : > { %v971_v62 = vpop.f32.mrb[30].mxu1  ;;  %1033 = vst [vmem:[%s4354_s14 + $0x1c8] sm:$0xff] %v806_v8  ;;  %1248 = vst [vmem:[#allocation2 + $0xf0] sm:$0xff] %v806_v8 }
 0x241   : > { %1038 = vst [vmem:[%s4354_s14 + $0x1f0] sm:$0xff] %v971_v62  ;;  %v973_v0 = vpop.f32.mrb[31].mxu1  ;;  %2799 = vmatmul.mubr.f32.gmra.mrb[46].mxu0 %v971_v62 }
 0x242   : > { %1039 = vst [vmem:[%s4354_s14 + $0x1f8] sm:$0xff] %v973_v0  ;;  %2855 = vmatmul.mubr.f32.gmra.mrb[46].mxu1 %v973_v0  ;;  %v810_v9 = vpop.f32.mrb[30].mxu0 }
 0x243   : > { %1036 = vst [vmem:[%s4354_s14 + $0x1e0] sm:$0xff] %v810_v9  ;;  %1071 = vst [vmem:[#allocation2 + $0x78] sm:$0xff] %v810_v9  ;;  %v812_v10 = vpop.f32.mrb[31].mxu0 }
 0x244   : > { %1037 = vst [vmem:[%s4354_s14 + $0x1e8] sm:$0xff] %v812_v10  ;;  %1249 = vst [vmem:[#allocation2 + $0xf8] sm:$0xff] %v812_v10 }
 0x2dc   : > { %v2779_v11 = vpop.f32.mrb[32].mxu0 }
 0x2dd   : > { %1218 = vst [vmem:[#allocation3 + $0x8] sm:$0xff] %v2779_v11  ;;  %v1138_v12 = vpop.f32.mrb[33].mxu0  ;;  %v2835_v7 = vpop.f32.mrb[32].mxu1 }
 0x2de   : > { %1217 = vst [vmem:[#allocation3] sm:$0xff] %v1138_v12  ;;  %1397 = vst [vmem:[#allocation3 + $0x88] sm:$0xff] %v2835_v7  ;;  %v1316_v13 = vpop.f32.mrb[33].mxu1 }
 0x2df   : > { %1396 = vst [vmem:[#allocation3 + $0x80] sm:$0xff] %v1316_v13 }
 0x2e4   : > { %v2782_v14 = vpop.f32.mrb[34].mxu0 }
 0x2e5   : > { %1220 = vst [vmem:[#allocation3 + $0x18] sm:$0xff] %v2782_v14  ;;  %v1148_v15 = vpop.f32.mrb[35].mxu0  ;;  %v2838_v16 = vpop.f32.mrb[34].mxu1 }
 0x2e6   : > { %1219 = vst [vmem:[#allocation3 + $0x10] sm:$0xff] %v1148_v15  ;;  %1399 = vst [vmem:[#allocation3 + $0x98] sm:$0xff] %v2838_v16  ;;  %v1326_v17 = vpop.f32.mrb[35].mxu1 }
 0x2e7   : > { %1398 = vst [vmem:[#allocation3 + $0x90] sm:$0xff] %v1326_v17 }
 0x2ec   : > { %v2785_v18 = vpop.f32.mrb[36].mxu0 }
 0x2ed   : > { %1222 = vst [vmem:[#allocation3 + $0x28] sm:$0xff] %v2785_v18  ;;  %v1158_v19 = vpop.f32.mrb[37].mxu0  ;;  %v2841_v20 = vpop.f32.mrb[36].mxu1 }
 0x2ee   : > { %1221 = vst [vmem:[#allocation3 + $0x20] sm:$0xff] %v1158_v19  ;;  %1401 = vst [vmem:[#allocation3 + $0xa8] sm:$0xff] %v2841_v20  ;;  %v1336_v21 = vpop.f32.mrb[37].mxu1 }
 0x2ef   : > { %1400 = vst [vmem:[#allocation3 + $0xa0] sm:$0xff] %v1336_v21 }
 0x2f4   : > { %v2788_v22 = vpop.f32.mrb[38].mxu0 }
 0x2f5   : > { %1224 = vst [vmem:[#allocation3 + $0x38] sm:$0xff] %v2788_v22  ;;  %v1168_v23 = vpop.f32.mrb[39].mxu0  ;;  %v2844_v24 = vpop.f32.mrb[38].mxu1 }
 0x2f6   : > { %1223 = vst [vmem:[#allocation3 + $0x30] sm:$0xff] %v1168_v23  ;;  %1403 = vst [vmem:[#allocation3 + $0xb8] sm:$0xff] %v2844_v24  ;;  %v1346_v25 = vpop.f32.mrb[39].mxu1 }
 0x2f7   : > { %1402 = vst [vmem:[#allocation3 + $0xb0] sm:$0xff] %v1346_v25 }
 0x2fc   : > { %v2791_v26 = vpop.f32.mrb[40].mxu0 }
 0x2fd   : > { %1226 = vst [vmem:[#allocation3 + $0x48] sm:$0xff] %v2791_v26  ;;  %v1178_v27 = vpop.f32.mrb[41].mxu0  ;;  %v2847_v28 = vpop.f32.mrb[40].mxu1 }
 0x2fe   : > { %1225 = vst [vmem:[#allocation3 + $0x40] sm:$0xff] %v1178_v27  ;;  %1405 = vst [vmem:[#allocation3 + $0xc8] sm:$0xff] %v2847_v28  ;;  %v1356_v29 = vpop.f32.mrb[41].mxu1 }
 0x2ff   : > { %1404 = vst [vmem:[#allocation3 + $0xc0] sm:$0xff] %v1356_v29 }
 0x304   : > { %v2794_v30 = vpop.f32.mrb[42].mxu0 }
 0x305   : > { %1228 = vst [vmem:[#allocation3 + $0x58] sm:$0xff] %v2794_v30  ;;  %v1188_v31 = vpop.f32.mrb[43].mxu0  ;;  %v2850_v32 = vpop.f32.mrb[42].mxu1 }
 0x306   : > { %1227 = vst [vmem:[#allocation3 + $0x50] sm:$0xff] %v1188_v31  ;;  %1407 = vst [vmem:[#allocation3 + $0xd8] sm:$0xff] %v2850_v32  ;;  %v1366_v33 = vpop.f32.mrb[43].mxu1 }
 0x307   : > { %1406 = vst [vmem:[#allocation3 + $0xd0] sm:$0xff] %v1366_v33 }
 0x30c   : > { %v2797_v34 = vpop.f32.mrb[44].mxu0 }
 0x30d   : > { %1230 = vst [vmem:[#allocation3 + $0x68] sm:$0xff] %v2797_v34  ;;  %v1198_v35 = vpop.f32.mrb[45].mxu0  ;;  %v2853_v36 = vpop.f32.mrb[44].mxu1 }
 0x30e   : > { %1229 = vst [vmem:[#allocation3 + $0x60] sm:$0xff] %v1198_v35  ;;  %1409 = vst [vmem:[#allocation3 + $0xe8] sm:$0xff] %v2853_v36  ;;  %v1376_v37 = vpop.f32.mrb[45].mxu1 }
 0x30f   : > { %1408 = vst [vmem:[#allocation3 + $0xe0] sm:$0xff] %v1376_v37 }
 0x314   : > { %v2800_v38 = vpop.f32.mrb[46].mxu0 }
 0x315   : > { %1232 = vst [vmem:[#allocation3 + $0x78] sm:$0xff] %v2800_v38  ;;  %v1208_v39 = vpop.f32.mrb[47].mxu0  ;;  %v2856_v40 = vpop.f32.mrb[46].mxu1 }
 0x316   : > { %1231 = vst [vmem:[#allocation3 + $0x70] sm:$0xff] %v1208_v39  ;;  %1411 = vst [vmem:[#allocation3 + $0xf8] sm:$0xff] %v2856_v40  ;;  %v1386_v41 = vpop.f32.mrb[47].mxu1 }
 0x317   : > { %1410 = vst [vmem:[#allocation3 + $0xf0] sm:$0xff] %v1386_v41 }
 0x318 PF: > { %v1417_v42 = vld [vmem:[#allocation11 + $0x8] sm:$0xff]  ;;  %v1419_v43 = vld [vmem:[#allocation11 + $0x18] sm:$0xff]  ;;  %v1416_v44 = vld [vmem:[#allocation11] sm:$0xff]  ;;  %v3903_v49 = vmov 0.0   ;;  %s4885_s30 = sld [smem:[#allocation47_spill]]  ;;  %s4888_s6 = sld [smem:[#allocation39_spill]] }
 0x319   : > { %v3137_v45 = vpack.c.bf16 %v1419_v43, %v1417_v42  ;;  %v1418_v46 = vld [vmem:[#allocation11 + $0x10] sm:$0xff]  ;;  %v1421_v47 = vld [vmem:[#allocation11 + $0x28] sm:$0xff]  ;;  %v1423_v48 = vld [vmem:[#allocation11 + $0x38] sm:$0xff]  ;;  %1512 = vmatprep.mubr.f32.mxu0 %v3903_v49  ;;  %s2278_s24 = sshll.u32 %s4354_s14, 4  ;;  %s4889_s10 = sld [smem:[#allocation51_spill]]  ;;  %s4630_s24 = int_to_ptr.vmem [resolvable:$true] %s2278_s24 }
 0x31a   : > { %v3139_v50 = vpack.c.bf16 %v1418_v46, %v1416_v44  ;;  %v3141_v51 = vpack.c.bf16 %v1423_v48, %v1421_v47  ;;  %v1420_v52 = vld [vmem:[#allocation11 + $0x20] sm:$0xff]  ;;  %v1422_v53 = vld [vmem:[#allocation11 + $0x30] sm:$0xff]  ;;  %v1425_v54 = vld [vmem:[#allocation11 + $0x48] sm:$0xff]  ;;  %s3714_s12 = scalar_lea.vmem %s4630_s24, 8192  ;;  %s3905_s16 = smov [#allocation17]  }
 0x31b   : > { %3138 = vmatprep.subr.bf16.mxu0 %v3137_v45  ;;  %v1427_v55 = vld [vmem:[#allocation11 + $0x58] sm:$0xff]  ;;  %v3143_v56 = vpack.c.bf16 %v1422_v53, %v1420_v52  ;;  %v1424_v58 = vld [vmem:[#allocation11 + $0x40] sm:$0xff]  ;;  %v1426_v59 = vld [vmem:[#allocation11 + $0x50] sm:$0xff]  ;;  %p3715_p3 = scmp.ne.s32.totalorder %s4630_s24, %s3714_s12  ;;  %s3718_s14 = sshll.u32 %s3905_s16, 4  ;;  %s3719_s14 = int_to_ptr.vmem [resolvable:$false] %s3718_s14 }
 0x31c   : > { %3140 = vmatpush1.bf16.msra.mxu0 %v3139_v50  ;;  %v3145_v57 = vpack.c.bf16 %v1427_v55, %v1425_v54  ;;  %v1429_v60 = vld [vmem:[#allocation11 + $0x68] sm:$0xff]  ;;  %v1431_v61 = vld [vmem:[#allocation11 + $0x78] sm:$0xff]  ;;  %v3147_v62 = vpack.c.bf16 %v1426_v59, %v1424_v58  ;;  %v1428_v0 = vld [vmem:[#allocation11 + $0x60] sm:$0xff]  ;;  %s3720_s29 = scalar_lea.vmem %s3719_s14, 16384  ;;  %p3721_p6 = scmp.lt.s32.totalorder %s4630_s24, %s3719_s14 }
 0x31d   : > { %3142 = vmatprep.subr.bf16.mxu0 %v3141_v51  ;;  %v3149_v63 = vpack.c.bf16 %v1431_v61, %v1429_v60  ;;  %v1430_v1 = vld [vmem:[#allocation11 + $0x70] sm:$0xff]  ;;  %v1433_v2 = vld [vmem:[#allocation11 + $0x88] sm:$0xff]  ;;  %v1435_v3 = vld [vmem:[#allocation11 + $0x98] sm:$0xff]  ;;  %p3722_p11 = scmp.lt.s32.totalorder %s3720_s29, %s3714_s12 }
 0x31e   : > { %v3151_v4 = vpack.c.bf16 %v1430_v1, %v1428_v0  ;;  %v1432_v5 = vld [vmem:[#allocation11 + $0x80] sm:$0xff]  ;;  %v1554_v6 = vld [vmem:[#allocation2] sm:$0xff]  ;;  %v1555_v8 = vld [vmem:[#allocation2 + $0x8] sm:$0xff]  ;;  %v3153_v9 = vpack.c.bf16 %v1435_v3, %v1433_v2  ;;  %p4890_p9 = scmp.ne.s32.totalorder %s4888_s6, 0 }
 0x31f   : > { %v1434_v10 = vld [vmem:[#allocation11 + $0x90] sm:$0xff]  ;;  %v3169_v11 = vpack.c.bf16 %v1555_v8, %v1554_v6  ;;  %v1556_v12 = vld [vmem:[#allocation2 + $0x10] sm:$0xff]  ;;  %v1557_v7 = vld [vmem:[#allocation2 + $0x18] sm:$0xff]  ;;  %p3723_p2 = por %p3722_p11, %p3721_p6 }
 0x320   : > { %3144 = vmatpush1.bf16.msra.mxu0 %v3143_v56  ;;  %v1437_v13 = vld [vmem:[#allocation11 + $0xa8] sm:$0xff]  ;;  %v1439_v14 = vld [vmem:[#allocation11 + $0xb8] sm:$0xff]  ;;  %v3173_v15 = vpack.c.bf16 %v1557_v7, %v1556_v12  ;;  %v3155_v16 = vpack.c.bf16 %v1434_v10, %v1432_v5  ;;  %v1436_v18 = vld [vmem:[#allocation11 + $0xa0] sm:$0xff]  ;;  %p3716_p5 = pnand %p3715_p3, %p4890_p9 }
 0x321   : > { %3146 = vmatprep.subr.bf16.mxu0 %v3145_v57  ;;  %3170 = vmatprep.subr.bf16.mxu1 %v3169_v11  ;;  %v3157_v17 = vpack.c.bf16 %v1439_v14, %v1437_v13  ;;  %v1438_v19 = vld [vmem:[#allocation11 + $0xb0] sm:$0xff]  ;;  %v1441_v20 = vld [vmem:[#allocation11 + $0xc8] sm:$0xff]  ;;  %v1443_v21 = vld [vmem:[#allocation11 + $0xd8] sm:$0xff] }
 0x322   : > { %3172 = vmatpush3.bf16.xpose.msra.mxu1 %v3169_v11  ;;  %v1558_v22 = vld [vmem:[#allocation2 + $0x20] sm:$0xff]  ;;  %v1559_v23 = vld [vmem:[#allocation2 + $0x28] sm:$0xff]  ;;  %v3159_v24 = vpack.c.bf16 %v1438_v19, %v1436_v18  ;;  %v3161_v25 = vpack.c.bf16 %v1443_v21, %v1441_v20  ;;  %v1440_v26 = vld [vmem:[#allocation11 + $0xc0] sm:$0xff]  ;;  %p3717_p4 = pneg %p3716_p5 }
 0x323   : > { %3174 = vmatprep.subr.bf16.mxu1 %v3173_v15  ;;  %v1442_v27 = vld [vmem:[#allocation11 + $0xd0] sm:$0xff]  ;;  %v3177_v28 = vpack.c.bf16 %v1559_v23, %v1558_v22  ;;  %v1445_v29 = vld [vmem:[#allocation11 + $0xe8] sm:$0xff]  ;;  %v1447_v30 = vld [vmem:[#allocation11 + $0xf8] sm:$0xff] }
 0x324   : > { %3148 = vmatpush1.bf16.msra.mxu0 %v3147_v62  ;;  %v3163_v31 = vpack.c.bf16 %v1442_v27, %v1440_v26  ;;  %v3165_v32 = vpack.c.bf16 %v1447_v30, %v1445_v29  ;;  %v1444_v33 = vld [vmem:[#allocation11 + $0xe0] sm:$0xff]  ;;  %v1446_v34 = vld [vmem:[#allocation11 + $0xf0] sm:$0xff]  ;;  %v1571_v36 = vld [vmem:[#allocation2 + $0x88] sm:$0xff]  ;;  %p3724_p10 = pnand %p3723_p2, %p3717_p4 }
 0x325   : > { %3150 = vmatprep.subr.bf16.mxu0 %v3149_v63  ;;  %v1570_v35 = vld [vmem:[#allocation2 + $0x80] sm:$0xff]  ;;  %v1560_v37 = vld [vmem:[#allocation2 + $0x30] sm:$0xff]  ;;  %v1561_v38 = vld [vmem:[#allocation2 + $0x38] sm:$0xff]  ;;  %v3167_v39 = vpack.c.bf16 %v1446_v34, %v1444_v33 }
 0x326   : > { %v3201_v40 = vpack.c.bf16 %v1571_v36, %v1570_v35  ;;  %v3181_v41 = vpack.c.bf16 %v1561_v38, %v1560_v37  ;;  %v1412_v42 = vld [vmem:[%s4320_s20] sm:$0xff]  ;;  %v1563_v44 = vld [vmem:[#allocation2 + $0x48] sm:$0xff]  ;;  %v1572_v45 = vld [vmem:[#allocation2 + $0x90] sm:$0xff] }
 0x327   : > { %v1562_v43 = vld [vmem:[#allocation2 + $0x40] sm:$0xff]  ;;  %v1573_v46 = vld [vmem:[#allocation2 + $0x98] sm:$0xff]  ;;  %v1413_v47 = vld [vmem:[%s4320_s20 + $0x8] sm:$0xff] }
 0x328   : > { %3152 = vmatpush1.bf16.msra.mxu0 %v3151_v4  ;;  %v3185_v48 = vpack.c.bf16 %v1563_v44, %v1562_v43  ;;  %v3205_v50 = vpack.c.bf16 %v1573_v46, %v1572_v45  ;;  %v1414_v51 = vld [vmem:[%s4320_s20 + $0x10] sm:$0xff]  ;;  %v1565_v53 = vld [vmem:[#allocation2 + $0x58] sm:$0xff]  ;;  %v1574_v54 = vld [vmem:[#allocation2 + $0xa0] sm:$0xff] }
 0x329   : > { %3154 = vmatprep.subr.bf16.mxu0 %v3153_v9  ;;  %v1564_v52 = vld [vmem:[#allocation2 + $0x50] sm:$0xff]  ;;  %v1575_v55 = vld [vmem:[#allocation2 + $0xa8] sm:$0xff]  ;;  %v1415_v56 = vld [vmem:[%s4320_s20 + $0x18] sm:$0xff]  ;;  %s4886_s20 = sld [smem:[#allocation33_spill]] }
 0x32a   : > { %3176 = vmatpush3.bf16.xpose.msra.mxu1 %v3173_v15  ;;  %v3189_v57 = vpack.c.bf16 %v1565_v53, %v1564_v52  ;;  %v3209_v58 = vpack.c.bf16 %v1575_v55, %v1574_v54  ;;  %v1566_v59 = vld [vmem:[#allocation2 + $0x60] sm:$0xff]  ;;  %v1567_v60 = vld [vmem:[#allocation2 + $0x68] sm:$0xff]  ;;  %v1576_v61 = vld [vmem:[#allocation2 + $0xb0] sm:$0xff] }
 0x32b   : > { %3178 = vmatprep.subr.bf16.mxu1 %v3177_v28  ;;  %v1577_v62 = vld [vmem:[#allocation2 + $0xb8] sm:$0xff]  ;;  %v3193_v63 = vpack.c.bf16 %v1567_v60, %v1566_v59  ;;  %v1568_v1 = vld [vmem:[#allocation2 + $0x70] sm:$0xff]  ;;  %v1578_v2 = vld [vmem:[#allocation2 + $0xc0] sm:$0xff] }
 0x32c   : > { %3156 = vmatpush1.bf16.msra.mxu0 %v3155_v16  ;;  %v3213_v0 = vpack.c.bf16 %v1577_v62, %v1576_v61  ;;  %v1579_v3 = vld [vmem:[#allocation2 + $0xc8] sm:$0xff]  ;;  %v1580_v6 = vld [vmem:[#allocation2 + $0xd0] sm:$0xff]  ;;  %v1581_v8 = vld [vmem:[#allocation2 + $0xd8] sm:$0xff] }
 0x32d   : > { %3158 = vmatprep.subr.bf16.mxu0 %v3157_v17  ;;  %v3217_v5 = vpack.c.bf16 %v1579_v3, %v1578_v2  ;;  %v3221_v9 = vpack.c.bf16 %v1581_v8, %v1580_v6  ;;  %v1582_v10 = vld [vmem:[#allocation2 + $0xe0] sm:$0xff]  ;;  %v1583_v11 = vld [vmem:[#allocation2 + $0xe8] sm:$0xff]  ;;  %v1584_v7 = vld [vmem:[#allocation2 + $0xf0] sm:$0xff] }
 0x32e   : > { %v3225_v12 = vpack.c.bf16 %v1583_v11, %v1582_v10  ;;  %v1585_v13 = vld [vmem:[#allocation2 + $0xf8] sm:$0xff]  ;;  %v1875_v23 = vld [vmem:[#allocation3] sm:$0xff]  ;;  %v1880_v30 = vld [vmem:[#allocation3 + $0x28] sm:$0xff] }
 0x32f   : > { %v3229_v14 = vpack.c.bf16 %v1585_v13, %v1584_v7  ;;  %v1878_v27 = vld [vmem:[#allocation3 + $0x18] sm:$0xff]  ;;  %v1881_v35 = vld [vmem:[#allocation3 + $0x30] sm:$0xff]  ;;  %v1756_v38 = vld [vmem:[%s4337_s23] sm:$0xff]  ;;  %s2600_s15 = sshll.u32 %s4886_s20, 13  ;;  %s4634_s23 = scalar_lea.sflag [#allocation18], %s481_s28 }
 0x330   : > { %3160 = vmatpush1.bf16.msra.mxu0 %v3159_v24  ;;  %v1876_v24 = vld [vmem:[#allocation3 + $0x8] sm:$0xff]  ;;  %v1882_v36 = vld [vmem:[#allocation3 + $0x38] sm:$0xff]  ;;  %vm1757_vm0 = vnez %v1756_v38  ;;  %v1893_v13 = vld [vmem:[#allocation3 + $0x90] sm:$0xff]  ;;  %s4628_s11 = scalar_lea.hbm %s4889_s10, %s2600_s15 }
 0x331   : > { %3162 = vmatprep.subr.bf16.mxu0 %v3161_v25  ;;  %v1877_v25 = vld [vmem:[#allocation3 + $0x10] sm:$0xff]  ;;  %v3233_v26 = vpack.c.bf16 %v1876_v24, %v1875_v23  ;;  %v3245_v37 = vpack.c.bf16 %v1882_v36, %v1881_v35  ;;  %v1886_v23 = vld [vmem:[#allocation3 + $0x58] sm:$0xff] }
 0x332   : > { %3180 = vmatpush3.bf16.xpose.msra.mxu1 %v3177_v28  ;;  %v1879_v28 = vld [vmem:[#allocation3 + $0x20] sm:$0xff]  ;;  %v3237_v29 = vpack.c.bf16 %v1878_v27, %v1877_v25  ;;  %v1897_v25 = vld [vmem:[#allocation3 + $0xb0] sm:$0xff]  ;;  %v1890_v36 = vld [vmem:[#allocation3 + $0x78] sm:$0xff] }
 0x333   : > { %3182 = vmatprep.subr.bf16.mxu1 %v3181_v41  ;;  %v3241_v34 = vpack.c.bf16 %v1880_v30, %v1879_v28  ;;  %v1887_v28 = vld [vmem:[#allocation3 + $0x60] sm:$0xff]  ;;  %v1889_v35 = vld [vmem:[#allocation3 + $0x70] sm:$0xff] }
 0x334   : > { %3164 = vmatpush1.bf16.msra.mxu0 %v3163_v31  ;;  %v1891_v31 = vld [vmem:[#allocation3 + $0x80] sm:$0xff]  ;;  %v1901_v38 = vld [vmem:[#allocation3 + $0xd0] sm:$0xff] }
 0x335   : > { %3166 = vmatprep.subr.bf16.mxu0 %v3165_v32  ;;  %v1892_v32 = vld [vmem:[#allocation3 + $0x88] sm:$0xff] }
 0x336   : > { %v4491_v33 = vpack.c.bf16 %v1892_v32, %v1891_v31  ;;  %v1899_v31 = vld [vmem:[#allocation3 + $0xc0] sm:$0xff]  ;;  %v1900_v32 = vld [vmem:[#allocation3 + $0xc8] sm:$0xff] }
 0x338   : > { %3168 = vmatpush1.bf16.msra.mxu0 %v3167_v39  ;;  %v3904_v39 = vmov 0  }
 0x339   : > { %3202 = vmatprep.subr.bf16.mxu0 %v3201_v40 }
 0x33a   : > { %3184 = vmatpush3.bf16.xpose.msra.mxu1 %v3181_v41 }
 0x33b   : > { %1513 = vmatmul.mubr.f32.vlgmr.msra.gmra.mrb[0].mxu0 %v1412_v42  ;;  %3186 = vmatprep.subr.bf16.mxu1 %v3185_v48 }
 0x33c   : > { %1518 = vmatprep.mubr.f32.mxu0 %v3903_v49 }
 0x33f   : > { %1519 = vmatmul.mubr.f32.gmra.mrb[2].mxu0 %v1413_v47 }
 0x340   : > { %1524 = vmatprep.mubr.f32.mxu0 %v3903_v49 }
 0x341   : > { %3204 = vmatpush3.bf16.xpose.msra.mxu0 %v3201_v40  ;;  %v1758_v40 = vsel %vm1757_vm0, 16843009, %v3904_v39 }
 0x342   : > { %3206 = vmatprep.subr.bf16.mxu0 %v3205_v50  ;;  %3188 = vmatpush3.bf16.xpose.msra.mxu1 %v3185_v48  ;;  %v1760_v41 = vunpack.c.1.s8 %v1758_v40  ;;  %v1759_v42 = vunpack.c.0.s8 %v1758_v40  ;;  %v1762_v46 = vunpack.c.3.s8 %v1758_v40  ;;  %v1761_v48 = vunpack.c.2.s8 %v1758_v40 }
 0x343   : > { %1525 = vmatmul.mubr.f32.gmra.mrb[4].mxu0 %v1414_v51  ;;  %3190 = vmatprep.subr.bf16.mxu1 %v3189_v57 }
 0x344   : > { %1530 = vmatprep.mubr.f32.mxu0 %v3903_v49  ;;  %v1569_v49 = vld [vmem:[#allocation2 + $0x78] sm:$0xff]  ;;  %v1765_v43 = vpack.c.b16 %v1760_v41, %v1760_v41  ;;  %v1763_v44 = vpack.c.b16 %v1759_v42, %v1759_v42  ;;  %v1767_v51 = vpack.c.b16 %v1761_v48, %v1761_v48  ;;  %v1903_v41 = vld [vmem:[#allocation3 + $0xe0] sm:$0xff]  ;;  %v1904_v42 = vld [vmem:[#allocation3 + $0xe8] sm:$0xff] }
 0x345   : > { %v3197_v4 = vpack.c.bf16 %v1569_v49, %v1568_v1 }
 0x346   : > { %v1766_v45 = vpack.c.b8 %v1765_v43, %v1765_v43  ;;  %v1764_v47 = vpack.c.b8 %v1763_v44, %v1763_v44  ;;  %v1768_v55 = vpack.c.b8 %v1767_v51, %v1767_v51  ;;  %v4557_v43 = vpack.c.bf16 %v1904_v42, %v1903_v41  ;;  %v1905_v44 = vld [vmem:[#allocation3 + $0xf0] sm:$0xff] }
 0x347   : > { %1531 = vmatmul.mubr.f32.gmra.mrb[6].mxu0 %v1415_v56 }
 0x348   : > { %vm1772_vm1 = vnez %v1766_v45  ;;  %vm1771_vm2 = vnez %v1764_v47  ;;  %vm1773_vm4 = vnez %v1768_v55  ;;  %v1906_v45 = vld [vmem:[#allocation3 + $0xf8] sm:$0xff] }
 0x349   : > { %3208 = vmatpush3.bf16.xpose.msra.mxu0 %v3205_v50  ;;  %v1769_v50 = vpack.c.b16 %v1762_v46, %v1762_v46  ;;  %v1776_v52 = vsel %vm1772_vm1, 16843009, %v3904_v39  ;;  %v1775_v53 = vsel %vm1771_vm2, 16843009, %v3904_v39  ;;  %v1777_v60 = vsel %vm1773_vm4, 16843009, %v3904_v39 }
 0x34a   : > { %3210 = vmatprep.subr.bf16.mxu0 %v3209_v58  ;;  %3192 = vmatpush3.bf16.xpose.msra.mxu1 %v3189_v57  ;;  %v1780_v56 = vunpack.c.0.s8 %v1776_v52  ;;  %v1779_v57 = vunpack.c.0.s8 %v1775_v53  ;;  %v4561_v46 = vpack.c.bf16 %v1906_v45, %v1905_v44 }
 0x34b   : > { %3194 = vmatprep.subr.bf16.mxu1 %v3193_v63  ;;  %v1770_v54 = vpack.c.b8 %v1769_v50, %v1769_v50 }
 0x34c   : > { %vm1784_vm5 = vcmp.ne.s32.totalorder %v1780_v56, 0  ;;  %vm1783_vm6 = vcmp.ne.s32.totalorder %v1779_v57, 0 }
 0x34d   : > { %vm1774_vm3 = vnez %v1770_v54 }
 0x351   : > { %3212 = vmatpush3.bf16.xpose.msra.mxu0 %v3209_v58  ;;  %v1778_v58 = vsel %vm1774_vm3, 16843009, %v3904_v39  ;;  %v1902_v39 = vld [vmem:[#allocation3 + $0xd8] sm:$0xff] }
 0x352   : > { %3214 = vmatprep.subr.bf16.mxu0 %v3213_v0  ;;  %3196 = vmatpush3.bf16.xpose.msra.mxu1 %v3193_v63  ;;  %v1782_v2 = vunpack.c.0.s8 %v1778_v58  ;;  %v4552_v40 = vpack.c.bf16 %v1902_v39, %v1901_v38 }
 0x353   : > { %3198 = vmatprep.subr.bf16.mxu1 %v3197_v4 }
 0x354   : > { %vm1786_vm7 = vcmp.ne.s32.totalorder %v1782_v2, 0 }
 0x359   : > { %3216 = vmatpush3.bf16.xpose.msra.mxu0 %v3213_v0 }
 0x35a   : > { %3218 = vmatprep.subr.bf16.mxu0 %v3217_v5  ;;  %3200 = vmatpush3.bf16.xpose.msra.mxu1 %v3197_v4  ;;  %v1781_v4 = vunpack.c.0.s8 %v1777_v60 }
 0x35b   : > { %3234 = vmatprep.subr.bf16.mxu1 %v3233_v26 }
 0x35c   : > { %vm1785_vm8 = vcmp.ne.s32.totalorder %v1781_v4, 0 }
 0x361   : > { %3220 = vmatpush3.bf16.xpose.msra.mxu0 %v3217_v5 }
 0x362   : > { %3222 = vmatprep.subr.bf16.mxu0 %v3221_v9 }
 0x369   : > { %3224 = vmatpush3.bf16.xpose.msra.mxu0 %v3221_v9 }
 0x36a   : > { %3226 = vmatprep.subr.bf16.mxu0 %v3225_v12 }
 0x371   : > { %3228 = vmatpush3.bf16.xpose.msra.mxu0 %v3225_v12 }
 0x372   : > { %3230 = vmatprep.subr.bf16.mxu0 %v3229_v14 }
 0x379   : > { %3232 = vmatpush3.bf16.xpose.msra.mxu0 %v3229_v14  ;;  %v1894_v14 = vld [vmem:[#allocation3 + $0x98] sm:$0xff] }
 0x37a   : > { %3266 = vmatprep.subr.bf16.mxu0 %v4491_v33 }
 0x40e   : > { %v1514_v15 = vpop.f32.mrb[0].mxu0 }
 0x40f   : > { %v1516_v16 = vpop.f32.mrb[1].mxu0  ;;  %2889 = vmatprep.mubr.f32.mxu1 %v1514_v15  ;;  %v4533_v15 = vpack.c.bf16 %v1894_v14, %v1893_v13 }
 0x410   : > { %2927 = vmatprep.mubr.f32.mxu0 %v1516_v16  ;;  %v1883_v16 = vld [vmem:[#allocation3 + $0x40] sm:$0xff] }
 0x412   : > { %v1520_v17 = vpop.f32.mrb[2].mxu0 }
 0x413   : > { %v1522_v18 = vpop.f32.mrb[3].mxu0  ;;  %2890 = vmatmul.mubr.f32.vlgmr.msra.gmra.mrb[0].mxu1 %v1520_v17  ;;  %v1884_v17 = vld [vmem:[#allocation3 + $0x48] sm:$0xff] }
 0x414   : > { %2928 = vmatmul.mubr.f32.vlgmr.msra.gmra.mrb[8].mxu0 %v1522_v18  ;;  %3236 = vmatpush3.bf16.msra.mxu1 %v3233_v26  ;;  %v3249_v18 = vpack.c.bf16 %v1884_v17, %v1883_v16  ;;  %v1898_v26 = vld [vmem:[#allocation3 + $0xb8] sm:$0xff] }
 0x415   : > { %3238 = vmatprep.subr.bf16.mxu1 %v3237_v29  ;;  %3268 = vmatpush3.bf16.msra.mxu0 %v4491_v33  ;;  %v4544_v27 = vpack.c.bf16 %v1898_v26, %v1897_v25 }
 0x416   : > { %v1526_v19 = vpop.f32.mrb[4].mxu0  ;;  %3270 = vmatprep.subr.bf16.mxu0 %v4533_v15 }
 0x417   : > { %v1528_v20 = vpop.f32.mrb[5].mxu0  ;;  %2892 = vmatprep.mubr.f32.mxu1 %v1526_v19  ;;  %v1895_v19 = vld [vmem:[#allocation3 + $0xa0] sm:$0xff] }
 0x418   : > { %2930 = vmatprep.mubr.f32.mxu0 %v1528_v20  ;;  %3240 = vmatpush3.bf16.msra.mxu1 %v3237_v29  ;;  %v1896_v20 = vld [vmem:[#allocation3 + $0xa8] sm:$0xff] }
 0x419   : > { %3242 = vmatprep.subr.bf16.mxu1 %v3241_v34  ;;  %3272 = vmatpush3.bf16.msra.mxu0 %v4533_v15  ;;  %v1888_v29 = vld [vmem:[#allocation3 + $0x68] sm:$0xff] }
 0x41a   : > { %v1532_v21 = vpop.f32.mrb[6].mxu0  ;;  %v3257_v30 = vpack.c.bf16 %v1888_v29, %v1887_v28 }
 0x41b   : > { %2893 = vmatmul.mubr.f32.gmra.mrb[2].mxu1 %v1532_v21  ;;  %v1534_v22 = vpop.f32.mrb[7].mxu0  ;;  %v4539_v21 = vpack.c.bf16 %v1896_v20, %v1895_v19 }
 0x41c   : > { %2931 = vmatmul.mubr.f32.gmra.mrb[10].mxu0 %v1534_v22  ;;  %3244 = vmatpush3.bf16.msra.mxu1 %v3241_v34  ;;  %v1885_v22 = vld [vmem:[#allocation3 + $0x50] sm:$0xff]  ;;  %v4548_v34 = vpack.c.bf16 %v1900_v32, %v1899_v31 }
 0x41d   : > { %3246 = vmatprep.subr.bf16.mxu1 %v3245_v37  ;;  %3274 = vmatprep.subr.bf16.mxu0 %v4539_v21  ;;  %v3253_v24 = vpack.c.bf16 %v1886_v23, %v1885_v22  ;;  %v2581_v22 = vld [vmem:[%s4885_s30] ss:$0 sm:$0xff] }
 0x41e   : > { %3276 = vmatpush3.bf16.msra.mxu0 %v4539_v21 }
 0x41f   : > { %3278 = vmatprep.subr.bf16.mxu0 %v4544_v27 }
 0x420   : > { %3248 = vmatpush3.bf16.msra.mxu1 %v3245_v37  ;;  %v3261_v37 = vpack.c.bf16 %v1890_v36, %v1889_v35 }
 0x421   : > { %3250 = vmatprep.subr.bf16.mxu1 %v3249_v18 }
 0x422   : > { %3280 = vmatpush3.bf16.msra.mxu0 %v4544_v27 }
 0x423   : > { %3282 = vmatprep.subr.bf16.mxu0 %v4548_v34 }
 0x424   : > { %3252 = vmatpush3.bf16.msra.mxu1 %v3249_v18 }
 0x425   : > { %3254 = vmatprep.subr.bf16.mxu1 %v3253_v24 }
 0x426   : > { %3284 = vmatpush3.bf16.msra.mxu0 %v4548_v34 }
 0x427   : > { %3286 = vmatprep.subr.bf16.mxu0 %v4552_v40 }
 0x428   : > { %3256 = vmatpush3.bf16.msra.mxu1 %v3253_v24 }
 0x429   : > { %3258 = vmatprep.subr.bf16.mxu1 %v3257_v30 }
 0x42a   : > { %3288 = vmatpush3.bf16.msra.mxu0 %v4552_v40 }
 0x42b   : > { %3290 = vmatprep.subr.bf16.mxu0 %v4557_v43 }
 0x42c   : > { %3260 = vmatpush3.bf16.msra.mxu1 %v3257_v30 }
 0x42d   : > { %3262 = vmatprep.subr.bf16.mxu1 %v3261_v37 }
 0x42e   : > { %3292 = vmatpush3.bf16.msra.mxu0 %v4557_v43 }
 0x42f   : > { %3294 = vmatprep.subr.bf16.mxu0 %v4561_v46 }
 0x430   : > { %3264 = vmatpush3.bf16.msra.mxu1 %v3261_v37 }
 0x431   : > { %3297 = vmatprep.subr.bf16.mxu1 %v4491_v33 }
 0x432   : > { %3296 = vmatpush3.bf16.msra.mxu0 %v4561_v46 }
 0x4e6   : > { %v2891_v59 = vpop.f32.mrb[0].mxu1 }
 0x4e7   : > { %v4496_v61 = vsel %vm1784_vm5, -60000.0, %v2891_v59  ;;  %v1652_v62 = vpop.f32.mrb[1].mxu1  ;;  %v2929_v63 = vpop.f32.mrb[8].mxu0 }
 0x4e8   : > { %1804 = vst [vmem:[%s4356_s5 + $0x8] sm:$0xff] %v4496_v61  ;;  %v4500_v0 = vsel %vm1783_vm6, -60000.0, %v1652_v62  ;;  %v4502_v1 = vsel %vm1784_vm5, -60000.0, %v2929_v63  ;;  %v1737_v49 = vpop.f32.mrb[9].mxu0 }
 0x4e9   : > { %1803 = vst [vmem:[%s4356_s5] sm:$0xff] %v4500_v0  ;;  %1808 = vst [vmem:[%s4356_s5 + $0x28] sm:$0xff] %v4502_v1  ;;  %v4508_v3 = vsel %vm1783_vm6, -60000.0, %v1737_v49  ;;  %1811 = vmax.xlane.f32.xlu0 %v4500_v0 }
 0x4ea   : > { %1807 = vst [vmem:[%s4356_s5 + $0x20] sm:$0xff] %v4508_v3 }
 0x4ed   : > { %1813 = vmax.xlane.f32.xlu0 %v4496_v61 }
 0x4ee   : > { %v2894_v5 = vpop.f32.mrb[2].mxu1 }
 0x4ef   : > { %v4514_v6 = vsel %vm1786_vm7, -60000.0, %v2894_v5  ;;  %v1662_v8 = vpop.f32.mrb[3].mxu1  ;;  %v2932_v9 = vpop.f32.mrb[10].mxu0 }
 0x4f0   : > { %1806 = vst [vmem:[%s4356_s5 + $0x18] sm:$0xff] %v4514_v6  ;;  %1817 = vmax.xlane.f32.xlu1 %v4514_v6  ;;  %v4519_v10 = vsel %vm1785_vm8, -60000.0, %v1662_v8  ;;  %v4521_v11 = vsel %vm1786_vm7, -60000.0, %v2932_v9  ;;  %v1747_v12 = vpop.f32.mrb[11].mxu0 }
 0x4f1   : > { %1819 = vmax.xlane.f32.xlu0 %v4508_v3  ;;  %1805 = vst [vmem:[%s4356_s5 + $0x10] sm:$0xff] %v4519_v10  ;;  %1810 = vst [vmem:[%s4356_s5 + $0x38] sm:$0xff] %v4521_v11  ;;  %v4528_v7 = vsel %vm1785_vm8, -60000.0, %v1747_v12 }
 0x4f2   : > { %1809 = vst [vmem:[%s4356_s5 + $0x30] sm:$0xff] %v4528_v7 }
 0x4f4   : > { %1815 = vmax.xlane.f32.xlu1 %v4519_v10 }
 0x4f5   : > { %1821 = vmax.xlane.f32.xlu0 %v4502_v1 }
 0x4f8   : > { %1823 = vmax.xlane.f32.xlu1 %v4528_v7 }
 0x4fc   : > { %1825 = vmax.xlane.f32.xlu1 %v4521_v11 }
 0x576   : > { %v1812_v47 = vpop.xlane.xlu0 %1811 }
 0x577   : > { %v1827_v48 = vsub.f32 %v4500_v0, %v1812_v47 }
 0x579   : > { %v1835_v50 = vmul.f32 1.442695, %v1827_v48 }
 0x57a   : > { %v1814_v51 = vpop.xlane.xlu0 %1813 }
 0x57b   : > { %3492 = vpow2.f32 %v1835_v50  ;;  %v1828_v52 = vsub.f32 %v4496_v61, %v1814_v51 }
 0x57d   : > { %v1837_v53 = vmul.f32 1.442695, %v1828_v52  ;;  %v1818_v54 = vpop.xlane.xlu1 %1817 }
 0x57e   : > { %v1830_v55 = vsub.f32 %v4514_v6, %v1818_v54  ;;  %v1820_v56 = vpop.xlane.xlu0 %1819 }
 0x57f   : > { %3494 = vpow2.f32 %v1837_v53  ;;  %v1831_v57 = vsub.f32 %v4508_v3, %v1820_v56 }
 0x580   : > { %v1841_v58 = vmul.f32 1.442695, %v1830_v55 }
 0x581   : > { %v1843_v59 = vmul.f32 1.442695, %v1831_v57  ;;  %v1816_v60 = vpop.xlane.xlu1 %1815 }
 0x582   : > { %v1829_v62 = vsub.f32 %v4519_v10, %v1816_v60  ;;  %v1822_v63 = vpop.xlane.xlu0 %1821 }
 0x583   : > { %3496 = vpow2.f32 %v1843_v59  ;;  %v1832_v0 = vsub.f32 %v4502_v1, %v1822_v63 }
 0x584   : > { %v1839_v49 = vmul.f32 1.442695, %v1829_v62  ;;  %3498 = vpow2.f32 %v1841_v58 }
 0x585   : > { %v3493_v2 = vpop.eup %3492  ;;  %v1845_v61 = vmul.f32 1.442695, %v1832_v0  ;;  %v1824_v4 = vpop.xlane.xlu1 %1823 }
 0x586   : > { %3500 = vpow2.f32 %v1839_v49  ;;  %v1833_v5 = vsub.f32 %v4528_v7, %v1824_v4  ;;  %2965 = vmatprep.mubr.f32.mxu1 %v3493_v2  ;;  %1851 = vadd.xlane.f32.xlu0 %v3493_v2 }
 0x587   : > { %3502 = vpow2.f32 %v1845_v61 }
 0x588   : > { %v1847_v3 = vmul.f32 1.442695, %v1833_v5 }
 0x589   : > { %v3495_v6 = vpop.eup %3494  ;;  %v1826_v8 = vpop.xlane.xlu1 %1825 }
 0x58a   : > { %3504 = vpow2.f32 %v1847_v3  ;;  %v1834_v9 = vsub.f32 %v4521_v11, %v1826_v8  ;;  %2966 = vmatmul.mubr.f32.vlgmr.msra.gmra.mrb[4].mxu1 %v3495_v6  ;;  %1853 = vadd.xlane.f32.xlu1 %v3495_v6 }
 0x58b   : > { %3305 = vmatpush3.bf16.msra.mxu1 %v4491_v33 }
 0x58c   : > { %v1849_v1 = vmul.f32 1.442695, %v1834_v9  ;;  %3298 = vmatprep.subr.bf16.mxu1 %v4533_v15 }
 0x58d   : > { %v3497_v10 = vpop.eup %3496 }
 0x58e   : > { %1859 = vadd.xlane.f32.xlu0 %v3497_v10  ;;  %3003 = vmatprep.mubr.f32.mxu0 %v3497_v10  ;;  %v3499_v12 = vpop.eup %3498  ;;  %3506 = vpow2.f32 %v1849_v1 }
 0x58f   : > { %3306 = vmatpush3.bf16.msra.mxu1 %v4533_v15 }
 0x590   : > { %v3501_v7 = vpop.eup %3500  ;;  %3299 = vmatprep.subr.bf16.mxu1 %v4539_v21 }
 0x591   : > { %v3503_v13 = vpop.eup %3502  ;;  %2968 = vmatprep.mubr.f32.mxu1 %v3501_v7 }
 0x592   : > { %2969 = vmatmul.mubr.f32.gmra.mrb[6].mxu1 %v3499_v12  ;;  %1855 = vadd.xlane.f32.xlu0 %v3501_v7 }
 0x593   : > { %3307 = vmatpush3.bf16.msra.mxu1 %v4539_v21  ;;  %3004 = vmatmul.mubr.f32.vlgmr.msra.gmra.mrb[12].mxu0 %v3503_v13 }
 0x594   : > { %v3505_v33 = vpop.eup %3504  ;;  %1861 = vadd.xlane.f32.xlu1 %v3503_v13  ;;  %3300 = vmatprep.subr.bf16.mxu1 %v4544_v27 }
 0x595   : > { %3006 = vmatprep.mubr.f32.mxu1 %v3505_v33 }
 0x596   : > { %1863 = vadd.xlane.f32.xlu0 %v3505_v33 }
 0x597   : > { %3308 = vmatpush3.bf16.msra.mxu1 %v4544_v27 }
 0x598   : > { %1857 = vadd.xlane.f32.xlu1 %v3499_v12  ;;  %3301 = vmatprep.subr.bf16.mxu1 %v4548_v34  ;;  %v3507_v11 = vpop.eup %3506 }
 0x59b   : > { %3309 = vmatpush3.bf16.msra.mxu1 %v4548_v34 }
 0x59c   : > { %1865 = vadd.xlane.f32.xlu1 %v3507_v11  ;;  %3302 = vmatprep.subr.bf16.mxu1 %v4552_v40 }
 0x59f   : > { %3310 = vmatpush3.bf16.msra.mxu1 %v4552_v40 }
 0x5a0   : > { %3303 = vmatprep.subr.bf16.mxu1 %v4557_v43 }
 0x5a3   : > { %3311 = vmatpush3.bf16.msra.mxu1 %v4557_v43 }
 0x5a4   : > { %3304 = vmatprep.subr.bf16.mxu1 %v4561_v46 }
 0x5a7   : > { %3312 = vmatpush3.bf16.msra.mxu1 %v4561_v46 }
 0x5aa   : > { %3007 = vmatmul.mubr.f32.vlgmr.msra.gmra.mrb[8].mxu1 %v3507_v11 }
 0x613   : > { %v1852_v15 = vpop.xlane.xlu0 %1851 }
 0x617   : > { %v1854_v14 = vpop.xlane.xlu1 %1853 }
 0x618   : > { %3508 = vrcp.f32 %v1854_v14 }
 0x619   : > { %3510 = vrcp.f32 %v1852_v15 }
 0x61b   : > { %v1860_v17 = vpop.xlane.xlu0 %1859 }
 0x61c   : > { %3512 = vrcp.f32 %v1860_v17 }
 0x61f   : > { %v1856_v19 = vpop.xlane.xlu0 %1855 }
 0x621   : > { %v1862_v16 = vpop.xlane.xlu1 %1861 }
 0x622   : > { %3514 = vrcp.f32 %v1862_v16  ;;  %v3509_v20 = vpop.eup %3508 }
 0x623   : > { %v3511_v23 = vpop.eup %3510  ;;  %v1864_v54 = vpop.xlane.xlu0 %1863 }
 0x625   : > { %v1858_v18 = vpop.xlane.xlu1 %1857 }
 0x626   : > { %3516 = vrcp.f32 %v1858_v18  ;;  %v3513_v31 = vpop.eup %3512 }
 0x627   : > { %3518 = vrcp.f32 %v1856_v19 }
 0x629   : > { %v1866_v52 = vpop.xlane.xlu1 %1865 }
 0x62a   : > { %3520 = vrcp.f32 %v1866_v52 }
 0x62b   : > { %3522 = vrcp.f32 %v1864_v54 }
 0x62c   : > { %v3515_v32 = vpop.eup %3514 }
 0x630   : > { %v3517_v35 = vpop.eup %3516 }
 0x631   : > { %v3519_v38 = vpop.eup %3518 }
 0x634   : > { %v3521_v55 = vpop.eup %3520 }
 0x635   : > { %v3523_v57 = vpop.eup %3522 }
 0x65d   : > { %v2967_v21 = vpop.f32.mrb[4].mxu1 }
 0x65e   : > { %v2078_v24 = vmul.f32 %v3509_v20, %v2967_v21  ;;  %v1973_v25 = vpop.f32.mrb[5].mxu1 }
 0x65f   : > { %v2077_v26 = vmul.f32 %v3511_v23, %v1973_v25 }
 0x660   : > { %v2093_v27 = vadd.f32 %v2581_v22, %v2078_v24 }
 0x661   : > { %v2092_v28 = vadd.f32 %v2581_v22, %v2077_v26 }
 0x662   : > { %v2101_v29 = vmax.f32 %v2093_v27, 0.0 }
 0x663   : > { %v2100_v30 = vmax.f32 %v2092_v28, 0.0 }
 0x664   : > { %2110 = vadd.xlane.f32.xlu1 %v2101_v29 }
 0x665   : > { %v2970_v34 = vpop.f32.mrb[6].mxu1  ;;  %2108 = vadd.xlane.f32.xlu0 %v2100_v30 }
 0x666   : > { %v3005_v36 = vpop.f32.mrb[12].mxu0  ;;  %v1983_v37 = vpop.f32.mrb[7].mxu1  ;;  %v2080_v39 = vmul.f32 %v3517_v35, %v2970_v34 }
 0x667   : > { %v2082_v40 = vmul.f32 %v3515_v32, %v3005_v36  ;;  %v2058_v41 = vpop.f32.mrb[13].mxu0  ;;  %v2079_v42 = vmul.f32 %v3519_v38, %v1983_v37 }
 0x668   : > { %v2081_v43 = vmul.f32 %v3513_v31, %v2058_v41  ;;  %v2095_v47 = vadd.f32 %v2581_v22, %v2080_v39 }
 0x669   : > { %v2097_v44 = vadd.f32 %v2581_v22, %v2082_v40  ;;  %v2094_v50 = vadd.f32 %v2581_v22, %v2079_v42 }
 0x66a   : > { %v2096_v45 = vadd.f32 %v2581_v22, %v2081_v43  ;;  %v2103_v51 = vmax.f32 %v2095_v47, 0.0 }
 0x66b   : > { %v2105_v46 = vmax.f32 %v2097_v44, 0.0  ;;  %v2102_v53 = vmax.f32 %v2094_v50, 0.0 }
 0x66c   : > { %v2104_v48 = vmax.f32 %v2096_v45, 0.0 }
 0x66d   : > { %2118 = vadd.xlane.f32.xlu1 %v2105_v46 }
 0x66e   : > { %2116 = vadd.xlane.f32.xlu0 %v2104_v48 }
 0x671   : > { %2114 = vadd.xlane.f32.xlu1 %v2103_v51 }
 0x672   : > { %2112 = vadd.xlane.f32.xlu0 %v2102_v53 }
 0x67d   : > { %v3008_v56 = vpop.f32.mrb[8].mxu1 }
 0x67e   : > { %v2084_v58 = vmul.f32 %v3521_v55, %v3008_v56  ;;  %v2068_v59 = vpop.f32.mrb[9].mxu1 }
 0x67f   : > { %v2083_v60 = vmul.f32 %v3523_v57, %v2068_v59 }
 0x680   : > { %v2099_v62 = vadd.f32 %v2581_v22, %v2084_v58 }
 0x681   : > { %v2098_v63 = vadd.f32 %v2581_v22, %v2083_v60 }
 0x682   : > { %v2107_v0 = vmax.f32 %v2099_v62, 0.0 }
 0x683   : > { %v2106_v49 = vmax.f32 %v2098_v63, 0.0 }
 0x684   : > { %2122 = vadd.xlane.f32.xlu1 %v2107_v0 }
 0x685   : > { %2120 = vadd.xlane.f32.xlu0 %v2106_v49 }
 0x6f1   : > { %v2111_v2 = vpop.xlane.xlu1 %2110 }
 0x6f2   : > { %v2126_v61 = vmul.f32 0.0078125, %v2111_v2  ;;  %v2109_v4 = vpop.xlane.xlu0 %2108 }
 0x6f3   : > { %v2125_v5 = vmul.f32 0.0078125, %v2109_v4 }
 0x6f4   : > { %v4591_v3 = vsub.f32 %v2101_v29, %v2126_v61 }
 0x6f5   : > { %v4593_v6 = vsub.f32 %v2100_v30, %v2125_v5 }
 0x6f6   : > { %v2142_v8 = vmul.f32 %v4591_v3, %v4591_v3 }
 0x6f7   : > { %v2141_v9 = vmul.f32 %v4593_v6, %v4593_v6 }
 0x6f8   : > { %2151 = vadd.xlane.f32.xlu1 %v2142_v8 }
 0x6f9   : > { %2149 = vadd.xlane.f32.xlu0 %v2141_v9 }
 0x6fa   : > { %v2119_v1 = vpop.xlane.xlu1 %2118 }
 0x6fb   : > { %v2130_v10 = vmul.f32 0.0078125, %v2119_v1  ;;  %v2117_v12 = vpop.xlane.xlu0 %2116 }
 0x6fc   : > { %v2129_v7 = vmul.f32 0.0078125, %v2117_v12 }
 0x6fd   : > { %v4599_v13 = vsub.f32 %v2105_v46, %v2130_v10 }
 0x6fe   : > { %v4601_v33 = vsub.f32 %v2104_v48, %v2129_v7  ;;  %v2115_v11 = vpop.xlane.xlu1 %2114 }
 0x6ff   : > { %v2128_v14 = vmul.f32 0.0078125, %v2115_v11  ;;  %v2113_v15 = vpop.xlane.xlu0 %2112  ;;  %v2146_v16 = vmul.f32 %v4599_v13, %v4599_v13 }
 0x700   : > { %v2127_v17 = vmul.f32 0.0078125, %v2113_v15  ;;  %v2145_v18 = vmul.f32 %v4601_v33, %v4601_v33 }
 0x701   : > { %v4607_v19 = vsub.f32 %v2103_v51, %v2128_v14  ;;  %2159 = vadd.xlane.f32.xlu1 %v2146_v16 }
 0x702   : > { %v4609_v20 = vsub.f32 %v2102_v53, %v2127_v17  ;;  %2157 = vadd.xlane.f32.xlu0 %v2145_v18 }
 0x703   : > { %v2144_v21 = vmul.f32 %v4607_v19, %v4607_v19 }
 0x704   : > { %v2143_v22 = vmul.f32 %v4609_v20, %v4609_v20 }
 0x705   : > { %2155 = vadd.xlane.f32.xlu1 %v2144_v21 }
 0x706   : > { %2153 = vadd.xlane.f32.xlu0 %v2143_v22 }
 0x711   : > { %v2123_v23 = vpop.xlane.xlu1 %2122 }
 0x712   : > { %v2132_v24 = vmul.f32 0.0078125, %v2123_v23  ;;  %v2121_v25 = vpop.xlane.xlu0 %2120 }
 0x713   : > { %v2131_v26 = vmul.f32 0.0078125, %v2121_v25 }
 0x714   : > { %v4615_v27 = vsub.f32 %v2107_v0, %v2132_v24 }
 0x715   : > { %v4617_v28 = vsub.f32 %v2106_v49, %v2131_v26 }
 0x716   : > { %v2148_v29 = vmul.f32 %v4615_v27, %v4615_v27 }
 0x717   : > { %v2147_v30 = vmul.f32 %v4617_v28, %v4617_v28 }
 0x718   : > { %2163 = vadd.xlane.f32.xlu1 %v2148_v29 }
 0x719   : > { %2161 = vadd.xlane.f32.xlu0 %v2147_v30 }
 0x71a   : > { %3727 = shalt.err (!%p3724_p10)
}
 0x71b   : > { %s3728_s28 = scalar_lea.hbm %s4628_s11, 8192  ;;  %s3732_s30 = scalar_lea.hbm %s4889_s10, 16384 }
 0x71c   : > { %p3729_p0 = scmp.ne.s32.totalorder %s4628_s11, %s3728_s28  ;;  %p3733_p7 = scmp.lt.u32.totalorder %s4628_s11, %s4889_s10 }
 0x71d   : > { %p3734_p1 = scmp.lt.u32.totalorder %s3732_s30, %s3728_s28  ;;  %p3736_p3 = scmp.lt.u32.totalorder %s3728_s28, %s4628_s11 }
 0x71e   : > { %p3730_p12 = pnand %p3729_p0, %p4890_p9 }
 0x71f   : > { %p3735_p13 = por %p3734_p1, %p3733_p7 }
 0x720   : > { %p3731_p8 = pneg %p3730_p12 }
 0x721   : > { %p3737_p5 = por %p3736_p3, %p3735_p13 }
 0x723   : > { %p3738_p4 = pnand %p3737_p5, %p3731_p8 }
 0x725   : > { %3741 = shalt.err (!%p3738_p4)
}
 0x726   : > { %s3906_s3 = smov 512   ;;  %s3907_s7 = smov 32  }
 0x727   : > { %3332 = dma.vmem_to_hbm [thread:$0]  (%p4890_p9), %s4630_s24, 8192, %s4628_s11, %s4634_s23, %s3906_s3, %s3906_s3, %s3907_s7  }
 0x728   : > { %s4891_s11 = sld [smem:[#allocation48_spill]]  ;;  %s4892_s14 = sld [smem:[#allocation49_spill]] }
 0x729   : > { %s4893_s29 = sld [smem:[#allocation32_spill]]  ;;  %s2589_s1 = sshll.u32 %s4886_s20, 4 }
 0x72a   : > { %s4894_s30 = sld [smem:[#allocation41_spill]]  ;;  %s2262_s15 = sshll.u32 %s4352_s17, 4  ;;  %s4688_s15 = int_to_ptr.vmem [resolvable:$true] %s2262_s15 }
 0x72b   : > { %s4895_s6 = sld [smem:[#allocation50_spill]]  ;;  %s3742_s12 = scalar_lea.vmem %s4688_s15, 1024 }
 0x72c   : > { %p3743_p9 = scmp.ne.s32.totalorder %s4688_s15, %s3742_s12  ;;  %s3908_s16 = smov [#allocation16]  }
 0x72e   : > { %v2582_v48 = vld [vmem:[%s4891_s11] ss:$0 sm:$0xff]  ;;  %s2236_s11 = scalar_lea.sflag [#allocation7], %s4316_s9 }
 0x72f   : > { %v2583_v54 = vld [vmem:[%s4892_s14] ss:$0 sm:$0xff]  ;;  %s2599_s28 = sshll.u32 %s4893_s29, 3  ;;  %s3746_s14 = sshll.u32 %s3908_s16, 4  ;;  %s3747_s14 = int_to_ptr.vmem [resolvable:$false] %s3746_s14 }
 0x730   : > { %s2259_s18 = sadd.s32 %s2599_s28, %s2589_s1  ;;  %p4896_p6 = scmp.ne.s32.totalorder %s4894_s30, 0 }
 0x731   : > { %s2590_s8 = sshll.u32 %s2259_s18, 7  ;;  %s3748_s28 = scalar_lea.vmem %s3747_s14, 2048 }
 0x732   : > { %s4686_s24 = scalar_lea.hbm %s4895_s6, %s2590_s8  ;;  %p3744_p11 = pnand %p3743_p9, %p4896_p6 }
 0x733   : > { %p3749_p10 = scmp.lt.s32.totalorder %s4688_s15, %s3747_s14  ;;  %p3750_p0 = scmp.lt.s32.totalorder %s3748_s28, %s3742_s12 }
 0x734   : > { %p3745_p2 = pneg %p3744_p11 }
 0x735   : > { %p3751_p12 = por %p3750_p0, %p3749_p10 }
 0x737   : > { %p3752_p8 = pnand %p3751_p12, %p3745_p2 }
 0x785   : > { %v2152_v31 = vpop.xlane.xlu1 %2151 }
 0x786   : > { %v2166_v32 = vmul.f32 0.0078125, %v2152_v31  ;;  %v2150_v34 = vpop.xlane.xlu0 %2149 }
 0x787   : > { %v2165_v35 = vmul.f32 0.0078125, %v2150_v34 }
 0x788   : > { %v2174_v36 = vadd.f32 1e-05, %v2166_v32 }
 0x789   : > { %v2173_v37 = vadd.f32 1e-05, %v2165_v35 }
 0x78a   : > { %3524 = vrsqrt.f32 %v2174_v36 }
 0x78b   : > { %3526 = vrsqrt.f32 %v2173_v37 }
 0x78e   : > { %v2160_v38 = vpop.xlane.xlu1 %2159 }
 0x78f   : > { %v2170_v39 = vmul.f32 0.0078125, %v2160_v38  ;;  %v2158_v40 = vpop.xlane.xlu0 %2157 }
 0x790   : > { %v2169_v41 = vmul.f32 0.0078125, %v2158_v40 }
 0x791   : > { %v2178_v42 = vadd.f32 1e-05, %v2170_v39 }
 0x792   : > { %v2177_v43 = vadd.f32 1e-05, %v2169_v41  ;;  %v2156_v44 = vpop.xlane.xlu1 %2155 }
 0x793   : > { %3528 = vrsqrt.f32 %v2178_v42  ;;  %v2168_v45 = vmul.f32 0.0078125, %v2156_v44  ;;  %v2154_v46 = vpop.xlane.xlu0 %2153 }
 0x794   : > { %v3525_v47 = vpop.eup %3524  ;;  %3530 = vrsqrt.f32 %v2177_v43  ;;  %v2167_v50 = vmul.f32 0.0078125, %v2154_v46 }
 0x795   : > { %v3527_v51 = vpop.eup %3526  ;;  %v2190_v52 = vmul.f32 %v3525_v47, %v4591_v3  ;;  %v2176_v53 = vadd.f32 1e-05, %v2168_v45 }
 0x796   : > { %v2189_v55 = vmul.f32 %v3527_v51, %v4593_v6  ;;  %v2175_v56 = vadd.f32 1e-05, %v2167_v50 }
 0x797   : > { %v2205_v57 = vmul.f32 %v2582_v48, %v2190_v52  ;;  %3532 = vrsqrt.f32 %v2176_v53 }
 0x798   : > { %v2204_v58 = vmul.f32 %v2582_v48, %v2189_v55  ;;  %3534 = vrsqrt.f32 %v2175_v56 }
 0x799   : > { %v2220_v59 = vadd.f32 %v2583_v54, %v2205_v57 }
 0x79a   : > { %v2219_v60 = vadd.f32 %v2583_v54, %v2204_v58 }
 0x79b   : > { %2229 = vst [vmem:[%s4352_s17 + $0x10] sm:$0xff] %v2220_v59 }
 0x79c   : > { %2227 = vst [vmem:[%s4352_s17] sm:$0xff] %v2219_v60 }
 0x79d   : > { %v3529_v62 = vpop.eup %3528 }
 0x79e   : > { %v3531_v63 = vpop.eup %3530  ;;  %v2194_v0 = vmul.f32 %v3529_v62, %v4599_v13 }
 0x79f   : > { %v2193_v49 = vmul.f32 %v3531_v63, %v4601_v33 }
 0x7a0   : > { %v2209_v2 = vmul.f32 %v2582_v48, %v2194_v0 }
 0x7a1   : > { %v3533_v61 = vpop.eup %3532  ;;  %v2208_v4 = vmul.f32 %v2582_v48, %v2193_v49 }
 0x7a2   : > { %v3535_v5 = vpop.eup %3534  ;;  %v2224_v3 = vadd.f32 %v2583_v54, %v2209_v2  ;;  %v2192_v6 = vmul.f32 %v3533_v61, %v4607_v19 }
 0x7a3   : > { %v2223_v8 = vadd.f32 %v2583_v54, %v2208_v4  ;;  %v2191_v9 = vmul.f32 %v3535_v5, %v4609_v20 }
 0x7a4   : > { %2230 = vst [vmem:[%s4352_s17 + $0x18] sm:$0xff] %v2224_v3  ;;  %v2207_v1 = vmul.f32 %v2582_v48, %v2192_v6 }
 0x7a5   : > { %2228 = vst [vmem:[%s4352_s17 + $0x8] sm:$0xff] %v2223_v8  ;;  %v2206_v10 = vmul.f32 %v2582_v48, %v2191_v9  ;;  %v2164_v12 = vpop.xlane.xlu1 %2163 }
 0x7a6   : > { %v2222_v7 = vadd.f32 %v2583_v54, %v2207_v1  ;;  %v2172_v13 = vmul.f32 0.0078125, %v2164_v12  ;;  %v2162_v33 = vpop.xlane.xlu0 %2161 }
 0x7a7   : > { %v2221_v11 = vadd.f32 %v2583_v54, %v2206_v10  ;;  %v2171_v14 = vmul.f32 0.0078125, %v2162_v33 }
 0x7a8   : > { %2233 = vst [vmem:[%s4352_s17 + $0x30] sm:$0xff] %v2222_v7  ;;  %v2180_v15 = vadd.f32 1e-05, %v2172_v13 }
 0x7a9   : > { %2231 = vst [vmem:[%s4352_s17 + $0x20] sm:$0xff] %v2221_v11  ;;  %v2179_v16 = vadd.f32 1e-05, %v2171_v14 }
 0x7aa   : > { %3536 = vrsqrt.f32 %v2180_v15 }
 0x7ab   : > { %3538 = vrsqrt.f32 %v2179_v16 }
 0x7b4   : > { %v3537_v17 = vpop.eup %3536 }
 0x7b5   : > { %v3539_v18 = vpop.eup %3538  ;;  %v2196_v19 = vmul.f32 %v3537_v17, %v4615_v27 }
 0x7b6   : > { %v2195_v20 = vmul.f32 %v3539_v18, %v4617_v28 }
 0x7b7   : > { %v2211_v21 = vmul.f32 %v2582_v48, %v2196_v19 }
 0x7b8   : > { %v2210_v22 = vmul.f32 %v2582_v48, %v2195_v20 }
 0x7b9   : > { %v2226_v23 = vadd.f32 %v2583_v54, %v2211_v21 }
 0x7ba   : > { %v2225_v24 = vadd.f32 %v2583_v54, %v2210_v22 }
 0x7bb   : > { %2234 = vst [vmem:[%s4352_s17 + $0x38] sm:$0xff] %v2226_v23 }
 0x7bc   : > { %2232 = vst [vmem:[%s4352_s17 + $0x28] sm:$0xff] %v2225_v24 }
 0x7bd   : > { %3755 = shalt.err (!%p3752_p8)
}
 0x7be   : > { %s3756_s17 = scalar_lea.hbm %s4686_s24, 1024  ;;  %s3760_s3 = scalar_lea.hbm %s4895_s6, 4096 }
 0x7bf   : > { %p3757_p7 = scmp.ne.s32.totalorder %s4686_s24, %s3756_s17  ;;  %p3761_p3 = scmp.lt.u32.totalorder %s4686_s24, %s4895_s6 }
 0x7c0   : > { %p3762_p5 = scmp.lt.u32.totalorder %s3760_s3, %s3756_s17  ;;  %p3764_p9 = scmp.lt.u32.totalorder %s3756_s17, %s4686_s24 }
 0x7c1   : > { %p3758_p1 = pnand %p3757_p7, %p4896_p6 }
 0x7c2   : > { %p3763_p4 = por %p3762_p5, %p3761_p3 }
 0x7c3   : > { %p3759_p13 = pneg %p3758_p1 }
 0x7c4   : > { %p3765_p11 = por %p3764_p9, %p3763_p4 }
 0x7c6   : > { %p3766_p2 = pnand %p3765_p11, %p3759_p13 }
 0x7c8   : > { %3769 = shalt.err (!%p3766_p2)
}
 0x7c9   : > { %s3909_s12 = smov 256   ;;  %s3910_s14 = smov 16  }
 0x7ca   : > { %3331 = dma.vmem_to_hbm [thread:$0]  (%p4896_p6), %s4688_s15, 1024, %s4686_s24, %s2236_s11, %s3909_s12, %s3909_s12, %s3910_s14  }
 0x7cb   : > { %s2593_s28 = sshll.u32 %s4893_s29, 2  ;;  %s2312_s17 = sshll.u32 %s4356_s5, 4  ;;  %s2313_s17 = int_to_ptr.vmem [resolvable:$true] %s2312_s17 }
 0x7cc   : > { %s2293_s18 = sadd.s32 %s2593_s28, %s2589_s1  ;;  %s4897_s15 = sld [smem:[#allocation52_spill]] }
 0x7cd   : > { %s2595_s8 = sshll.u32 %s2293_s18, 7  ;;  %s3911_s11 = smov 512  }
 0x7ce   : > { %3333 = sst [smem:[#allocation21]] (%p4896_p6), %s3911_s11  ;;  %s3912_s7 = smov 1024  }
 0x7cf   : > { %3334 = sst [smem:[#allocation21 + $0x1]] (%p4896_p6), %s3912_s7  ;;  %s3913_s16 = smov 4  }
 0x7d0   : > { %3335 = sst [smem:[#allocation21 + $0x2]] (%p4896_p6), %s3913_s16  ;;  %s3914_s5 = smov 128  }
 0x7d1   : > { %3336 = sst [smem:[#allocation21 + $0x3]] (%p4896_p6), %s3914_s5  ;;  %s3915_s20 = smov 8  }
 0x7d2   : > { %s2295_s24 = scalar_lea.hbm %s4897_s15, %s2595_s8  ;;  %3337 = sst [smem:[#allocation21 + $0x4]] (%p4896_p6), %s3914_s5 }
 0x7d3   : > { %3338 = sst [smem:[#allocation21 + $0x5]] (%p4896_p6), %s3915_s20  ;;  %s3916_s29 = smov [#allocation20]  }
 0x7d4   : > { %s3917_s1 = smov 0  }
 0x7d5   : > { %3339 = dma.general (%p4896_p6), %s2313_s17, 1024, %s2295_s24, %s4634_s23, %s3916_s29, [#allocation21], %s3917_s1, 0  }
 0x7d6 PF: > { %s4898_s12 = sld [smem:[#allocation31_spill]]  ;;  %s4899_s14 = sld [smem:[#allocation37_spill]] }
 0x7d7   : > { %p3380_p10 = scmp.ge.s32.totalorder %s3888_s27, 2 }
 0x7dc   : > { %s2340_s28 = sand.u32 1, %s4898_s12   ;;  %p4900_p0 = scmp.ne.s32.totalorder %s4899_s14, 0 }
 0x7dd   : > { %s2341_s18 = scalar_lea.sflag [#allocation7], %s2340_s28 }
 0x7de   : > { %p3364_p12 = pnand %p3380_p10, %p4900_p0 }
 0x7e0   : > { %3835 = dma.done.wait (!%p3364_p12), %s2341_s18, 1024  }
 0x7e1   : > { %3837 = vsyncadd (!%p3364_p12), %s2341_s18, 4294966272  ;;  %s4901_s8 = sadd.s32 4294967294, %s3888_s27   ;;  %s4902_s3 = sld [smem:[#allocation38_spill]] }
 0x7e2   : > { %s2349_s9 = sand.u32 1, %s4901_s8  }
 0x7e3   : > { %s2350_s15 = scalar_lea.sflag [#allocation18], %s2349_s9 }
 0x7e7   : > { %p4903_p8 = scmp.ne.s32.totalorder %s4902_s3, 0 }
 0x7e9   : > { %p3367_p7 = pnand %p3380_p10, %p4903_p8 }
 0x7eb   : > { %3839 = dma.done.wait (!%p3367_p7), %s2350_s15, 8192  }
 0x7ec   : > { %3841 = vsyncadd (!%p3367_p7), %s2350_s15, 4294959104 }
 0x7ed   : > { %3843 = dma.done.wait (!%p3364_p12), %s2350_s15, 1024  }
 0x7ee   : > { %3845 = vsyncadd (!%p3364_p12), %s2350_s15, 4294966272  ;;  %s36_s27 = sadd.s32 1, %s3888_s27   ;;  %s4904_s17 = sld [smem:[#allocation30_spill]] }
 0x7ef   : > { %p33_p6 = scmp.ge.s32.totalorder %s36_s27, 6   ;;  %s4905_s30 = sld [smem:[#allocation40_spill]] }
 0x7f0   : > { %s4906_s11 = sld [smem:[#allocation42_spill]]  ;;  %s4907_s18 = smov %s3856_s19 }
 0x7f1   : > { %s4908_s19 = smov %s4237_s13  ;;  %s4909_s20 = smov %s3864_s21 }
 0x7f2   : > { %s4910_s21 = smov %s3868_s22  ;;  %s4911_s22 = smov %s4240_s4 }
 0x7f3   : > { %s4912_s23 = smov %s3880_s25  ;;  %s4913_s24 = smov %s3884_s26 }
 0x7f4   :  { %35 = sbr.rel (!%p33_p6) target bundleno = 26 (0x1a), region = 181 }
 0x7f5   : > { %s4914_s25 = smov %s4905_s30 }
 0x7f6   : > { %s4915_s26 = smov %s4906_s11 }
 0x7fb   :  { %2364 = vsyncpa [#allocation6], 1 }
 0x7fc   :  { %2366 = vsyncpa [#allocation6 + $0x1], 1 }
 0x7fd   :  { %2367 = vsyncpa [#allocation9], 1 }
 0x7fe   :  { %2369 = vsyncpa [#allocation9 + $0x1], 1 }
 0x7ff   :  { %2370 = vsyncpa [#allocation12], 1 }
 0x800   :  { %2371 = vsyncpa [#allocation15], 1 }
 0x801   :  { %2372 = vsyncpa [#allocation7], 1 }
 0x802   :  { %2374 = vsyncpa [#allocation7 + $0x1], 1 }
 0x803   :  { %2375 = vsyncpa [#allocation18], 1 }
 0x804   :  { %2377 = vsyncpa [#allocation18 + $0x1], 1 }

</bundles_post_ra>
